<compile_context>
chip_gen: v7x
topology: tpu7x:2x2x1
jax: 0.10.0
libtpu: 0.0.40
codegen_flags: <defaults>
</compile_context>

<pallas_src>
import functools

import jax
import jax.numpy as jnp
from jax.experimental import pallas as pl
from jax.experimental.pallas import tpu as pltpu


CPAD = 128  # all channel counts (64/96/128) padded to one 128-lane tile

_LAYER_DIMS = [  # (cin, cout, leaky_relu_after)
    (64, 96, False), (96, 96, True),      # encoder1
    (96, 128, False), (128, 128, True),   # encoder2
    (128, 96, False), (96, 96, True),     # encoder3
    (96, 64, True), (64, 64, False),      # encoder4 (conv, lrelu, conv, bn)
]
_LRELU = tuple(l for (_, _, l) in _LAYER_DIMS)

_VMEM_LIMIT = 48 * 1024 * 1024  # leaves headroom even on v7x (64 MiB physical)


# ---------------------------------------------------------------------------
# Tiling helpers (static, shape-derived)
# ---------------------------------------------------------------------------
def _pick_row_tile(h, max_tile=32):
    """Largest divisor of h that is <= max_tile, preferring >= 2 tiles."""
    divs = [d for d in range(1, h + 1) if h % d == 0 and d <= max_tile]
    multi = [d for d in divs if h // d >= 2]
    if multi:
        return max(multi)
    return max(divs) if divs else h


def _pick_bn_tile(m, max_tile=1024):
    """Largest multiple-of-8 divisor of m <= max_tile with >= 2 tiles."""
    cand = [d for d in range(8, min(m, max_tile) + 1, 8)
            if m % d == 0 and m // d >= 2]
    return max(cand) if cand else m


# ---------------------------------------------------------------------------
# Pallas kernels
# ---------------------------------------------------------------------------
def _conv3x3_kernel(x_ref, w_ref, b_ref, o_ref, *, rows, cols, cin, cout,
                    neg_slope):
    """3x3 conv on one halo row-tile as 9 accumulated MXU dots.

    x_ref: (rows+2, cols+2, cin)  bf16 (spatially pre-padded halo tile)
    w_ref: (9*cin, cout)          bf16, row index = (dh*3+dw)*cin + ci
    b_ref: (1, cout)              f32
    o_ref: (rows, cols, cout)     bf16
    """
    acc = jnp.zeros((rows * cols, cout), jnp.float32)
    for dh in range(3):
        for dw in range(3):
            win = x_ref[dh:dh + rows, dw:dw + cols, :].reshape(rows * cols, cin)
            wk = w_ref[(dh * 3 + dw) * cin:(dh * 3 + dw + 1) * cin, :]
            acc = acc + jnp.dot(win, wk, preferred_element_type=jnp.float32)
    acc = acc + b_ref[...]                       # (1, cout) broadcasts (f32)
    if neg_slope is not None:
        acc = jnp.where(acc >= 0, acc, neg_slope * acc)
    o_ref[...] = acc.reshape(rows, cols, cout).astype(o_ref.dtype)


def _bn_stats_kernel(x_ref, sum_ref, sq_ref):
    """Accumulate per-channel sum and sum-of-squares over M tiles."""
    @pl.when(pl.program_id(0) == 0)
    def _():
        sum_ref[...] = jnp.zeros_like(sum_ref)
        sq_ref[...] = jnp.zeros_like(sq_ref)
    x = x_ref[...].astype(jnp.float32)                      # (TM, C)
    sum_ref[...] += jnp.sum(x, axis=0, keepdims=True)
    sq_ref[...] += jnp.sum(x * x, axis=0, keepdims=True)


def _bn_apply_kernel(x_ref, scale_ref, shift_ref, o_ref):
    """y = x * scale + shift  (scale/shift fold mean/var/gamma/beta)."""
    x = x_ref[...].astype(jnp.float32)
    o_ref[...] = x * scale_ref[...] + shift_ref[...]


# ---------------------------------------------------------------------------
# Wrappers
# ---------------------------------------------------------------------------
def conv3x3(x_nhwc, w_mat, bias, *, lrelu):
    """3x3 conv, padding=1, stride=1 (optionally fused LeakyReLU(0.2))."""
    N, H, W, C = x_nhwc.shape
    K, Cout = w_mat.shape
    assert K == 9 * C, (K, C)

    TH = _pick_row_tile(H)
    nT = H // TH

    # Spatial zero-pad once, then materialize overlapping halo row-tiles
    # (cheap ~(TH+2)/TH duplication, replaces the old 9x im2col expansion).
    xp = jnp.pad(x_nhwc, ((0, 0), (1, 1), (1, 1), (0, 0)))
    xt = jnp.stack([xp[:, t * TH:t * TH + TH + 2] for t in range(nT)], axis=1)
    # xt: (N, nT, TH+2, W+2, C)

    kern = functools.partial(_conv3x3_kernel, rows=TH, cols=W, cin=C,
                             cout=Cout, neg_slope=0.2 if lrelu else None)

    flops = 2 * N * H * W * K * Cout
    bytes_accessed = (xt.size * xt.dtype.itemsize
                      + w_mat.size * w_mat.dtype.itemsize
                      + bias.size * bias.dtype.itemsize
                      + N * H * W * Cout * 2)

    out = pl.pallas_call(
        kern,
        out_shape=jax.ShapeDtypeStruct((N, H, W, Cout), jnp.bfloat16),
        grid=(N, nT),
        in_specs=[
            # leading None dims are squeezed out of the kernel view
            pl.BlockSpec((None, None, TH + 2, W + 2, C),
                         lambda n, t: (n, t, 0, 0, 0)),
            pl.BlockSpec((K, Cout), lambda n, t: (0, 0)),   # weight resident
            pl.BlockSpec((1, Cout), lambda n, t: (0, 0)),   # bias resident
        ],
        out_specs=pl.BlockSpec((None, TH, W, Cout), lambda n, t: (n, t, 0, 0)),
        compiler_params=pltpu.CompilerParams(
            dimension_semantics=("parallel", "parallel"),
            vmem_limit_bytes=_VMEM_LIMIT),
        cost_estimate=pl.CostEstimate(flops=flops, transcendentals=0,
                                      bytes_accessed=bytes_accessed),
    )(xt, w_mat, bias)
    return out


def batchnorm2d(x_nhwc, gamma, beta, eps=1e-5):
    """BatchNorm2d with batch statistics (PyTorch training-mode forward)."""
    N, H, W, C = x_nhwc.shape
    M = N * H * W
    xf = x_nhwc.reshape(M, C)
    TM = _pick_bn_tile(M)
    nM = M // TM

    # Pass 1: tiled per-channel sum / sum-of-squares accumulation.
    s, ss = pl.pallas_call(
        _bn_stats_kernel,
        out_shape=(jax.ShapeDtypeStruct((1, C), jnp.float32),
                   jax.ShapeDtypeStruct((1, C), jnp.float32)),
        grid=(nM,),
        in_specs=[pl.BlockSpec((TM, C), lambda i: (i, 0))],
        out_specs=(pl.BlockSpec((1, C), lambda i: (0, 0)),
                   pl.BlockSpec((1, C), lambda i: (0, 0))),
        compiler_params=pltpu.CompilerParams(
            dimension_semantics=("arbitrary",),
            vmem_limit_bytes=_VMEM_LIMIT),
    )(xf)

    # Tiny (1, C) scalar math to fold stats into scale/shift (XLA glue).
    mean = s / M
    var = ss / M - mean * mean                 # biased variance (training mode)
    scale = gamma * jax.lax.rsqrt(var + eps)
    shift = beta - mean * scale

    # Pass 2: tiled, fully parallel normalization.
    out = pl.pallas_call(
        _bn_apply_kernel,
        out_shape=jax.ShapeDtypeStruct((M, C), jnp.float32),
        grid=(nM,),
        in_specs=[pl.BlockSpec((TM, C), lambda i: (i, 0)),
                  pl.BlockSpec((1, C), lambda i: (0, 0)),
                  pl.BlockSpec((1, C), lambda i: (0, 0))],
        out_specs=pl.BlockSpec((TM, C), lambda i: (i, 0)),
        compiler_params=pltpu.CompilerParams(
            dimension_semantics=("parallel",),
            vmem_limit_bytes=_VMEM_LIMIT),
    )(xf, scale, shift)
    return out.reshape(N, H, W, C)


# ---------------------------------------------------------------------------
# Parameter init (deterministic, PyTorch-default-like uniform bounds),
# zero-padded to CPAD channels so every layer is 128 -> 128 lane-dense.
# ---------------------------------------------------------------------------
def _init_conv(key, cin, cout):
    kw, kb = jax.random.split(key)
    bound = 1.0 / (cin * 9) ** 0.5
    w = jax.random.uniform(kw, (3, 3, cin, cout), jnp.float32, -bound, bound)
    b = jax.random.uniform(kb, (cout,), jnp.float32, -bound, bound)
    wp = jnp.zeros((3, 3, CPAD, CPAD), jnp.float32).at[:, :, :cin, :cout].set(w)
    bp = jnp.zeros((1, CPAD), jnp.float32).at[0, :cout].set(b)
    # row index = (dh*3 + dw)*CPAD + c_in  -> matches kernel weight slicing
    return wp.reshape(9 * CPAD, CPAD).astype(jnp.bfloat16), bp


def init_dn1_params(key):
    keys = jax.random.split(key, len(_LAYER_DIMS))
    conv_w, conv_b = [], []
    for (cin, cout, _), k in zip(_LAYER_DIMS, keys):
        w, b = _init_conv(k, cin, cout)
        conv_w.append(w)
        conv_b.append(b)
    gamma = jnp.zeros((1, CPAD), jnp.float32).at[0, :64].set(1.0)
    beta = jnp.zeros((1, CPAD), jnp.float32)
    return {"conv_w": tuple(conv_w), "conv_b": tuple(conv_b),
            "bn_gamma": gamma, "bn_beta": beta}


# ---------------------------------------------------------------------------
# Full forward (matches Dn1.forward)
# ---------------------------------------------------------------------------
# TODO(synk): per-encoder conv->lrelu->conv fusion (intermediate tile kept in
# VMEM scratch with a 2-row halo) would halve the remaining inter-layer HBM
# traffic; kept as per-layer kernels here.
@jax.jit
def dn1_forward(x_nchw, params):
    N, C, H, W = x_nchw.shape
    h = jnp.transpose(x_nchw, (0, 2, 3, 1))                   # NCHW -> NHWC
    h = jnp.pad(h, ((0, 0), (0, 0), (0, 0), (0, CPAD - C)))   # channel-pad
    h = h.astype(jnp.bfloat16)
    for w_mat, b, lrelu in zip(params["conv_w"], params["conv_b"], _LRELU):
        h = conv3x3(h, w_mat, b, lrelu=lrelu)
    y = batchnorm2d(h, params["bn_gamma"], params["bn_beta"])  # f32
    y = y[..., :64]                                            # drop channel pad
    return jnp.transpose(y, (0, 3, 1, 2))                      # NHWC -> NCHW


if __name__ == "__main__":
    key = jax.random.PRNGKey(0)
    kx, kp = jax.random.split(key)
    # Small shape consistent with the module: Conv2d(64, ...) -> 64 channels.
    x = jax.random.normal(kx, (2, 64, 16, 16), dtype=jnp.float32)
    params = init_dn1_params(kp)

    out = jax.block_until_ready(dn1_forward(x, params))
    assert out.shape == (2, 64, 16, 16), out.shape
    assert bool(jnp.all(jnp.isfinite(out)))
    print("KERNEL_OK")
</pallas_src>

<mosaic_0001>
module attributes {stable_mosaic.version = 11 : i64} {
  func.func @_conv3x3_kernel(%arg0: i32, %arg1: i32, %arg2: memref<1x1x10x18x128xbf16, #tpu.memory_space<vmem>>, %arg3: memref<1152x128xbf16, #tpu.memory_space<vmem>>, %arg4: memref<1x128xf32, #tpu.memory_space<vmem>>, %arg5: memref<1x8x16x128xbf16, #tpu.memory_space<vmem>>) attributes {dimension_semantics = [#tpu.dimension_semantics<parallel>, #tpu.dimension_semantics<parallel>], iteration_bounds = array<i64: 2, 2>, scalar_prefetch = 0 : i64, scratch_operands = 0 : i64, tpu.core_type = #tpu.core_type<tc>, window_params = [{transform_indices = @transform_0, window_bounds = array<i64: 1, 1, 10, 18, 128>}, {pipeline_mode = #tpu.pipeline_mode<synchronous>, transform_indices = @transform_1, window_bounds = array<i64: 1152, 128>}, {pipeline_mode = #tpu.pipeline_mode<synchronous>, transform_indices = @transform_2, window_bounds = array<i64: 1, 128>}, {transform_indices = @transform_3, window_bounds = array<i64: 1, 8, 16, 128>}]} {
    %cst = arith.constant 0.000000e+00 : f32
    %0 = vector.broadcast %cst : f32 to vector<128x128xf32>
    %c0 = arith.constant 0 : index
    %c0_0 = arith.constant 0 : index
    %c0_1 = arith.constant 0 : index
    %c0_2 = arith.constant 0 : index
    %c0_3 = arith.constant 0 : index
    %1 = vector.load %arg2[%c0, %c0_0, %c0_1, %c0_2, %c0_3] : memref<1x1x10x18x128xbf16, #tpu.memory_space<vmem>>, vector<1x1x8x16x128xbf16>
    %2 = vector.shape_cast %1 : vector<1x1x8x16x128xbf16> to vector<8x16x128xbf16>
    %3 = vector.shape_cast %2 : vector<8x16x128xbf16> to vector<128x128xbf16>
    %c0_4 = arith.constant 0 : index
    %c0_5 = arith.constant 0 : index
    %4 = vector.load %arg3[%c0_4, %c0_5] : memref<1152x128xbf16, #tpu.memory_space<vmem>>, vector<128x128xbf16>
    %cst_6 = arith.constant dense<0.000000e+00> : vector<128x128xf32>
    %5 = tpu.matmul %3, %4, %cst_6 {dimension_numbers = #tpu.dot_dimension_numbers<[1], [0], [0], [1], [0, 0, 1, 1], [], []>} : vector<128x128xbf16>, vector<128x128xbf16>, vector<128x128xf32> -> vector<128x128xf32>
    %6 = arith.addf %0, %5 : vector<128x128xf32>
    %c0_7 = arith.constant 0 : index
    %c0_8 = arith.constant 0 : index
    %c0_9 = arith.constant 0 : index
    %c1 = arith.constant 1 : index
    %c0_10 = arith.constant 0 : index
    %7 = vector.load %arg2[%c0_7, %c0_8, %c0_9, %c1, %c0_10] : memref<1x1x10x18x128xbf16, #tpu.memory_space<vmem>>, vector<1x1x8x16x128xbf16>
    %8 = vector.shape_cast %7 : vector<1x1x8x16x128xbf16> to vector<8x16x128xbf16>
    %9 = vector.shape_cast %8 : vector<8x16x128xbf16> to vector<128x128xbf16>
    %c128 = arith.constant 128 : index
    %c0_11 = arith.constant 0 : index
    %10 = vector.load %arg3[%c128, %c0_11] : memref<1152x128xbf16, #tpu.memory_space<vmem>>, vector<128x128xbf16>
    %cst_12 = arith.constant dense<0.000000e+00> : vector<128x128xf32>
    %11 = tpu.matmul %9, %10, %cst_12 {dimension_numbers = #tpu.dot_dimension_numbers<[1], [0], [0], [1], [0, 0, 1, 1], [], []>} : vector<128x128xbf16>, vector<128x128xbf16>, vector<128x128xf32> -> vector<128x128xf32>
    %12 = arith.addf %6, %11 : vector<128x128xf32>
    %c0_13 = arith.constant 0 : index
    %c0_14 = arith.constant 0 : index
    %c0_15 = arith.constant 0 : index
    %c2 = arith.constant 2 : index
    %c0_16 = arith.constant 0 : index
    %13 = vector.load %arg2[%c0_13, %c0_14, %c0_15, %c2, %c0_16] : memref<1x1x10x18x128xbf16, #tpu.memory_space<vmem>>, vector<1x1x8x16x128xbf16>
    %14 = vector.shape_cast %13 : vector<1x1x8x16x128xbf16> to vector<8x16x128xbf16>
    %15 = vector.shape_cast %14 : vector<8x16x128xbf16> to vector<128x128xbf16>
    %c256 = arith.constant 256 : index
    %c0_17 = arith.constant 0 : index
    %16 = vector.load %arg3[%c256, %c0_17] : memref<1152x128xbf16, #tpu.memory_space<vmem>>, vector<128x128xbf16>
    %cst_18 = arith.constant dense<0.000000e+00> : vector<128x128xf32>
    %17 = tpu.matmul %15, %16, %cst_18 {dimension_numbers = #tpu.dot_dimension_numbers<[1], [0], [0], [1], [0, 0, 1, 1], [], []>} : vector<128x128xbf16>, vector<128x128xbf16>, vector<128x128xf32> -> vector<128x128xf32>
    %18 = arith.addf %12, %17 : vector<128x128xf32>
    %c0_19 = arith.constant 0 : index
    %c0_20 = arith.constant 0 : index
    %c1_21 = arith.constant 1 : index
    %c0_22 = arith.constant 0 : index
    %c0_23 = arith.constant 0 : index
    %19 = vector.load %arg2[%c0_19, %c0_20, %c1_21, %c0_22, %c0_23] : memref<1x1x10x18x128xbf16, #tpu.memory_space<vmem>>, vector<1x1x8x16x128xbf16>
    %20 = vector.shape_cast %19 : vector<1x1x8x16x128xbf16> to vector<8x16x128xbf16>
    %21 = vector.shape_cast %20 : vector<8x16x128xbf16> to vector<128x128xbf16>
    %c384 = arith.constant 384 : index
    %c0_24 = arith.constant 0 : index
    %22 = vector.load %arg3[%c384, %c0_24] : memref<1152x128xbf16, #tpu.memory_space<vmem>>, vector<128x128xbf16>
    %cst_25 = arith.constant dense<0.000000e+00> : vector<128x128xf32>
    %23 = tpu.matmul %21, %22, %cst_25 {dimension_numbers = #tpu.dot_dimension_numbers<[1], [0], [0], [1], [0, 0, 1, 1], [], []>} : vector<128x128xbf16>, vector<128x128xbf16>, vector<128x128xf32> -> vector<128x128xf32>
    %24 = arith.addf %18, %23 : vector<128x128xf32>
    %c0_26 = arith.constant 0 : index
    %c0_27 = arith.constant 0 : index
    %c1_28 = arith.constant 1 : index
    %c1_29 = arith.constant 1 : index
    %c0_30 = arith.constant 0 : index
    %25 = vector.load %arg2[%c0_26, %c0_27, %c1_28, %c1_29, %c0_30] : memref<1x1x10x18x128xbf16, #tpu.memory_space<vmem>>, vector<1x1x8x16x128xbf16>
    %26 = vector.shape_cast %25 : vector<1x1x8x16x128xbf16> to vector<8x16x128xbf16>
    %27 = vector.shape_cast %26 : vector<8x16x128xbf16> to vector<128x128xbf16>
    %c512 = arith.constant 512 : index
    %c0_31 = arith.constant 0 : index
    %28 = vector.load %arg3[%c512, %c0_31] : memref<1152x128xbf16, #tpu.memory_space<vmem>>, vector<128x128xbf16>
    %cst_32 = arith.constant dense<0.000000e+00> : vector<128x128xf32>
    %29 = tpu.matmul %27, %28, %cst_32 {dimension_numbers = #tpu.dot_dimension_numbers<[1], [0], [0], [1], [0, 0, 1, 1], [], []>} : vector<128x128xbf16>, vector<128x128xbf16>, vector<128x128xf32> -> vector<128x128xf32>
    %30 = arith.addf %24, %29 : vector<128x128xf32>
    %c0_33 = arith.constant 0 : index
    %c0_34 = arith.constant 0 : index
    %c1_35 = arith.constant 1 : index
    %c2_36 = arith.constant 2 : index
    %c0_37 = arith.constant 0 : index
    %31 = vector.load %arg2[%c0_33, %c0_34, %c1_35, %c2_36, %c0_37] : memref<1x1x10x18x128xbf16, #tpu.memory_space<vmem>>, vector<1x1x8x16x128xbf16>
    %32 = vector.shape_cast %31 : vector<1x1x8x16x128xbf16> to vector<8x16x128xbf16>
    %33 = vector.shape_cast %32 : vector<8x16x128xbf16> to vector<128x128xbf16>
    %c640 = arith.constant 640 : index
    %c0_38 = arith.constant 0 : index
    %34 = vector.load %arg3[%c640, %c0_38] : memref<1152x128xbf16, #tpu.memory_space<vmem>>, vector<128x128xbf16>
    %cst_39 = arith.constant dense<0.000000e+00> : vector<128x128xf32>
    %35 = tpu.matmul %33, %34, %cst_39 {dimension_numbers = #tpu.dot_dimension_numbers<[1], [0], [0], [1], [0, 0, 1, 1], [], []>} : vector<128x128xbf16>, vector<128x128xbf16>, vector<128x128xf32> -> vector<128x128xf32>
    %36 = arith.addf %30, %35 : vector<128x128xf32>
    %c0_40 = arith.constant 0 : index
    %c0_41 = arith.constant 0 : index
    %c2_42 = arith.constant 2 : index
    %c0_43 = arith.constant 0 : index
    %c0_44 = arith.constant 0 : index
    %37 = vector.load %arg2[%c0_40, %c0_41, %c2_42, %c0_43, %c0_44] : memref<1x1x10x18x128xbf16, #tpu.memory_space<vmem>>, vector<1x1x8x16x128xbf16>
    %38 = vector.shape_cast %37 : vector<1x1x8x16x128xbf16> to vector<8x16x128xbf16>
    %39 = vector.shape_cast %38 : vector<8x16x128xbf16> to vector<128x128xbf16>
    %c768 = arith.constant 768 : index
    %c0_45 = arith.constant 0 : index
    %40 = vector.load %arg3[%c768, %c0_45] : memref<1152x128xbf16, #tpu.memory_space<vmem>>, vector<128x128xbf16>
    %cst_46 = arith.constant dense<0.000000e+00> : vector<128x128xf32>
    %41 = tpu.matmul %39, %40, %cst_46 {dimension_numbers = #tpu.dot_dimension_numbers<[1], [0], [0], [1], [0, 0, 1, 1], [], []>} : vector<128x128xbf16>, vector<128x128xbf16>, vector<128x128xf32> -> vector<128x128xf32>
    %42 = arith.addf %36, %41 : vector<128x128xf32>
    %c0_47 = arith.constant 0 : index
    %c0_48 = arith.constant 0 : index
    %c2_49 = arith.constant 2 : index
    %c1_50 = arith.constant 1 : index
    %c0_51 = arith.constant 0 : index
    %43 = vector.load %arg2[%c0_47, %c0_48, %c2_49, %c1_50, %c0_51] : memref<1x1x10x18x128xbf16, #tpu.memory_space<vmem>>, vector<1x1x8x16x128xbf16>
    %44 = vector.shape_cast %43 : vector<1x1x8x16x128xbf16> to vector<8x16x128xbf16>
    %45 = vector.shape_cast %44 : vector<8x16x128xbf16> to vector<128x128xbf16>
    %c896 = arith.constant 896 : index
    %c0_52 = arith.constant 0 : index
    %46 = vector.load %arg3[%c896, %c0_52] : memref<1152x128xbf16, #tpu.memory_space<vmem>>, vector<128x128xbf16>
    %cst_53 = arith.constant dense<0.000000e+00> : vector<128x128xf32>
    %47 = tpu.matmul %45, %46, %cst_53 {dimension_numbers = #tpu.dot_dimension_numbers<[1], [0], [0], [1], [0, 0, 1, 1], [], []>} : vector<128x128xbf16>, vector<128x128xbf16>, vector<128x128xf32> -> vector<128x128xf32>
    %48 = arith.addf %42, %47 : vector<128x128xf32>
    %c0_54 = arith.constant 0 : index
    %c0_55 = arith.constant 0 : index
    %c2_56 = arith.constant 2 : index
    %c2_57 = arith.constant 2 : index
    %c0_58 = arith.constant 0 : index
    %49 = vector.load %arg2[%c0_54, %c0_55, %c2_56, %c2_57, %c0_58] : memref<1x1x10x18x128xbf16, #tpu.memory_space<vmem>>, vector<1x1x8x16x128xbf16>
    %50 = vector.shape_cast %49 : vector<1x1x8x16x128xbf16> to vector<8x16x128xbf16>
    %51 = vector.shape_cast %50 : vector<8x16x128xbf16> to vector<128x128xbf16>
    %c1024 = arith.constant 1024 : index
    %c0_59 = arith.constant 0 : index
    %52 = vector.load %arg3[%c1024, %c0_59] : memref<1152x128xbf16, #tpu.memory_space<vmem>>, vector<128x128xbf16>
    %cst_60 = arith.constant dense<0.000000e+00> : vector<128x128xf32>
    %53 = tpu.matmul %51, %52, %cst_60 {dimension_numbers = #tpu.dot_dimension_numbers<[1], [0], [0], [1], [0, 0, 1, 1], [], []>} : vector<128x128xbf16>, vector<128x128xbf16>, vector<128x128xf32> -> vector<128x128xf32>
    %54 = arith.addf %48, %53 : vector<128x128xf32>
    %c0_61 = arith.constant 0 : index
    %c0_62 = arith.constant 0 : index
    %55 = vector.load %arg4[%c0_61, %c0_62] : memref<1x128xf32, #tpu.memory_space<vmem>>, vector<1x128xf32>
    %56 = vector.broadcast %55 : vector<1x128xf32> to vector<128x128xf32>
    %57 = arith.addf %54, %56 : vector<128x128xf32>
    %58 = vector.shape_cast %57 : vector<128x128xf32> to vector<8x16x128xf32>
    %59 = arith.truncf %58 : vector<8x16x128xf32> to vector<8x16x128xbf16>
    %c0_63 = arith.constant 0 : index
    %c0_64 = arith.constant 0 : index
    %c0_65 = arith.constant 0 : index
    %c0_66 = arith.constant 0 : index
    %60 = vector.load %arg5[%c0_63, %c0_64, %c0_65, %c0_66] : memref<1x8x16x128xbf16, #tpu.memory_space<vmem>>, vector<1x8x16x128xbf16>
    %61 = vector.shape_cast %60 : vector<1x8x16x128xbf16> to vector<8x16x128xbf16>
    %62 = vector.shape_cast %59 : vector<8x16x128xbf16> to vector<1x8x16x128xbf16>
    tpu.vector_store %arg5[%c0_63, %c0_64, %c0_65, %c0_66], %62 {strides = array<i32>} : memref<1x8x16x128xbf16, #tpu.memory_space<vmem>>, vector<1x8x16x128xbf16>,
    return
  }
  func.func @transform_0(%arg0: i32, %arg1: i32) -> (i32, i32, i32, i32, i32) {
    %c0_i32 = arith.constant 0 : i32
    %c0_i32_0 = arith.constant 0 : i32
    %c0_i32_1 = arith.constant 0 : i32
    %c0_i32_2 = arith.constant 0 : i32
    return %arg0, %arg1, %c0_i32, %c0_i32_0, %c0_i32_1 : i32, i32, i32, i32, i32
  }
  func.func @transform_1(%arg0: i32, %arg1: i32) -> (i32, i32) {
    %c0_i32 = arith.constant 0 : i32
    %c0_i32_0 = arith.constant 0 : i32
    %c0_i32_1 = arith.constant 0 : i32
    return %c0_i32, %c0_i32_0 : i32, i32
  }
  func.func @transform_2(%arg0: i32, %arg1: i32) -> (i32, i32) {
    %c0_i32 = arith.constant 0 : i32
    %c0_i32_0 = arith.constant 0 : i32
    %c0_i32_1 = arith.constant 0 : i32
    return %c0_i32, %c0_i32_0 : i32, i32
  }
  func.func @transform_3(%arg0: i32, %arg1: i32) -> (i32, i32, i32, i32) {
    %c0_i32 = arith.constant 0 : i32
    %c0_i32_0 = arith.constant 0 : i32
    %c0_i32_1 = arith.constant 0 : i32
    return %arg0, %arg1, %c0_i32, %c0_i32_0 : i32, i32, i32, i32
  }
}

module attributes {stable_mosaic.version = 11 : i64} {
  func.func @_conv3x3_kernel(%arg0: i32, %arg1: i32, %arg2: memref<1x1x10x18x128xbf16, #tpu.memory_space<vmem>>, %arg3: memref<1152x128xbf16, #tpu.memory_space<vmem>>, %arg4: memref<1x128xf32, #tpu.memory_space<vmem>>, %arg5: memref<1x8x16x128xbf16, #tpu.memory_space<vmem>>) attributes {dimension_semantics = [#tpu.dimension_semantics<parallel>, #tpu.dimension_semantics<parallel>], iteration_bounds = array<i64: 2, 2>, scalar_prefetch = 0 : i64, scratch_operands = 0 : i64, tpu.core_type = #tpu.core_type<tc>, window_params = [{transform_indices = @transform_0, window_bounds = array<i64: 1, 1, 10, 18, 128>}, {pipeline_mode = #tpu.pipeline_mode<synchronous>, transform_indices = @transform_1, window_bounds = array<i64: 1152, 128>}, {pipeline_mode = #tpu.pipeline_mode<synchronous>, transform_indices = @transform_2, window_bounds = array<i64: 1, 128>}, {transform_indices = @transform_3, window_bounds = array<i64: 1, 8, 16, 128>}]} {
    %cst = arith.constant 0.000000e+00 : f32
    %0 = vector.broadcast %cst : f32 to vector<128x128xf32>
    %c0 = arith.constant 0 : index
    %c0_0 = arith.constant 0 : index
    %c0_1 = arith.constant 0 : index
    %c0_2 = arith.constant 0 : index
    %c0_3 = arith.constant 0 : index
    %1 = vector.load %arg2[%c0, %c0_0, %c0_1, %c0_2, %c0_3] : memref<1x1x10x18x128xbf16, #tpu.memory_space<vmem>>, vector<1x1x8x16x128xbf16>
    %2 = vector.shape_cast %1 : vector<1x1x8x16x128xbf16> to vector<8x16x128xbf16>
    %3 = vector.shape_cast %2 : vector<8x16x128xbf16> to vector<128x128xbf16>
    %c0_4 = arith.constant 0 : index
    %c0_5 = arith.constant 0 : index
    %4 = vector.load %arg3[%c0_4, %c0_5] : memref<1152x128xbf16, #tpu.memory_space<vmem>>, vector<128x128xbf16>
    %cst_6 = arith.constant dense<0.000000e+00> : vector<128x128xf32>
    %5 = tpu.matmul %3, %4, %cst_6 {dimension_numbers = #tpu.dot_dimension_numbers<[1], [0], [0], [1], [0, 0, 1, 1], [], []>} : vector<128x128xbf16>, vector<128x128xbf16>, vector<128x128xf32> -> vector<128x128xf32>
    %6 = arith.addf %0, %5 : vector<128x128xf32>
    %c0_7 = arith.constant 0 : index
    %c0_8 = arith.constant 0 : index
    %c0_9 = arith.constant 0 : index
    %c1 = arith.constant 1 : index
    %c0_10 = arith.constant 0 : index
    %7 = vector.load %arg2[%c0_7, %c0_8, %c0_9, %c1, %c0_10] : memref<1x1x10x18x128xbf16, #tpu.memory_space<vmem>>, vector<1x1x8x16x128xbf16>
    %8 = vector.shape_cast %7 : vector<1x1x8x16x128xbf16> to vector<8x16x128xbf16>
    %9 = vector.shape_cast %8 : vector<8x16x128xbf16> to vector<128x128xbf16>
    %c128 = arith.constant 128 : index
    %c0_11 = arith.constant 0 : index
    %10 = vector.load %arg3[%c128, %c0_11] : memref<1152x128xbf16, #tpu.memory_space<vmem>>, vector<128x128xbf16>
    %cst_12 = arith.constant dense<0.000000e+00> : vector<128x128xf32>
    %11 = tpu.matmul %9, %10, %cst_12 {dimension_numbers = #tpu.dot_dimension_numbers<[1], [0], [0], [1], [0, 0, 1, 1], [], []>} : vector<128x128xbf16>, vector<128x128xbf16>, vector<128x128xf32> -> vector<128x128xf32>
    %12 = arith.addf %6, %11 : vector<128x128xf32>
    %c0_13 = arith.constant 0 : index
    %c0_14 = arith.constant 0 : index
    %c0_15 = arith.constant 0 : index
    %c2 = arith.constant 2 : index
    %c0_16 = arith.constant 0 : index
    %13 = vector.load %arg2[%c0_13, %c0_14, %c0_15, %c2, %c0_16] : memref<1x1x10x18x128xbf16, #tpu.memory_space<vmem>>, vector<1x1x8x16x128xbf16>
    %14 = vector.shape_cast %13 : vector<1x1x8x16x128xbf16> to vector<8x16x128xbf16>
    %15 = vector.shape_cast %14 : vector<8x16x128xbf16> to vector<128x128xbf16>
    %c256 = arith.constant 256 : index
    %c0_17 = arith.constant 0 : index
    %16 = vector.load %arg3[%c256, %c0_17] : memref<1152x128xbf16, #tpu.memory_space<vmem>>, vector<128x128xbf16>
    %cst_18 = arith.constant dense<0.000000e+00> : vector<128x128xf32>
    %17 = tpu.matmul %15, %16, %cst_18 {dimension_numbers = #tpu.dot_dimension_numbers<[1], [0], [0], [1], [0, 0, 1, 1], [], []>} : vector<128x128xbf16>, vector<128x128xbf16>, vector<128x128xf32> -> vector<128x128xf32>
    %18 = arith.addf %12, %17 : vector<128x128xf32>
    %c0_19 = arith.constant 0 : index
    %c0_20 = arith.constant 0 : index
    %c1_21 = arith.constant 1 : index
    %c0_22 = arith.constant 0 : index
    %c0_23 = arith.constant 0 : index
    %19 = vector.load %arg2[%c0_19, %c0_20, %c1_21, %c0_22, %c0_23] : memref<1x1x10x18x128xbf16, #tpu.memory_space<vmem>>, vector<1x1x8x16x128xbf16>
    %20 = vector.shape_cast %19 : vector<1x1x8x16x128xbf16> to vector<8x16x128xbf16>
    %21 = vector.shape_cast %20 : vector<8x16x128xbf16> to vector<128x128xbf16>
    %c384 = arith.constant 384 : index
    %c0_24 = arith.constant 0 : index
    %22 = vector.load %arg3[%c384, %c0_24] : memref<1152x128xbf16, #tpu.memory_space<vmem>>, vector<128x128xbf16>
    %cst_25 = arith.constant dense<0.000000e+00> : vector<128x128xf32>
    %23 = tpu.matmul %21, %22, %cst_25 {dimension_numbers = #tpu.dot_dimension_numbers<[1], [0], [0], [1], [0, 0, 1, 1], [], []>} : vector<128x128xbf16>, vector<128x128xbf16>, vector<128x128xf32> -> vector<128x128xf32>
    %24 = arith.addf %18, %23 : vector<128x128xf32>
    %c0_26 = arith.constant 0 : index
    %c0_27 = arith.constant 0 : index
    %c1_28 = arith.constant 1 : index
    %c1_29 = arith.constant 1 : index
    %c0_30 = arith.constant 0 : index
    %25 = vector.load %arg2[%c0_26, %c0_27, %c1_28, %c1_29, %c0_30] : memref<1x1x10x18x128xbf16, #tpu.memory_space<vmem>>, vector<1x1x8x16x128xbf16>
    %26 = vector.shape_cast %25 : vector<1x1x8x16x128xbf16> to vector<8x16x128xbf16>
    %27 = vector.shape_cast %26 : vector<8x16x128xbf16> to vector<128x128xbf16>
    %c512 = arith.constant 512 : index
    %c0_31 = arith.constant 0 : index
    %28 = vector.load %arg3[%c512, %c0_31] : memref<1152x128xbf16, #tpu.memory_space<vmem>>, vector<128x128xbf16>
    %cst_32 = arith.constant dense<0.000000e+00> : vector<128x128xf32>
    %29 = tpu.matmul %27, %28, %cst_32 {dimension_numbers = #tpu.dot_dimension_numbers<[1], [0], [0], [1], [0, 0, 1, 1], [], []>} : vector<128x128xbf16>, vector<128x128xbf16>, vector<128x128xf32> -> vector<128x128xf32>
    %30 = arith.addf %24, %29 : vector<128x128xf32>
    %c0_33 = arith.constant 0 : index
    %c0_34 = arith.constant 0 : index
    %c1_35 = arith.constant 1 : index
    %c2_36 = arith.constant 2 : index
    %c0_37 = arith.constant 0 : index
    %31 = vector.load %arg2[%c0_33, %c0_34, %c1_35, %c2_36, %c0_37] : memref<1x1x10x18x128xbf16, #tpu.memory_space<vmem>>, vector<1x1x8x16x128xbf16>
    %32 = vector.shape_cast %31 : vector<1x1x8x16x128xbf16> to vector<8x16x128xbf16>
    %33 = vector.shape_cast %32 : vector<8x16x128xbf16> to vector<128x128xbf16>
    %c640 = arith.constant 640 : index
    %c0_38 = arith.constant 0 : index
    %34 = vector.load %arg3[%c640, %c0_38] : memref<1152x128xbf16, #tpu.memory_space<vmem>>, vector<128x128xbf16>
    %cst_39 = arith.constant dense<0.000000e+00> : vector<128x128xf32>
    %35 = tpu.matmul %33, %34, %cst_39 {dimension_numbers = #tpu.dot_dimension_numbers<[1], [0], [0], [1], [0, 0, 1, 1], [], []>} : vector<128x128xbf16>, vector<128x128xbf16>, vector<128x128xf32> -> vector<128x128xf32>
    %36 = arith.addf %30, %35 : vector<128x128xf32>
    %c0_40 = arith.constant 0 : index
    %c0_41 = arith.constant 0 : index
    %c2_42 = arith.constant 2 : index
    %c0_43 = arith.constant 0 : index
    %c0_44 = arith.constant 0 : index
    %37 = vector.load %arg2[%c0_40, %c0_41, %c2_42, %c0_43, %c0_44] : memref<1x1x10x18x128xbf16, #tpu.memory_space<vmem>>, vector<1x1x8x16x128xbf16>
    %38 = vector.shape_cast %37 : vector<1x1x8x16x128xbf16> to vector<8x16x128xbf16>
    %39 = vector.shape_cast %38 : vector<8x16x128xbf16> to vector<128x128xbf16>
    %c768 = arith.constant 768 : index
    %c0_45 = arith.constant 0 : index
    %40 = vector.load %arg3[%c768, %c0_45] : memref<1152x128xbf16, #tpu.memory_space<vmem>>, vector<128x128xbf16>
    %cst_46 = arith.constant dense<0.000000e+00> : vector<128x128xf32>
    %41 = tpu.matmul %39, %40, %cst_46 {dimension_numbers = #tpu.dot_dimension_numbers<[1], [0], [0], [1], [0, 0, 1, 1], [], []>} : vector<128x128xbf16>, vector<128x128xbf16>, vector<128x128xf32> -> vector<128x128xf32>
    %42 = arith.addf %36, %41 : vector<128x128xf32>
    %c0_47 = arith.constant 0 : index
    %c0_48 = arith.constant 0 : index
    %c2_49 = arith.constant 2 : index
    %c1_50 = arith.constant 1 : index
    %c0_51 = arith.constant 0 : index
    %43 = vector.load %arg2[%c0_47, %c0_48, %c2_49, %c1_50, %c0_51] : memref<1x1x10x18x128xbf16, #tpu.memory_space<vmem>>, vector<1x1x8x16x128xbf16>
    %44 = vector.shape_cast %43 : vector<1x1x8x16x128xbf16> to vector<8x16x128xbf16>
    %45 = vector.shape_cast %44 : vector<8x16x128xbf16> to vector<128x128xbf16>
    %c896 = arith.constant 896 : index
    %c0_52 = arith.constant 0 : index
    %46 = vector.load %arg3[%c896, %c0_52] : memref<1152x128xbf16, #tpu.memory_space<vmem>>, vector<128x128xbf16>
    %cst_53 = arith.constant dense<0.000000e+00> : vector<128x128xf32>
    %47 = tpu.matmul %45, %46, %cst_53 {dimension_numbers = #tpu.dot_dimension_numbers<[1], [0], [0], [1], [0, 0, 1, 1], [], []>} : vector<128x128xbf16>, vector<128x128xbf16>, vector<128x128xf32> -> vector<128x128xf32>
    %48 = arith.addf %42, %47 : vector<128x128xf32>
    %c0_54 = arith.constant 0 : index
    %c0_55 = arith.constant 0 : index
    %c2_56 = arith.constant 2 : index
    %c2_57 = arith.constant 2 : index
    %c0_58 = arith.constant 0 : index
    %49 = vector.load %arg2[%c0_54, %c0_55, %c2_56, %c2_57, %c0_58] : memref<1x1x10x18x128xbf16, #tpu.memory_space<vmem>>, vector<1x1x8x16x128xbf16>
    %50 = vector.shape_cast %49 : vector<1x1x8x16x128xbf16> to vector<8x16x128xbf16>
    %51 = vector.shape_cast %50 : vector<8x16x128xbf16> to vector<128x128xbf16>
    %c1024 = arith.constant 1024 : index
    %c0_59 = arith.constant 0 : index
    %52 = vector.load %arg3[%c1024, %c0_59] : memref<1152x128xbf16, #tpu.memory_space<vmem>>, vector<128x128xbf16>
    %cst_60 = arith.constant dense<0.000000e+00> : vector<128x128xf32>
    %53 = tpu.matmul %51, %52, %cst_60 {dimension_numbers = #tpu.dot_dimension_numbers<[1], [0], [0], [1], [0, 0, 1, 1], [], []>} : vector<128x128xbf16>, vector<128x128xbf16>, vector<128x128xf32> -> vector<128x128xf32>
    %54 = arith.addf %48, %53 : vector<128x128xf32>
    %c0_61 = arith.constant 0 : index
    %c0_62 = arith.constant 0 : index
    %55 = vector.load %arg4[%c0_61, %c0_62] : memref<1x128xf32, #tpu.memory_space<vmem>>, vector<1x128xf32>
    %56 = vector.broadcast %55 : vector<1x128xf32> to vector<128x128xf32>
    %57 = arith.addf %54, %56 : vector<128x128xf32>
    %cst_63 = arith.constant 0.000000e+00 : f32
    %58 = vector.broadcast %cst_63 : f32 to vector<128x128xf32>
    %59 = arith.cmpf oge, %57, %58 : vector<128x128xf32>
    %cst_64 = arith.constant 2.000000e-01 : f32
    %60 = vector.broadcast %cst_64 : f32 to vector<128x128xf32>
    %61 = arith.mulf %60, %57 : vector<128x128xf32>
    %62 = arith.select %59, %57, %61 : vector<128x128xi1>, vector<128x128xf32>
    %63 = vector.shape_cast %62 : vector<128x128xf32> to vector<8x16x128xf32>
    %64 = arith.truncf %63 : vector<8x16x128xf32> to vector<8x16x128xbf16>
    %c0_65 = arith.constant 0 : index
    %c0_66 = arith.constant 0 : index
    %c0_67 = arith.constant 0 : index
    %c0_68 = arith.constant 0 : index
    %65 = vector.load %arg5[%c0_65, %c0_66, %c0_67, %c0_68] : memref<1x8x16x128xbf16, #tpu.memory_space<vmem>>, vector<1x8x16x128xbf16>
    %66 = vector.shape_cast %65 : vector<1x8x16x128xbf16> to vector<8x16x128xbf16>
    %67 = vector.shape_cast %64 : vector<8x16x128xbf16> to vector<1x8x16x128xbf16>
    tpu.vector_store %arg5[%c0_65, %c0_66, %c0_67, %c0_68], %67 {strides = array<i32>} : memref<1x8x16x128xbf16, #tpu.memory_space<vmem>>, vector<1x8x16x128xbf16>,
    return
  }
  func.func @transform_0(%arg0: i32, %arg1: i32) -> (i32, i32, i32, i32, i32) {
    %c0_i32 = arith.constant 0 : i32
    %c0_i32_0 = arith.constant 0 : i32
    %c0_i32_1 = arith.constant 0 : i32
    %c0_i32_2 = arith.constant 0 : i32
    return %arg0, %arg1, %c0_i32, %c0_i32_0, %c0_i32_1 : i32, i32, i32, i32, i32
  }
  func.func @transform_1(%arg0: i32, %arg1: i32) -> (i32, i32) {
    %c0_i32 = arith.constant 0 : i32
    %c0_i32_0 = arith.constant 0 : i32
    %c0_i32_1 = arith.constant 0 : i32
    return %c0_i32, %c0_i32_0 : i32, i32
  }
  func.func @transform_2(%arg0: i32, %arg1: i32) -> (i32, i32) {
    %c0_i32 = arith.constant 0 : i32
    %c0_i32_0 = arith.constant 0 : i32
    %c0_i32_1 = arith.constant 0 : i32
    return %c0_i32, %c0_i32_0 : i32, i32
  }
  func.func @transform_3(%arg0: i32, %arg1: i32) -> (i32, i32, i32, i32) {
    %c0_i32 = arith.constant 0 : i32
    %c0_i32_0 = arith.constant 0 : i32
    %c0_i32_1 = arith.constant 0 : i32
    return %arg0, %arg1, %c0_i32, %c0_i32_0 : i32, i32, i32, i32
  }
}

module attributes {stable_mosaic.version = 11 : i64} {
  func.func @_bn_stats_kernel(%arg0: i32, %arg1: memref<256x128xbf16, #tpu.memory_space<vmem>>, %arg2: memref<1x128xf32, #tpu.memory_space<vmem>>, %arg3: memref<1x128xf32, #tpu.memory_space<vmem>>) attributes {dimension_semantics = [#tpu.dimension_semantics<arbitrary>], iteration_bounds = array<i64: 2>, scalar_prefetch = 0 : i64, scratch_operands = 0 : i64, tpu.core_type = #tpu.core_type<tc>, window_params = [{transform_indices = @transform_0, window_bounds = array<i64: 256, 128>}, {pipeline_mode = #tpu.pipeline_mode<synchronous>, transform_indices = @transform_1, window_bounds = array<i64: 1, 128>}, {pipeline_mode = #tpu.pipeline_mode<synchronous>, transform_indices = @transform_2, window_bounds = array<i64: 1, 128>}]} {
    %c0_i32 = arith.constant 0 : i32
    %0 = arith.cmpi eq, %arg0, %c0_i32 : i32
    %1 = arith.extui %0 : i1 to i32
    %c0_i32_0 = arith.constant 0 : i32
    %2 = arith.cmpi ne, %1, %c0_i32_0 : i32
    scf.if %2 {
      %cst_11 = arith.constant 0.000000e+00 : f32
      %16 = vector.broadcast %cst_11 : f32 to vector<1x128xf32>
      %c0_12 = arith.constant 0 : index
      %c0_13 = arith.constant 0 : index
      %17 = vector.load %arg2[%c0_12, %c0_13] : memref<1x128xf32, #tpu.memory_space<vmem>>, vector<1x128xf32>
      tpu.vector_store %arg2[%c0_12, %c0_13], %16 {strides = array<i32>} : memref<1x128xf32, #tpu.memory_space<vmem>>, vector<1x128xf32>,
      %cst_14 = arith.constant 0.000000e+00 : f32
      %18 = vector.broadcast %cst_14 : f32 to vector<1x128xf32>
      %c0_15 = arith.constant 0 : index
      %c0_16 = arith.constant 0 : index
      %19 = vector.load %arg3[%c0_15, %c0_16] : memref<1x128xf32, #tpu.memory_space<vmem>>, vector<1x128xf32>
      tpu.vector_store %arg3[%c0_15, %c0_16], %18 {strides = array<i32>} : memref<1x128xf32, #tpu.memory_space<vmem>>, vector<1x128xf32>,
    } else {
    }
    %c0 = arith.constant 0 : index
    %c0_1 = arith.constant 0 : index
    %3 = vector.load %arg1[%c0, %c0_1] : memref<256x128xbf16, #tpu.memory_space<vmem>>, vector<256x128xbf16>
    %4 = arith.extf %3 : vector<256x128xbf16> to vector<256x128xf32>
    %c0_2 = arith.constant 0 : index
    %c0_3 = arith.constant 0 : index
    %5 = vector.load %arg2[%c0_2, %c0_3] : memref<1x128xf32, #tpu.memory_space<vmem>>, vector<1x128xf32>
    %cst = arith.constant dense<0.000000e+00> : vector<128xf32>
    %6 = vector.multi_reduction <add>, %4, %cst [0] : vector<256x128xf32> to vector<128xf32>
    %7 = vector.shape_cast %6 : vector<128xf32> to vector<1x128xf32>
    %8 = arith.addf %5, %7 : vector<1x128xf32>
    %c0_4 = arith.constant 0 : index
    %c0_5 = arith.constant 0 : index
    %9 = vector.load %arg2[%c0_4, %c0_5] : memref<1x128xf32, #tpu.memory_space<vmem>>, vector<1x128xf32>
    tpu.vector_store %arg2[%c0_4, %c0_5], %8 {strides = array<i32>} : memref<1x128xf32, #tpu.memory_space<vmem>>, vector<1x128xf32>,
    %c0_6 = arith.constant 0 : index
    %c0_7 = arith.constant 0 : index
    %10 = vector.load %arg3[%c0_6, %c0_7] : memref<1x128xf32, #tpu.memory_space<vmem>>, vector<1x128xf32>
    %11 = arith.mulf %4, %4 : vector<256x128xf32>
    %cst_8 = arith.constant dense<0.000000e+00> : vector<128xf32>
    %12 = vector.multi_reduction <add>, %11, %cst_8 [0] : vector<256x128xf32> to vector<128xf32>
    %13 = vector.shape_cast %12 : vector<128xf32> to vector<1x128xf32>
    %14 = arith.addf %10, %13 : vector<1x128xf32>
    %c0_9 = arith.constant 0 : index
    %c0_10 = arith.constant 0 : index
    %15 = vector.load %arg3[%c0_9, %c0_10] : memref<1x128xf32, #tpu.memory_space<vmem>>, vector<1x128xf32>
    tpu.vector_store %arg3[%c0_9, %c0_10], %14 {strides = array<i32>} : memref<1x128xf32, #tpu.memory_space<vmem>>, vector<1x128xf32>,
    return
  }
  func.func @transform_0(%arg0: i32) -> (i32, i32) {
    %c0_i32 = arith.constant 0 : i32
    %c0_i32_0 = arith.constant 0 : i32
    return %arg0, %c0_i32 : i32, i32
  }
  func.func @transform_1(%arg0: i32) -> (i32, i32) {
    %c0_i32 = arith.constant 0 : i32
    %c0_i32_0 = arith.constant 0 : i32
    %c0_i32_1 = arith.constant 0 : i32
    return %c0_i32, %c0_i32_0 : i32, i32
  }
  func.func @transform_2(%arg0: i32) -> (i32, i32) {
    %c0_i32 = arith.constant 0 : i32
    %c0_i32_0 = arith.constant 0 : i32
    %c0_i32_1 = arith.constant 0 : i32
    return %c0_i32, %c0_i32_0 : i32, i32
  }
}

module attributes {stable_mosaic.version = 11 : i64} {
  func.func @_bn_apply_kernel(%arg0: i32, %arg1: memref<256x128xbf16, #tpu.memory_space<vmem>>, %arg2: memref<1x128xf32, #tpu.memory_space<vmem>>, %arg3: memref<1x128xf32, #tpu.memory_space<vmem>>, %arg4: memref<256x128xf32, #tpu.memory_space<vmem>>) attributes {dimension_semantics = [#tpu.dimension_semantics<parallel>], iteration_bounds = array<i64: 2>, scalar_prefetch = 0 : i64, scratch_operands = 0 : i64, tpu.core_type = #tpu.core_type<tc>, window_params = [{transform_indices = @transform_0, window_bounds = array<i64: 256, 128>}, {pipeline_mode = #tpu.pipeline_mode<synchronous>, transform_indices = @transform_1, window_bounds = array<i64: 1, 128>}, {pipeline_mode = #tpu.pipeline_mode<synchronous>, transform_indices = @transform_2, window_bounds = array<i64: 1, 128>}, {transform_indices = @transform_3, window_bounds = array<i64: 256, 128>}]} {
    %c0 = arith.constant 0 : index
    %c0_0 = arith.constant 0 : index
    %0 = vector.load %arg1[%c0, %c0_0] : memref<256x128xbf16, #tpu.memory_space<vmem>>, vector<256x128xbf16>
    %1 = arith.extf %0 : vector<256x128xbf16> to vector<256x128xf32>
    %c0_1 = arith.constant 0 : index
    %c0_2 = arith.constant 0 : index
    %2 = vector.load %arg2[%c0_1, %c0_2] : memref<1x128xf32, #tpu.memory_space<vmem>>, vector<1x128xf32>
    %3 = vector.broadcast %2 : vector<1x128xf32> to vector<256x128xf32>
    %4 = arith.mulf %1, %3 : vector<256x128xf32>
    %c0_3 = arith.constant 0 : index
    %c0_4 = arith.constant 0 : index
    %5 = vector.load %arg3[%c0_3, %c0_4] : memref<1x128xf32, #tpu.memory_space<vmem>>, vector<1x128xf32>
    %6 = vector.broadcast %5 : vector<1x128xf32> to vector<256x128xf32>
    %7 = arith.addf %4, %6 : vector<256x128xf32>
    %c0_5 = arith.constant 0 : index
    %c0_6 = arith.constant 0 : index
    %8 = vector.load %arg4[%c0_5, %c0_6] : memref<256x128xf32, #tpu.memory_space<vmem>>, vector<256x128xf32>
    tpu.vector_store %arg4[%c0_5, %c0_6], %7 {strides = array<i32>} : memref<256x128xf32, #tpu.memory_space<vmem>>, vector<256x128xf32>,
    return
  }
  func.func @transform_0(%arg0: i32) -> (i32, i32) {
    %c0_i32 = arith.constant 0 : i32
    %c0_i32_0 = arith.constant 0 : i32
    return %arg0, %c0_i32 : i32, i32
  }
  func.func @transform_1(%arg0: i32) -> (i32, i32) {
    %c0_i32 = arith.constant 0 : i32
    %c0_i32_0 = arith.constant 0 : i32
    %c0_i32_1 = arith.constant 0 : i32
    return %c0_i32, %c0_i32_0 : i32, i32
  }
  func.func @transform_2(%arg0: i32) -> (i32, i32) {
    %c0_i32 = arith.constant 0 : i32
    %c0_i32_0 = arith.constant 0 : i32
    %c0_i32_1 = arith.constant 0 : i32
    return %c0_i32, %c0_i32_0 : i32, i32
  }
  func.func @transform_3(%arg0: i32) -> (i32, i32) {
    %c0_i32 = arith.constant 0 : i32
    %c0_i32_0 = arith.constant 0 : i32
    return %arg0, %c0_i32 : i32, i32
  }
}

</mosaic_0001>

<bundles_post_ra>
// kernel: dn1_forward.18
= control target key start
LH: loop header
LB: loop body
LE: loop exit
PB: predicated region body
PF: predicated region fallthrough
CT: control target
= control target key end

     0   :  { %s466_s9 = smov 0   ;;  %s516_s0 = inlined_call_operand.vmem [shape: bf16[512,128], index: 0, kind: input, shape index: {}]   ;;  %s517_s1 = inlined_call_operand.vmem [shape: f32[1,128], index: 1, kind: output, shape index: {0}]   ;;  %s518_s2 = inlined_call_operand.vmem [shape: f32[1,128], index: 2, kind: output, shape index: {1}]  }
   0x1 LB: > { %s345_s10 = sadd.s32 4294967295, %s448_s9   ;;  %p348_p0 = scmp.ge.s32.totalorder %s448_s9, 1  ;;  %s448_s9 = sphi %s466_s9, %s13_s9  }
   0x2   : > { %p106_p1 = scmp.lt.s32.totalorder %s448_s9, 3 }
   0x4   : > { %p107_p2 = pnand %p348_p0, %p106_p1 }
   0x5   : > { %s349_s11 = sshll.u32 (!%p107_p2), %s345_s10, 5  ;;  %p351_p4 = scmp.ne.s32.totalorder (!%p107_p2), %s345_s10, 0 }
   0x6   : > { %110 = sbr.rel (%p107_p2) target bundleno = 102 (0x66), region = 24  ;;  %p124_p3 = scmp.lt.s32.totalorder (!%p107_p2), %s349_s11, 63 }
   0xd   : > { %s520_s11 = smov (!%p124_p3, %s349_s11), 63  ;;  %132 = sbr.rel (%p351_p4) target bundleno = 20 (0x14), region = 28 }
   0xe   : > { %s350_s12 = sshll.u32 %s520_s11, 2  ;;  %v450_v0 = vmov (!%p351_p4), 0.0  }
   0xf   : > { %s477_s15 = scalar_lea.vmem %s516_s0, %s350_s12  ;;  %133 = vst [vmem:[%s517_s1] sm:$0x1] (!%p351_p4), %v450_v0  ;;  %134 = vst [vmem:[%s518_s2] sm:$0x1] (!%p351_p4), %v450_v0 }
  0x14 PF: > { %v355_v1 = vld [vmem:[%s477_s15] sm:$0xff]   ;;  %v418_v2 = vld [vmem:[%s477_s15 + $0x8] sm:$0xff]   ;;  %v419_v7 = vld [vmem:[%s477_s15 + $0x10] sm:$0xff]  }
  0x15   : > { %v356_v3 = vunpack.c.l.bf16 %v355_v1  ;;  %v357_v4 = vunpack.c.h.bf16 %v355_v1  ;;  %v360_v5 = vunpack.c.l.bf16 %v418_v2  ;;  %v361_v8 = vunpack.c.h.bf16 %v418_v2  ;;  %v420_v12 = vld [vmem:[%s477_s15 + $0x18] sm:$0xff]   ;;  %v421_v20 = vld [vmem:[%s477_s15 + $0x20] sm:$0xff]   ;;  %v422_v29 = vld [vmem:[%s477_s15 + $0x28] sm:$0xff]  }
  0x16   : > { %v364_v10 = vunpack.c.l.bf16 %v419_v7  ;;  %v365_v15 = vunpack.c.h.bf16 %v419_v7  ;;  %v368_v18 = vunpack.c.l.bf16 %v420_v12  ;;  %v369_v23 = vunpack.c.h.bf16 %v420_v12  ;;  %v423_v38 = vld [vmem:[%s477_s15 + $0x30] sm:$0xff]   ;;  %v424_v47 = vld [vmem:[%s477_s15 + $0x38] sm:$0xff]   ;;  %v425_v56 = vld [vmem:[%s477_s15 + $0x40] sm:$0xff]  }
  0x17   : > { %v200_v6 = vadd.f32 %v357_v4, %v356_v3  ;;  %v240_v13 = vmul.f32 %v356_v3, %v356_v3  ;;  %v241_v14 = vmul.f32 %v357_v4, %v357_v4  ;;  %v242_v17 = vmul.f32 %v360_v5, %v360_v5  ;;  %v426_v1 = vld [vmem:[%s477_s15 + $0x48] sm:$0xff]  }
  0x18   : > { %v243_v21 = vmul.f32 %v361_v8, %v361_v8  ;;  %v244_v25 = vmul.f32 %v364_v10, %v364_v10  ;;  %v372_v27 = vunpack.c.l.bf16 %v421_v20  ;;  %v245_v30 = vmul.f32 %v365_v15, %v365_v15 }
  0x19   : > { %v201_v9 = vadd.f32 %v360_v5, %v200_v6  ;;  %v272_v22 = vadd.f32 %v241_v14, %v240_v13  ;;  %v373_v32 = vunpack.c.h.bf16 %v421_v20  ;;  %v246_v34 = vmul.f32 %v368_v18, %v368_v18 }
  0x1a   : > { %v376_v36 = vunpack.c.l.bf16 %v422_v29  ;;  %v247_v39 = vmul.f32 %v369_v23, %v369_v23  ;;  %v377_v41 = vunpack.c.h.bf16 %v422_v29  ;;  %v248_v43 = vmul.f32 %v372_v27, %v372_v27 }
  0x1b   : > { %v202_v11 = vadd.f32 %v361_v8, %v201_v9  ;;  %v273_v26 = vadd.f32 %v272_v22, %v242_v17  ;;  %v380_v45 = vunpack.c.l.bf16 %v423_v38  ;;  %v249_v48 = vmul.f32 %v373_v32, %v373_v32 }
  0x1c   : > { %v381_v50 = vunpack.c.h.bf16 %v423_v38  ;;  %v250_v52 = vmul.f32 %v376_v36, %v376_v36  ;;  %v384_v54 = vunpack.c.l.bf16 %v424_v47  ;;  %v251_v57 = vmul.f32 %v377_v41, %v377_v41 }
  0x1d   : > { %v203_v16 = vadd.f32 %v364_v10, %v202_v11  ;;  %v274_v31 = vadd.f32 %v273_v26, %v243_v21  ;;  %v385_v59 = vunpack.c.h.bf16 %v424_v47  ;;  %v252_v61 = vmul.f32 %v380_v45, %v380_v45  ;;  %v427_v10 = vld [vmem:[%s477_s15 + $0x50] sm:$0xff]  }
  0x1e   : > { %v388_v63 = vunpack.c.l.bf16 %v425_v56  ;;  %v253_v2 = vmul.f32 %v381_v50, %v381_v50  ;;  %v389_v4 = vunpack.c.h.bf16 %v425_v56  ;;  %v254_v6 = vmul.f32 %v384_v54, %v384_v54 }
  0x1f   : > { %v204_v19 = vadd.f32 %v365_v15, %v203_v16  ;;  %v275_v35 = vadd.f32 %v274_v31, %v244_v25  ;;  %v392_v8 = vunpack.c.l.bf16 %v426_v1  ;;  %v255_v11 = vmul.f32 %v385_v59, %v385_v59 }
  0x20   : > { %v393_v13 = vunpack.c.h.bf16 %v426_v1  ;;  %v256_v15 = vmul.f32 %v388_v63, %v388_v63  ;;  %v396_v17 = vunpack.c.l.bf16 %v427_v10  ;;  %v257_v20 = vmul.f32 %v389_v4, %v389_v4 }
  0x21   : > { %v205_v24 = vadd.f32 %v368_v18, %v204_v19  ;;  %v276_v40 = vadd.f32 %v275_v35, %v245_v30  ;;  %v428_v19 = vld [vmem:[%s477_s15 + $0x58] sm:$0xff]   ;;  %v397_v22 = vunpack.c.h.bf16 %v427_v10 }
  0x22   : > { %v400_v26 = vunpack.c.l.bf16 %v428_v19  ;;  %v259_v29 = vmul.f32 %v393_v13, %v393_v13  ;;  %v401_v31 = vunpack.c.h.bf16 %v428_v19 }
  0x23   : > { %v206_v28 = vadd.f32 %v369_v23, %v205_v24  ;;  %v277_v44 = vadd.f32 %v276_v40, %v246_v34  ;;  %v258_v24 = vmul.f32 %v392_v8, %v392_v8  ;;  %v261_v38 = vmul.f32 %v397_v22, %v397_v22 }
  0x24   : > { %v263_v47 = vmul.f32 %v401_v31, %v401_v31 }
  0x25   : > { %v207_v33 = vadd.f32 %v372_v27, %v206_v28  ;;  %v278_v49 = vadd.f32 %v277_v44, %v247_v39  ;;  %v429_v28 = vld [vmem:[%s477_s15 + $0x60] sm:$0xff]  }
  0x26   : > { %v404_v35 = vunpack.c.l.bf16 %v429_v28  ;;  %v405_v40 = vunpack.c.h.bf16 %v429_v28  ;;  %v239_v28 = vld [vmem:[%s518_s2] sm:$0x1] }
  0x27   : > { %v208_v37 = vadd.f32 %v373_v32, %v207_v33  ;;  %v279_v53 = vadd.f32 %v278_v49, %v248_v43  ;;  %v260_v33 = vmul.f32 %v396_v17, %v396_v17 }
  0x28   : > { %v265_v56 = vmul.f32 %v405_v40, %v405_v40 }
  0x29   : > { %v209_v42 = vadd.f32 %v376_v36, %v208_v37  ;;  %v280_v58 = vadd.f32 %v279_v53, %v249_v48  ;;  %v430_v37 = vld [vmem:[%s477_s15 + $0x68] sm:$0xff]  }
  0x2a   : > { %v408_v44 = vunpack.c.l.bf16 %v430_v37  ;;  %v409_v49 = vunpack.c.h.bf16 %v430_v37 }
  0x2b   : > { %v210_v46 = vadd.f32 %v377_v41, %v209_v42  ;;  %v281_v62 = vadd.f32 %v280_v58, %v250_v52  ;;  %v262_v42 = vmul.f32 %v400_v26, %v400_v26 }
  0x2d   : > { %v211_v51 = vadd.f32 %v380_v45, %v210_v46  ;;  %v282_v3 = vadd.f32 %v281_v62, %v251_v57  ;;  %v431_v46 = vld [vmem:[%s477_s15 + $0x70] sm:$0xff]  }
  0x2e   : > { %v412_v53 = vunpack.c.l.bf16 %v431_v46  ;;  %v413_v58 = vunpack.c.h.bf16 %v431_v46 }
  0x2f   : > { %v212_v55 = vadd.f32 %v381_v50, %v211_v51  ;;  %v283_v7 = vadd.f32 %v282_v3, %v252_v61  ;;  %v264_v51 = vmul.f32 %v404_v35, %v404_v35 }
  0x31   : > { %v213_v60 = vadd.f32 %v384_v54, %v212_v55  ;;  %v284_v12 = vadd.f32 %v283_v7, %v253_v2  ;;  %v432_v55 = vld [vmem:[%s477_s15 + $0x78] sm:$0xff]   ;;  %v269_v7 = vmul.f32 %v413_v58, %v413_v58 }
  0x32   : > { %v416_v62 = vunpack.c.l.bf16 %v432_v55  ;;  %v417_v2 = vunpack.c.h.bf16 %v432_v55 }
  0x33   : > { %v214_v0 = vadd.f32 %v385_v59, %v213_v60  ;;  %v285_v16 = vadd.f32 %v284_v12, %v254_v6  ;;  %v266_v60 = vmul.f32 %v408_v44, %v408_v44 }
  0x34   : > { %v270_v10 = vmul.f32 %v416_v62, %v416_v62 }
  0x35   : > { %v215_v5 = vadd.f32 %v388_v63, %v214_v0  ;;  %v286_v21 = vadd.f32 %v285_v16, %v255_v11  ;;  %v267_v0 = vmul.f32 %v409_v49, %v409_v49 }
  0x37   : > { %v216_v9 = vadd.f32 %v389_v4, %v215_v5  ;;  %v287_v25 = vadd.f32 %v286_v21, %v256_v15  ;;  %v268_v4 = vmul.f32 %v412_v53, %v412_v53 }
  0x39   : > { %v217_v14 = vadd.f32 %v392_v8, %v216_v9  ;;  %v288_v30 = vadd.f32 %v287_v25, %v257_v20  ;;  %v199_v20 = vld [vmem:[%s517_s1] sm:$0x1] }
  0x3b   : > { %v218_v18 = vadd.f32 %v393_v13, %v217_v14  ;;  %v289_v34 = vadd.f32 %v288_v30, %v258_v24  ;;  %v271_v13 = vmul.f32 %v417_v2, %v417_v2 }
  0x3d   : > { %v219_v23 = vadd.f32 %v396_v17, %v218_v18  ;;  %v290_v39 = vadd.f32 %v289_v34, %v259_v29 }
  0x3f   : > { %v220_v27 = vadd.f32 %v397_v22, %v219_v23  ;;  %v291_v43 = vadd.f32 %v290_v39, %v260_v33 }
  0x41   : > { %v221_v32 = vadd.f32 %v400_v26, %v220_v27  ;;  %v292_v48 = vadd.f32 %v291_v43, %v261_v38 }
  0x43   : > { %v222_v36 = vadd.f32 %v401_v31, %v221_v32  ;;  %v293_v52 = vadd.f32 %v292_v48, %v262_v42 }
  0x45   : > { %v223_v41 = vadd.f32 %v404_v35, %v222_v36  ;;  %v294_v57 = vadd.f32 %v293_v52, %v263_v47 }
  0x47   : > { %v224_v45 = vadd.f32 %v405_v40, %v223_v41  ;;  %v295_v61 = vadd.f32 %v294_v57, %v264_v51 }
  0x49   : > { %v225_v50 = vadd.f32 %v408_v44, %v224_v45  ;;  %v296_v1 = vadd.f32 %v295_v61, %v265_v56 }
  0x4b   : > { %v226_v54 = vadd.f32 %v409_v49, %v225_v50  ;;  %v297_v5 = vadd.f32 %v296_v1, %v266_v60 }
  0x4d   : > { %v227_v59 = vadd.f32 %v412_v53, %v226_v54  ;;  %v298_v8 = vadd.f32 %v297_v5, %v267_v0 }
  0x4f   : > { %v228_v63 = vadd.f32 %v413_v58, %v227_v59  ;;  %v299_v11 = vadd.f32 %v298_v8, %v268_v4 }
  0x51   : > { %v229_v3 = vadd.f32 %v416_v62, %v228_v63  ;;  %v300_v14 = vadd.f32 %v299_v11, %v269_v7 }
  0x53   : > { %v230_v6 = vadd.f32 %v417_v2, %v229_v3  ;;  %v301_v16 = vadd.f32 %v300_v14, %v270_v10 }
  0x55   : > { %v231_v9 = vrot.slane %v230_v6, 4  ;;  %v302_v18 = vadd.f32 %v301_v16, %v271_v13 }
  0x57   : > { %v232_v12 = vadd.f32 %v231_v9, %v230_v6  ;;  %v303_v21 = vrot.slane %v302_v18, 4 }
  0x59   : > { %v233_v15 = vrot.slane %v232_v12, 2  ;;  %v304_v23 = vadd.f32 %v303_v21, %v302_v18 }
  0x5b   : > { %v234_v17 = vadd.f32 %v233_v15, %v232_v12  ;;  %v305_v25 = vrot.slane %v304_v23, 2 }
  0x5d   : > { %v235_v19 = vrot.slane %v234_v17, 1  ;;  %v306_v26 = vadd.f32 %v305_v25, %v304_v23 }
  0x5f   : > { %v236_v22 = vadd.f32 %v235_v19, %v234_v17  ;;  %v307_v27 = vrot.slane %v306_v26, 1 }
  0x61   : > { %v237_v24 = vadd.f32 %v236_v22, %v199_v20  ;;  %v308_v29 = vadd.f32 %v307_v27, %v306_v26 }
  0x63   : > { %238 = vst [vmem:[%s517_s1] sm:$0x1] %v237_v24  ;;  %v309_v30 = vadd.f32 %v308_v29, %v239_v28 }
  0x65   : > { %310 = vst [vmem:[%s518_s2] sm:$0x1] %v309_v30 }
  0x66 PF: > { %s13_s9 = sadd.s32 1, %s448_s9  }
  0x67   : > { %p10_p5 = scmp.ge.s32.totalorder %s13_s9, 4  }
  0x69   :  { %12 = sbr.rel (!%p10_p5) target bundleno = 1 (0x1), region = 62 }

// kernel: dn1_forward.19
= control target key start
LH: loop header
LB: loop body
LE: loop exit
PB: predicated region body
PF: predicated region fallthrough
CT: control target
= control target key end

     0   :  { %s532_s12 = smov 0   ;;  %s675_s0 = inlined_call_operand.vmem [shape: bf16[512,128], index: 0, kind: input, shape index: {}]   ;;  %s676_s1 = inlined_call_operand.vmem [shape: f32[1,128], index: 1, kind: input, shape index: {}]   ;;  %s677_s2 = inlined_call_operand.vmem [shape: f32[1,128], index: 2, kind: input, shape index: {}]   ;;  %s678_s3 = inlined_call_operand.vmem [shape: f32[512,128], index: 3, kind: output, shape index: {}]  }
   0x1 LB: > { %s404_s13 = sadd.s32 4294967295, %s510_s12   ;;  %p408_p0 = scmp.ge.s32.totalorder %s510_s12, 1  ;;  %s510_s12 = sphi %s532_s12, %s13_s12  }
   0x2   : > { %p138_p1 = scmp.lt.s32.totalorder %s510_s12, 3 }
   0x4   : > { %p139_p2 = pnand %p408_p0, %p138_p1 }
   0x5   : > { %s409_s14 = sshll.u32 (!%p139_p2), %s404_s13, 5  ;;  %v548_v0 = vld [vmem:[%s676_s1] ss:$0 sm:$0xff] (!%p139_p2) }
   0x6   : > { %142 = sbr.rel (%p139_p2) target bundleno = 45 (0x2d), region = 32  ;;  %p163_p3 = scmp.lt.s32.totalorder (!%p139_p2), %s409_s14, 63  ;;  %v557_v9 = vld [vmem:[%s677_s2] ss:$0 sm:$0xff] (!%p139_p2) }
   0xd   : > { %s680_s14 = smov (!%p163_p3, %s409_s14), 63 }
   0xe   : > { %s410_s15 = sshll.u32 %s680_s14, 2  ;;  %s412_s21 = sshll.u32 %s680_s14, 3 }
   0xf   : > { %s543_s18 = scalar_lea.vmem %s675_s0, %s410_s15  ;;  %s566_s26 = scalar_lea.vmem %s678_s3, %s412_s21 }
  0x10   : > { %v418_v1 = vld [vmem:[%s543_s18] sm:$0xff]   ;;  %v481_v2 = vld [vmem:[%s543_s18 + $0x8] sm:$0xff]   ;;  %v482_v3 = vld [vmem:[%s543_s18 + $0x10] sm:$0xff]  }
  0x11   : > { %v419_v4 = vunpack.c.l.bf16 %v418_v1  ;;  %v420_v5 = vunpack.c.h.bf16 %v418_v1  ;;  %v423_v6 = vunpack.c.l.bf16 %v481_v2  ;;  %v424_v7 = vunpack.c.h.bf16 %v481_v2  ;;  %v483_v8 = vld [vmem:[%s543_s18 + $0x18] sm:$0xff]   ;;  %v484_v22 = vld [vmem:[%s543_s18 + $0x20] sm:$0xff]   ;;  %v485_v23 = vld [vmem:[%s543_s18 + $0x28] sm:$0xff]  }
  0x12   : > { %v427_v10 = vunpack.c.l.bf16 %v482_v3  ;;  %v428_v11 = vunpack.c.h.bf16 %v482_v3  ;;  %v431_v12 = vunpack.c.l.bf16 %v483_v8  ;;  %v432_v13 = vunpack.c.h.bf16 %v483_v8  ;;  %v486_v28 = vld [vmem:[%s543_s18 + $0x30] sm:$0xff]   ;;  %v487_v29 = vld [vmem:[%s543_s18 + $0x38] sm:$0xff]   ;;  %v488_v50 = vld [vmem:[%s543_s18 + $0x40] sm:$0xff]  }
  0x13   : > { %v245_v14 = vmul.f32 %v419_v4, %v548_v0  ;;  %v246_v15 = vmul.f32 %v420_v5, %v548_v0  ;;  %v247_v16 = vmul.f32 %v423_v6, %v548_v0  ;;  %v248_v17 = vmul.f32 %v424_v7, %v548_v0  ;;  %v489_v51 = vld [vmem:[%s543_s18 + $0x48] sm:$0xff]   ;;  %v490_v56 = vld [vmem:[%s543_s18 + $0x50] sm:$0xff]   ;;  %v491_v57 = vld [vmem:[%s543_s18 + $0x58] sm:$0xff]  }
  0x14   : > { %v249_v18 = vmul.f32 %v427_v10, %v548_v0  ;;  %v250_v19 = vmul.f32 %v428_v11, %v548_v0  ;;  %v251_v20 = vmul.f32 %v431_v12, %v548_v0  ;;  %v252_v21 = vmul.f32 %v432_v13, %v548_v0 }
  0x15   : > { %v284_v24 = vadd.f32 %v557_v9, %v245_v14  ;;  %v285_v25 = vadd.f32 %v557_v9, %v246_v15  ;;  %v286_v26 = vadd.f32 %v557_v9, %v247_v16  ;;  %v287_v27 = vadd.f32 %v557_v9, %v248_v17  ;;  %v492_v16 = vld [vmem:[%s543_s18 + $0x60] sm:$0xff]   ;;  %v493_v17 = vld [vmem:[%s543_s18 + $0x68] sm:$0xff]  }
  0x16   : > { %v288_v30 = vadd.f32 %v557_v9, %v249_v18  ;;  %v289_v31 = vadd.f32 %v557_v9, %v250_v19  ;;  %v290_v32 = vadd.f32 %v557_v9, %v251_v20  ;;  %v291_v33 = vadd.f32 %v557_v9, %v252_v21 }
  0x17   : > { %316 = vst [vmem:[%s566_s26] sm:$0xff] %v284_v24  ;;  %317 = vst [vmem:[%s566_s26 + $0x8] sm:$0xff] %v285_v25  ;;  %v435_v34 = vunpack.c.l.bf16 %v484_v22  ;;  %v436_v35 = vunpack.c.h.bf16 %v484_v22  ;;  %v439_v36 = vunpack.c.l.bf16 %v485_v23  ;;  %v440_v37 = vunpack.c.h.bf16 %v485_v23  ;;  %v494_v22 = vld [vmem:[%s543_s18 + $0x70] sm:$0xff]   ;;  %v495_v23 = vld [vmem:[%s543_s18 + $0x78] sm:$0xff]  }
  0x18   : > { %318 = vst [vmem:[%s566_s26 + $0x10] sm:$0xff] %v286_v26  ;;  %319 = vst [vmem:[%s566_s26 + $0x18] sm:$0xff] %v287_v27  ;;  %v443_v38 = vunpack.c.l.bf16 %v486_v28  ;;  %v444_v39 = vunpack.c.h.bf16 %v486_v28  ;;  %v447_v40 = vunpack.c.l.bf16 %v487_v29  ;;  %v448_v41 = vunpack.c.h.bf16 %v487_v29 }
  0x19   : > { %320 = vst [vmem:[%s566_s26 + $0x20] sm:$0xff] %v288_v30  ;;  %321 = vst [vmem:[%s566_s26 + $0x28] sm:$0xff] %v289_v31  ;;  %v253_v42 = vmul.f32 %v435_v34, %v548_v0  ;;  %v254_v43 = vmul.f32 %v436_v35, %v548_v0  ;;  %v255_v44 = vmul.f32 %v439_v36, %v548_v0  ;;  %v451_v62 = vunpack.c.l.bf16 %v488_v50 }
  0x1a   : > { %322 = vst [vmem:[%s566_s26 + $0x30] sm:$0xff] %v290_v32  ;;  %323 = vst [vmem:[%s566_s26 + $0x38] sm:$0xff] %v291_v33  ;;  %v256_v45 = vmul.f32 %v440_v37, %v548_v0  ;;  %v257_v46 = vmul.f32 %v443_v38, %v548_v0  ;;  %v258_v47 = vmul.f32 %v444_v39, %v548_v0  ;;  %v452_v63 = vunpack.c.h.bf16 %v488_v50 }
  0x1b   : > { %v259_v48 = vmul.f32 %v447_v40, %v548_v0  ;;  %v260_v49 = vmul.f32 %v448_v41, %v548_v0  ;;  %v292_v52 = vadd.f32 %v557_v9, %v253_v42  ;;  %v293_v53 = vadd.f32 %v557_v9, %v254_v43 }
  0x1c   : > { %v294_v54 = vadd.f32 %v557_v9, %v255_v44  ;;  %v295_v55 = vadd.f32 %v557_v9, %v256_v45  ;;  %v296_v58 = vadd.f32 %v557_v9, %v257_v46  ;;  %v297_v59 = vadd.f32 %v557_v9, %v258_v47 }
  0x1d   : > { %v298_v60 = vadd.f32 %v557_v9, %v259_v48  ;;  %v299_v61 = vadd.f32 %v557_v9, %v260_v49  ;;  %324 = vst [vmem:[%s566_s26 + $0x40] sm:$0xff] %v292_v52  ;;  %325 = vst [vmem:[%s566_s26 + $0x48] sm:$0xff] %v293_v53  ;;  %v455_v1 = vunpack.c.l.bf16 %v489_v51  ;;  %v456_v2 = vunpack.c.h.bf16 %v489_v51 }
  0x1e   : > { %326 = vst [vmem:[%s566_s26 + $0x50] sm:$0xff] %v294_v54  ;;  %327 = vst [vmem:[%s566_s26 + $0x58] sm:$0xff] %v295_v55  ;;  %v459_v3 = vunpack.c.l.bf16 %v490_v56  ;;  %v460_v4 = vunpack.c.h.bf16 %v490_v56  ;;  %v463_v5 = vunpack.c.l.bf16 %v491_v57  ;;  %v464_v6 = vunpack.c.h.bf16 %v491_v57 }
  0x1f   : > { %328 = vst [vmem:[%s566_s26 + $0x60] sm:$0xff] %v296_v58  ;;  %329 = vst [vmem:[%s566_s26 + $0x68] sm:$0xff] %v297_v59  ;;  %v261_v7 = vmul.f32 %v451_v62, %v548_v0  ;;  %v262_v8 = vmul.f32 %v452_v63, %v548_v0  ;;  %v263_v10 = vmul.f32 %v455_v1, %v548_v0  ;;  %v467_v28 = vunpack.c.l.bf16 %v492_v16 }
  0x20   : > { %330 = vst [vmem:[%s566_s26 + $0x70] sm:$0xff] %v298_v60  ;;  %331 = vst [vmem:[%s566_s26 + $0x78] sm:$0xff] %v299_v61  ;;  %v264_v11 = vmul.f32 %v456_v2, %v548_v0  ;;  %v265_v12 = vmul.f32 %v459_v3, %v548_v0  ;;  %v266_v13 = vmul.f32 %v460_v4, %v548_v0  ;;  %v468_v29 = vunpack.c.h.bf16 %v492_v16 }
  0x21   : > { %v267_v14 = vmul.f32 %v463_v5, %v548_v0  ;;  %v268_v15 = vmul.f32 %v464_v6, %v548_v0  ;;  %v300_v18 = vadd.f32 %v557_v9, %v261_v7  ;;  %v301_v19 = vadd.f32 %v557_v9, %v262_v8 }
  0x22   : > { %v302_v20 = vadd.f32 %v557_v9, %v263_v10  ;;  %v303_v21 = vadd.f32 %v557_v9, %v264_v11  ;;  %v304_v24 = vadd.f32 %v557_v9, %v265_v12  ;;  %v305_v25 = vadd.f32 %v557_v9, %v266_v13 }
  0x23   : > { %v306_v26 = vadd.f32 %v557_v9, %v267_v14  ;;  %v307_v27 = vadd.f32 %v557_v9, %v268_v15  ;;  %332 = vst [vmem:[%s566_s26 + $0x80] sm:$0xff] %v300_v18  ;;  %333 = vst [vmem:[%s566_s26 + $0x88] sm:$0xff] %v301_v19  ;;  %v471_v30 = vunpack.c.l.bf16 %v493_v17  ;;  %v472_v31 = vunpack.c.h.bf16 %v493_v17 }
  0x24   : > { %334 = vst [vmem:[%s566_s26 + $0x90] sm:$0xff] %v302_v20  ;;  %335 = vst [vmem:[%s566_s26 + $0x98] sm:$0xff] %v303_v21  ;;  %v475_v32 = vunpack.c.l.bf16 %v494_v22  ;;  %v476_v33 = vunpack.c.h.bf16 %v494_v22  ;;  %v479_v34 = vunpack.c.l.bf16 %v495_v23  ;;  %v480_v35 = vunpack.c.h.bf16 %v495_v23 }
  0x25   : > { %336 = vst [vmem:[%s566_s26 + $0xa0] sm:$0xff] %v304_v24  ;;  %337 = vst [vmem:[%s566_s26 + $0xa8] sm:$0xff] %v305_v25  ;;  %v269_v36 = vmul.f32 %v467_v28, %v548_v0  ;;  %v270_v37 = vmul.f32 %v468_v29, %v548_v0  ;;  %v271_v38 = vmul.f32 %v471_v30, %v548_v0 }
  0x26   : > { %338 = vst [vmem:[%s566_s26 + $0xb0] sm:$0xff] %v306_v26  ;;  %339 = vst [vmem:[%s566_s26 + $0xb8] sm:$0xff] %v307_v27  ;;  %v272_v39 = vmul.f32 %v472_v31, %v548_v0  ;;  %v273_v40 = vmul.f32 %v475_v32, %v548_v0  ;;  %v274_v41 = vmul.f32 %v476_v33, %v548_v0 }
  0x27   : > { %v275_v42 = vmul.f32 %v479_v34, %v548_v0  ;;  %v276_v43 = vmul.f32 %v480_v35, %v548_v0  ;;  %v308_v44 = vadd.f32 %v557_v9, %v269_v36  ;;  %v309_v45 = vadd.f32 %v557_v9, %v270_v37 }
  0x28   : > { %v310_v46 = vadd.f32 %v557_v9, %v271_v38  ;;  %v311_v47 = vadd.f32 %v557_v9, %v272_v39  ;;  %v312_v48 = vadd.f32 %v557_v9, %v273_v40  ;;  %v313_v49 = vadd.f32 %v557_v9, %v274_v41 }
  0x29   : > { %v314_v50 = vadd.f32 %v557_v9, %v275_v42  ;;  %v315_v51 = vadd.f32 %v557_v9, %v276_v43  ;;  %340 = vst [vmem:[%s566_s26 + $0xc0] sm:$0xff] %v308_v44  ;;  %341 = vst [vmem:[%s566_s26 + $0xc8] sm:$0xff] %v309_v45 }
  0x2a   : > { %342 = vst [vmem:[%s566_s26 + $0xd0] sm:$0xff] %v310_v46  ;;  %343 = vst [vmem:[%s566_s26 + $0xd8] sm:$0xff] %v311_v47 }
  0x2b   : > { %344 = vst [vmem:[%s566_s26 + $0xe0] sm:$0xff] %v312_v48  ;;  %345 = vst [vmem:[%s566_s26 + $0xe8] sm:$0xff] %v313_v49 }
  0x2c   : > { %346 = vst [vmem:[%s566_s26 + $0xf0] sm:$0xff] %v314_v50  ;;  %347 = vst [vmem:[%s566_s26 + $0xf8] sm:$0xff] %v315_v51 }
  0x2d PF: > { %s13_s12 = sadd.s32 1, %s510_s12  }
  0x2e   : > { %p10_p4 = scmp.ge.s32.totalorder %s13_s12, 4  }
  0x30   :  { %12 = sbr.rel (!%p10_p4) target bundleno = 1 (0x1), region = 62 }

// kernel: dn1_forward.10
= control target key start
LH: loop header
LB: loop body
LE: loop exit
PB: predicated region body
PF: predicated region fallthrough
CT: control target
= control target key end

     0   :  { %s4388_s12 = smov 0   ;;  %s4390_s13 = smov 0   ;;  %s5459_s0 = inlined_call_operand.vmem [shape: bf16[2,2,10,18,128], index: 0, kind: input, shape index: {}]   ;;  %s5460_s1 = inlined_call_operand.vmem [shape: bf16[1152,128], index: 1, kind: input, shape index: {}]   ;;  %s5461_s2 = inlined_call_operand.vmem [shape: f32[1,128], index: 2, kind: input, shape index: {}]   ;;  %s5462_s3 = inlined_call_operand.vmem [shape: bf16[2,16,16,128], index: 3, kind: output, shape index: {}]  }
   0x1   :  { %s4392_s14 = smov 0   ;;  %s4394_s15 = smov 0  }
   0x2   :  { %s4396_s16 = smov 0  }
   0x3 LB: > { %s22_s17 = sadd.s32 1, %s4358_s14  ;;  %s25_s18 = sadd.s32 1, %s4362_s15  ;;  %s4366_s16 = sphi %s4396_s16, %s13_s16   ;;  %s4362_s15 = sphi %s4394_s15, %s5479_s15   ;;  %s4358_s14 = sphi %s4392_s14, %s5478_s14   ;;  %s4354_s13 = sphi %s4390_s13, %s5477_s13   ;;  %s4350_s12 = sphi %s4388_s12, %s5476_s12  }
   0x4   : > { %p23_p0 = scmp.ge.s32.totalorder %s22_s17, 2  ;;  %p3258_p1 = scmp.ge.s32.totalorder %s4366_s16, 1 }
   0x5   : > { %p157_p2 = scmp.lt.s32.totalorder %s4366_s16, 5 }
   0x6   : > { %s5481_s17 = smov (%p23_p0, %s22_s17), 0  ;;  %s5483_s18 = smov (!%p23_p0, %s25_s18), %s4362_s15 }
   0x7   : > { %p158_p3 = pnand %p3258_p1, %p157_p2  ;;  %p27_p4 = scmp.ge.s32.totalorder %s5483_s18, 2 }
   0x9   : > { %s5485_s18 = smov (%p27_p4, %s5483_s18), 0  ;;  %161 = sbr.rel (%p158_p3) target bundleno = 436 (0x1b4), region = 32 }
  0x10   : > { %v4228_v0 = vld [vmem:[%s5460_s1 + $0x40] sm:$0xff]   ;;  %p190_p5 = scmp.lt.s32.totalorder %s4354_s13, 1  ;;  %p192_p6 = scmp.lt.s32.totalorder %s4350_s12, 1  ;;  %v4230_v2 = vld [vmem:[%s5460_s1 + $0x48] sm:$0xff]   ;;  %v4232_v4 = vld [vmem:[%s5460_s1 + $0x50] sm:$0xff]   ;;  %vm856_vm3 = vcmask 1042432  }
  0x11   : > { %v4229_v1 = vld [vmem:[%s5460_s1 + $0x100] sm:$0xff]   ;;  %3754 = vmatprep.subr.bf16.mxu1 %v4228_v0  ;;  %v4231_v3 = vld [vmem:[%s5460_s1 + $0x108] sm:$0xff]   ;;  %v4233_v5 = vld [vmem:[%s5460_s1 + $0x110] sm:$0xff]   ;;  %vm251_vm0 = vsmask.f32 3328  ;;  %vm857_vm4 = vcmask 1046532  }
  0x12   : > { %s5487_s13 = smov (!%p190_p5, %s4354_s13), 1  ;;  %3882 = vmatprep.subr.bf16.mxu0 %v4229_v1  ;;  %3755 = vmatpush3.bf16.msra.mxu1 %v4228_v0  ;;  %v4234_v6 = vld [vmem:[%s5460_s1 + $0x58] sm:$0xff]   ;;  %v4236_v8 = vld [vmem:[%s5460_s1 + $0x60] sm:$0xff]   ;;  %v4238_v10 = vld [vmem:[%s5460_s1 + $0x68] sm:$0xff]   ;;  %vm252_vm1 = vsmask.f32 7440 }
  0x13   : > { %s193_s27 = scalar_select %p192_p6, %s4350_s12, 1  ;;  %3883 = vmatpush3.bf16.msra.mxu0 %v4229_v1  ;;  %3756 = vmatprep.subr.bf16.mxu1 %v4230_v2  ;;  %v4235_v7 = vld [vmem:[%s5460_s1 + $0x118] sm:$0xff]   ;;  %v4237_v9 = vld [vmem:[%s5460_s1 + $0x120] sm:$0xff]   ;;  %v4239_v11 = vld [vmem:[%s5460_s1 + $0x128] sm:$0xff]  }
  0x14   : > { %s4187_s30 = smul.u32 60, %s5487_s13  ;;  %3884 = vmatprep.subr.bf16.mxu0 %v4231_v3  ;;  %v4240_v25 = vld [vmem:[%s5460_s1 + $0x70] sm:$0xff]   ;;  %v4242_v35 = vld [vmem:[%s5460_s1 + $0x78] sm:$0xff]   ;;  %vm4503_vm2 = vmor %vm251_vm0, %vm252_vm1  ;;  %s3262_s11 = sshll.u32 %s5487_s13, 5 }
  0x15   : > { %s4186_s6 = smul.u32 30, %s193_s27  ;;  %v4241_v29 = vld [vmem:[%s5460_s1 + $0x130] sm:$0xff]   ;;  %v4243_v50 = vld [vmem:[%s5460_s1 + $0x138] sm:$0xff]   ;;  %vm4800_vm5 = vmor %vm856_vm3, %vm857_vm4 }
  0x16   : > { %3757 = vmatpush3.bf16.msra.mxu1 %v4230_v2  ;;  %v4244_v2 = vld [vmem:[%s5460_s1] sm:$0xff]  }
  0x17   : > { %s196_s7 = sadd.s32 %s4187_s30, %s4186_s6  ;;  %3885 = vmatpush3.bf16.msra.mxu0 %v4231_v3  ;;  %3758 = vmatprep.subr.bf16.mxu1 %v4232_v4  ;;  %v4535_v3 = vld [vmem:[%s5460_s1 + $0x140] sm:$0xff]  }
  0x18   : > { %3886 = vmatprep.subr.bf16.mxu0 %v4233_v5  ;;  %s3259_s19 = sshll.u32 %s196_s7, 2 }
  0x19   : > { %s4458_s26 = scalar_lea.vmem %s5459_s0, %s3259_s19 }
  0x1a   : > { %3759 = vmatpush3.bf16.msra.mxu1 %v4232_v4  ;;  %v4467_v12 = vld [vmem:[%s4458_s26] sm:$0xf]  ;;  %v4470_v13 = vld [vmem:[%s4458_s26 + $0x4] sm:$0xf]  ;;  %v4473_v14 = vld [vmem:[%s4458_s26 + $0x8] sm:$0x1] }
  0x1b   : > { %3887 = vmatpush3.bf16.msra.mxu0 %v4233_v5  ;;  %3760 = vmatprep.subr.bf16.mxu1 %v4234_v6  ;;  %v255_v15 = vshrl.u32 %v4467_v12, 16  ;;  %v258_v16 = vshll.u32 %v4467_v12, 16  ;;  %v264_v17 = vshll.u32 %v4470_v13, 16  ;;  %v268_v18 = vshrl.u32 %v4470_v13, 16  ;;  %v3352_v20 = vld [vmem:[%s4458_s26 + $0xc] sm:$0xf] }
  0x1c   : > { %3888 = vmatprep.subr.bf16.mxu0 %v4235_v7  ;;  %v274_v19 = vshll.u32 %v4473_v14, 16  ;;  %v4482_v23 = vld [vmem:[%s4458_s26 + $0x10] sm:$0xf]  ;;  %v4485_v24 = vld [vmem:[%s4458_s26 + $0x14] sm:$0x1]  ;;  %v1391_v28 = vshrl.u32 %v3352_v20, 16 }
  0x1d   : > { %v257_v21 = vrot.slane %v255_v15, 4  ;;  %v260_v22 = vrot.slane %v258_v16, 5  ;;  %v266_v26 = vrot.slane %v264_v17, 5  ;;  %v270_v27 = vrot.slane %v268_v18, 4  ;;  %v4496_v34 = vld [vmem:[%s4458_s26 + $0xc] sm:$0xf] }
  0x1e   : > { %3761 = vmatpush3.bf16.msra.mxu1 %v4234_v6  ;;  %v1394_v31 = vshll.u32 %v3352_v20, 16  ;;  %v1400_v32 = vshll.u32 %v4482_v23, 16  ;;  %v1404_v33 = vshrl.u32 %v4482_v23, 16  ;;  %v276_v38 = vrot.slane %v274_v19, 5  ;;  %v4509_v41 = vld [vmem:[%s4458_s26 + $0x10] sm:$0xf] }
  0x1f   : > { %3889 = vmatpush3.bf16.msra.mxu0 %v4235_v7  ;;  %3762 = vmatprep.subr.bf16.mxu1 %v4236_v8  ;;  %v261_v30 = vor.u32 %v260_v22, %v257_v21  ;;  %v271_v37 = vor.u32 %v270_v27, %v266_v26  ;;  %v1393_v39 = vrot.slane %v1391_v28, 4  ;;  %v1410_v40 = vshll.u32 %v4485_v24, 16  ;;  %v4519_v54 = vld [vmem:[%s4458_s26 + $0x14] sm:$0x1]  ;;  %v3355_v56 = vld [vmem:[%s4458_s26 + $0x18] sm:$0xf] }
  0x20   : > { %3890 = vmatprep.subr.bf16.mxu0 %v4237_v9  ;;  %v1396_v43 = vrot.slane %v1394_v31, 5  ;;  %v1402_v44 = vrot.slane %v1400_v32, 5  ;;  %v1406_v45 = vrot.slane %v1404_v33, 4  ;;  %v279_v48 = vshrl.u32 %v4496_v34, 16  ;;  %v4527_v61 = vld [vmem:[%s4458_s26 + $0x1c] sm:$0xf] }
  0x21   : > { %v262_v42 = vrot.slane %v261_v30, 4  ;;  %v272_v46 = vrot.slane %v271_v37, 4  ;;  %v1412_v47 = vrot.slane %v1410_v40, 5  ;;  %v282_v49 = vshll.u32 %v4496_v34, 16  ;;  %v4539_v7 = vld [vmem:[%s4458_s26 + $0x20] sm:$0x1] }
  0x22   : > { %3763 = vmatpush3.bf16.msra.mxu1 %v4236_v8  ;;  %v1397_v52 = vor.u32 %v1396_v43, %v1393_v39  ;;  %v1407_v53 = vor.u32 %v1406_v45, %v1402_v44  ;;  %v288_v55 = vshll.u32 %v4509_v41, 16  ;;  %v281_v58 = vrot.slane %v279_v48, 4  ;;  %v4556_v33 = vld [vmem:[%s4458_s26 + $0x1c] sm:$0xf] }
  0x23   : > { %3891 = vmatpush3.bf16.msra.mxu0 %v4237_v9  ;;  %3764 = vmatprep.subr.bf16.mxu1 %v4238_v10  ;;  %v267_v51 = vsel %vm4503_vm2, %v262_v42, %v266_v26  ;;  %v277_v57 = vsel %vm4503_vm2, %v272_v46, %v276_v38  ;;  %v284_v59 = vrot.slane %v282_v49, 5  ;;  %v292_v60 = vshrl.u32 %v4509_v41, 16  ;;  %v3358_v42 = vld [vmem:[%s4458_s26 + $0x24] sm:$0xf]  ;;  %v4246_v46 = vld [vmem:[%s5460_s1 + $0x8] sm:$0xff]  }
  0x24   : > { %3892 = vmatprep.subr.bf16.mxu0 %v4239_v11  ;;  %v3264_v62 = vcombine.low %v267_v51, %v277_v57  ;;  %v1398_v63 = vrot.slane %v1397_v52, 4  ;;  %v1408_v0 = vrot.slane %v1407_v53, 4  ;;  %v290_v1 = vrot.slane %v288_v55, 5  ;;  %v4571_v52 = vld [vmem:[%s4458_s26 + $0x28] sm:$0xf] }
  0x25   : > { %v285_v4 = vor.u32 %v284_v59, %v281_v58  ;;  %v294_v5 = vrot.slane %v292_v60, 4  ;;  %v298_v6 = vshll.u32 %v4519_v54, 16  ;;  %v1424_v21 = vshll.u32 %v4527_v61, 16  ;;  %v4576_v57 = vld [vmem:[%s4458_s26 + $0x2c] sm:$0x1]  ;;  %v4248_v59 = vld [vmem:[%s5460_s1 + $0x10] sm:$0xff]  }
  0x26   : > { %3765 = vmatpush3.bf16.msra.mxu1 %v4238_v10  ;;  %3770 = vmatprep.mubr.bf16.mxu1 %v3264_v62  ;;  %v1403_v8 = vsel %vm4503_vm2, %v1398_v63, %v1402_v44  ;;  %v1413_v9 = vsel %vm4503_vm2, %v1408_v0, %v1412_v47  ;;  %v1415_v10 = vshrl.u32 %v3355_v56, 16  ;;  %v1428_v22 = vshrl.u32 %v4527_v61, 16  ;;  %v4247_v60 = vld [vmem:[%s5460_s1 + $0x148] sm:$0xff]  }
  0x27   : > { %3893 = vmatpush3.bf16.msra.mxu0 %v4239_v11  ;;  %3766 = vmatprep.subr.bf16.mxu1 %v4240_v25  ;;  %v1418_v11 = vshll.u32 %v3355_v56, 16  ;;  %v3376_v15 = vcombine.low %v1403_v8, %v1413_v9  ;;  %v286_v16 = vrot.slane %v285_v4, 4  ;;  %v295_v17 = vor.u32 %v294_v5, %v290_v1  ;;  %v4585_v4 = vld [vmem:[%s4458_s26 + $0x24] sm:$0xf] }
  0x28   : > { %3894 = vmatprep.subr.bf16.mxu0 %v4241_v29  ;;  %v300_v18 = vrot.slane %v298_v6, 5  ;;  %v1417_v19 = vrot.slane %v1415_v10, 4  ;;  %v1426_v31 = vrot.slane %v1424_v21, 5  ;;  %v1430_v32 = vrot.slane %v1428_v22, 4  ;;  %v3361_v22 = vld [vmem:[%s4458_s26 + $0x30] sm:$0xf] }
  0x29   : > { %v1420_v20 = vrot.slane %v1418_v11, 5  ;;  %3898 = vmatprep.mubr.bf16.mxu0 %v3376_v15  ;;  %v291_v27 = vsel %vm4503_vm2, %v286_v16, %v290_v1  ;;  %v296_v28 = vrot.slane %v295_v17, 4  ;;  %v312_v49 = vshll.u32 %v4556_v33, 16  ;;  %v4592_v16 = vld [vmem:[%s4458_s26 + $0x28] sm:$0xf] }
  0x2a   : > { %3767 = vmatpush3.bf16.msra.mxu1 %v4240_v25  ;;  %v4548_v25 = vld [vmem:[%s4458_s26 + $0x18] sm:$0xf]  ;;  %v1431_v45 = vor.u32 %v1430_v32, %v1426_v31  ;;  %v1439_v58 = vshrl.u32 %v3358_v42, 16  ;;  %v1442_v1 = vshll.u32 %v3358_v42, 16  ;;  %v1452_v15 = vshrl.u32 %v4571_v52, 16  ;;  %v4249_v32 = vld [vmem:[%s5460_s1 + $0x150] sm:$0xff]  }
  0x2b   : > { %3895 = vmatpush3.bf16.msra.mxu0 %v4241_v29  ;;  %3768 = vmatprep.subr.bf16.mxu1 %v4242_v35  ;;  %v1434_v29 = vshll.u32 %v4539_v7, 16  ;;  %v1421_v30 = vor.u32 %v1420_v20, %v1417_v19  ;;  %v301_v37 = vsel %vm4503_vm2, %v296_v28, %v300_v18  ;;  %v303_v40 = vshrl.u32 %v4548_v25, 16  ;;  %v4595_v17 = vld [vmem:[%s4458_s26 + $0x2c] sm:$0x1]  ;;  %v4250_v42 = vld [vmem:[%s5460_s1 + $0x18] sm:$0xff]  }
  0x2c   : > { %3896 = vmatprep.subr.bf16.mxu0 %v4243_v50  ;;  %v3265_v43 = vcombine.low %v291_v27, %v301_v37  ;;  %v306_v47 = vshll.u32 %v4548_v25, 16  ;;  %v1432_v55 = vrot.slane %v1431_v45, 4  ;;  %v314_v62 = vrot.slane %v312_v49, 5 }
  0x2d   : > { %v1436_v38 = vrot.slane %v1434_v29, 5  ;;  %v1422_v44 = vrot.slane %v1421_v30, 4  ;;  %v305_v48 = vrot.slane %v303_v40, 4  ;;  %v1441_v8 = vrot.slane %v1439_v58, 4  ;;  %v4251_v58 = vld [vmem:[%s5460_s1 + $0x158] sm:$0xff]  }
  0x2e   : > { %3769 = vmatpush3.bf16.msra.mxu1 %v4242_v35  ;;  %v245_v35 = vld [vmem:[%s4458_s26 + $0x20] sm:$0x1]  ;;  %v308_v56 = vrot.slane %v306_v47, 5  ;;  %v1444_v11 = vrot.slane %v1442_v1, 5  ;;  %v1458_v20 = vshll.u32 %v4576_v57, 16  ;;  %v327_v21 = vshrl.u32 %v4585_v4, 16 }
  0x2f   : > { %3897 = vmatpush3.bf16.msra.mxu0 %v4243_v50  ;;  %3786 = vmatprep.subr.bf16.mxu1 %v4244_v2  ;;  %v316_v50 = vshrl.u32 %v4556_v33, 16  ;;  %v322_v51 = vshll.u32 %v245_v35, 16  ;;  %v1427_v53 = vsel %vm4503_vm2, %v1422_v44, %v1426_v31  ;;  %v1437_v5 = vsel %vm4503_vm2, %v1432_v55, %v1436_v38  ;;  %v4602_v31 = vld [vmem:[%s4458_s26 + $0x34] sm:$0xf]  ;;  %v4621_v55 = vld [vmem:[%s4458_s26 + $0x38] sm:$0x1] }
  0x30   : > { %3914 = vmatprep.subr.bf16.mxu0 %v4535_v3  ;;  %v309_v6 = vor.u32 %v308_v56, %v305_v48  ;;  %v3377_v9 = vcombine.low %v1427_v53, %v1437_v5  ;;  %v1445_v28 = vor.u32 %v1444_v11, %v1441_v8  ;;  %v1454_v29 = vrot.slane %v1452_v15, 4  ;;  %v4628_v5 = vld [vmem:[%s4458_s26 + $0x30] sm:$0xf] }
  0x31   : > { %3771 = vmatmul.mubr.bf16.vlgmr.msra.gmra.mrb[0].mxu1 %v3265_v43  ;;  %v318_v63 = vrot.slane %v316_v50, 4  ;;  %v324_v0 = vrot.slane %v322_v51, 5  ;;  %v330_v30 = vshll.u32 %v4585_v4, 16  ;;  %v1460_v37 = vrot.slane %v1458_v20, 5 }
  0x32   : > { %3787 = vmatpush3.bf16.msra.mxu1 %v4244_v2  ;;  %v1448_v2 = vshll.u32 %v4571_v52, 16  ;;  %v310_v18 = vrot.slane %v309_v6, 4  ;;  %3899 = vmatmul.mubr.bf16.vlgmr.msra.gmra.mrb[0].mxu0 %v3377_v9  ;;  %v329_v38 = vrot.slane %v327_v21, 4  ;;  %v336_v40 = vshll.u32 %v4592_v16, 16  ;;  %v4634_v9 = vld [vmem:[%s4458_s26 + $0x34] sm:$0xf] }
  0x33   : > { %3788 = vmatprep.subr.bf16.mxu1 %v4246_v46  ;;  %v319_v10 = vor.u32 %v318_v63, %v314_v62  ;;  %3915 = vmatpush3.bf16.msra.mxu0 %v4535_v3  ;;  %v1446_v44 = vrot.slane %v1445_v28, 4  ;;  %v332_v3 = vrot.slane %v330_v30, 5  ;;  %v340_v48 = vshrl.u32 %v4592_v16, 16 }
  0x34   : > { %v1450_v19 = vrot.slane %v1448_v2, 5  ;;  %v315_v35 = vsel %vm4503_vm2, %v310_v18, %v314_v62  ;;  %3916 = vmatprep.subr.bf16.mxu0 %v4247_v60  ;;  %v338_v47 = vrot.slane %v336_v40, 5  ;;  %v346_v49 = vshll.u32 %v4595_v17, 16 }
  0x35   : > { %v320_v27 = vrot.slane %v319_v10, 4  ;;  %v333_v53 = vor.u32 %v332_v3, %v329_v38  ;;  %v1463_v56 = vshrl.u32 %v3361_v22, 16  ;;  %v342_v62 = vrot.slane %v340_v48, 4  ;;  %v4659_v48 = vld [vmem:[%s4458_s26 + $0x40] sm:$0xf] }
  0x36   : > { %3789 = vmatpush3.bf16.msra.mxu1 %v4246_v46  ;;  %v1455_v45 = vor.u32 %v1454_v29, %v1450_v19  ;;  %v1451_v50 = vsel %vm4503_vm2, %v1446_v44, %v1450_v19  ;;  %v348_v63 = vrot.slane %v346_v49, 5  ;;  %v1472_v1 = vshll.u32 %v4602_v31, 16  ;;  %v4644_v29 = vld [vmem:[%s4458_s26 + $0x38] sm:$0x1]  ;;  %v3364_v44 = vld [vmem:[%s4458_s26 + $0x3c] sm:$0xf] }
  0x37   : > { %3790 = vmatprep.subr.bf16.mxu1 %v4248_v59  ;;  %v325_v43 = vsel %vm4503_vm2, %v320_v27, %v324_v0  ;;  %3917 = vmatpush3.bf16.msra.mxu0 %v4247_v60  ;;  %v1466_v0 = vshll.u32 %v3361_v22, 16  ;;  %v334_v8 = vrot.slane %v333_v53, 4  ;;  %v1465_v2 = vrot.slane %v1463_v56, 4  ;;  %v4252_v60 = vld [vmem:[%s5460_s1 + $0x20] sm:$0xff]   ;;  %v4256_v56 = vld [vmem:[%s5460_s1 + $0x30] sm:$0xff]  }
  0x38   : > { %v3266_v46 = vcombine.low %v315_v35, %v325_v43  ;;  %v1456_v51 = vrot.slane %v1455_v45, 4  ;;  %3918 = vmatprep.subr.bf16.mxu0 %v4249_v32  ;;  %v343_v11 = vor.u32 %v342_v62, %v338_v47  ;;  %v1474_v18 = vrot.slane %v1472_v1, 5 }
  0x39   : > { %v1468_v15 = vrot.slane %v1466_v0, 5  ;;  %v339_v19 = vsel %vm4503_vm2, %v334_v8, %v338_v47  ;;  %v1482_v21 = vshll.u32 %v4621_v55, 16  ;;  %v351_v22 = vshrl.u32 %v4628_v5, 16  ;;  %v4668_v0 = vld [vmem:[%s4458_s26 + $0x44] sm:$0x1]  ;;  %v4255_v8 = vld [vmem:[%s5460_s1 + $0x168] sm:$0xff]  }
  0x3a   : > { %3791 = vmatpush3.bf16.msra.mxu1 %v4248_v59  ;;  %3774 = vmatprep.mubr.bf16.mxu1 %v3266_v46  ;;  %v1461_v6 = vsel %vm4503_vm2, %v1456_v51, %v1460_v37  ;;  %v1476_v59 = vshrl.u32 %v4602_v31, 16  ;;  %v344_v27 = vrot.slane %v343_v11, 4  ;;  %v354_v30 = vshll.u32 %v4628_v5, 16  ;;  %v4254_v37 = vld [vmem:[%s5460_s1 + $0x28] sm:$0xff]   ;;  %v4680_v11 = vld [vmem:[%s4458_s26 + $0x40] sm:$0xf] }
  0x3b   : > { %3792 = vmatprep.subr.bf16.mxu1 %v4250_v42  ;;  %v3378_v10 = vcombine.low %v1451_v50, %v1461_v6  ;;  %v1469_v28 = vor.u32 %v1468_v15, %v1465_v2  ;;  %3919 = vmatpush3.bf16.msra.mxu0 %v4249_v32  ;;  %v360_v35 = vshll.u32 %v4634_v9, 16  ;;  %v1484_v40 = vrot.slane %v1482_v21, 5  ;;  %v4253_v32 = vld [vmem:[%s5460_s1 + $0x160] sm:$0xff]  }
  0x3c   : > { %v1478_v20 = vrot.slane %v1476_v59, 4  ;;  %3920 = vmatprep.subr.bf16.mxu0 %v4251_v58  ;;  %v364_v43 = vshrl.u32 %v4634_v9, 16  ;;  %v349_v45 = vsel %vm4503_vm2, %v344_v27, %v348_v63  ;;  %v356_v46 = vrot.slane %v354_v30, 5  ;;  %v4683_v21 = vld [vmem:[%s4458_s26 + $0x44] sm:$0x1] }
  0x3d   : > { %3902 = vmatprep.mubr.bf16.mxu0 %v3378_v10  ;;  %v1470_v3 = vrot.slane %v1469_v28, 4  ;;  %v362_v47 = vrot.slane %v360_v35, 5  ;;  %v3267_v49 = vcombine.low %v339_v19, %v349_v45  ;;  %v370_v53 = vshll.u32 %v4644_v29, 16  ;;  %v4677_v10 = vld [vmem:[%s4458_s26 + $0x3c] sm:$0xf]  ;;  %5467 = vst [vmem:[#allocation2_spill] sm:$0xff] %v4683_v21 }
  0x3e   : > { %3793 = vmatpush3.bf16.msra.mxu1 %v4250_v42  ;;  %v1479_v38 = vor.u32 %v1478_v20, %v1474_v18  ;;  %v353_v42 = vrot.slane %v351_v22, 4  ;;  %v366_v51 = vrot.slane %v364_v43, 4  ;;  %v1487_v1 = vshrl.u32 %v3364_v44, 16  ;;  %v4258_v22 = vld [vmem:[%s5460_s1 + $0x38] sm:$0xff]   ;;  %v4696_v45 = vld [vmem:[%s4458_s26 + $0x4c] sm:$0xf] }
  0x3f   : > { %3794 = vmatprep.subr.bf16.mxu1 %v4252_v60  ;;  %v1475_v62 = vsel %vm4503_vm2, %v1470_v3, %v1474_v18  ;;  %3921 = vmatpush3.bf16.msra.mxu0 %v4251_v58  ;;  %v1490_v6 = vshll.u32 %v3364_v44, 16  ;;  %v1496_v58 = vshll.u32 %v4659_v48, 16  ;;  %v1500_v30 = vshrl.u32 %v4659_v48, 16 }
  0x40   : > { %v1480_v50 = vrot.slane %v1479_v38, 4  ;;  %v357_v63 = vor.u32 %v356_v46, %v353_v42  ;;  %3775 = vmatmul.mubr.bf16.gmra.mrb[4].mxu1 %v3267_v49  ;;  %v367_v59 = vor.u32 %v366_v51, %v362_v47  ;;  %3922 = vmatprep.subr.bf16.mxu0 %v4253_v32  ;;  %v1489_v19 = vrot.slane %v1487_v1, 4  ;;  %v3367_v38 = vld [vmem:[%s4458_s26 + $0x48] sm:$0xf] }
  0x41   : > { %v1492_v20 = vrot.slane %v1490_v6, 5  ;;  %v1498_v28 = vrot.slane %v1496_v58, 5  ;;  %v1506_v35 = vshll.u32 %v4668_v0, 16  ;;  %v375_v43 = vshrl.u32 %v4677_v10, 16 }
  0x42   : > { %3795 = vmatpush3.bf16.msra.mxu1 %v4252_v60  ;;  %v1485_v2 = vsel %vm4503_vm2, %v1480_v50, %v1484_v40  ;;  %v372_v60 = vrot.slane %v370_v53, 5  ;;  %v358_v18 = vrot.slane %v357_v63, 4  ;;  %v368_v27 = vrot.slane %v367_v59, 4 }
  0x43   : > { %3796 = vmatprep.subr.bf16.mxu1 %v4254_v37  ;;  %v3379_v15 = vcombine.low %v1475_v62, %v1485_v2  ;;  %v1493_v42 = vor.u32 %v1492_v20, %v1489_v19  ;;  %v378_v44 = vshll.u32 %v4677_v10, 16  ;;  %v1502_v46 = vrot.slane %v1500_v30, 4  ;;  %3923 = vmatpush3.bf16.msra.mxu0 %v4253_v32  ;;  %v4257_v62 = vld [vmem:[%s5460_s1 + $0x170] sm:$0xff]  }
  0x44   : > { %v363_v40 = vsel %vm4503_vm2, %v358_v18, %v362_v47  ;;  %v373_v3 = vsel %vm4503_vm2, %v368_v27, %v372_v60  ;;  %v1508_v49 = vrot.slane %v1506_v35, 5  ;;  %v384_v50 = vshll.u32 %v4680_v11, 16  ;;  %3924 = vmatprep.subr.bf16.mxu0 %v4255_v8  ;;  %v4709_v60 = vld [vmem:[%s4458_s26 + $0x50] sm:$0x1]  ;;  %v4714_v18 = vld [vmem:[%s5460_s1 + $0x80] sm:$0xff]  }
  0x45   : > { %3903 = vmatmul.mubr.bf16.gmra.mrb[4].mxu0 %v3379_v15  ;;  %v1494_v51 = vrot.slane %v1493_v42, 4  ;;  %v377_v47 = vrot.slane %v375_v43, 4  ;;  %v380_v53 = vrot.slane %v378_v44, 5  ;;  %v1503_v63 = vor.u32 %v1502_v46, %v1498_v28  ;;  %v4722_v42 = vld [vmem:[%s4458_s26 + $0x48] sm:$0xf] }
  0x46   : > { %3797 = vmatpush3.bf16.msra.mxu1 %v4254_v37  ;;  %v3268_v37 = vcombine.low %v363_v40, %v373_v3  ;;  %v386_v1 = vrot.slane %v384_v50, 5  ;;  %v388_v6 = vshrl.u32 %v4680_v11, 16  ;;  %v394_v2 = vshll.u32 %v4683_v21, 16  ;;  %v4728_v46 = vld [vmem:[%s4458_s26 + $0x4c] sm:$0xf] }
  0x47   : > { %3798 = vmatprep.subr.bf16.mxu1 %v4256_v56  ;;  %v1499_v32 = vsel %vm4503_vm2, %v1494_v51, %v1498_v28  ;;  %v381_v59 = vor.u32 %v380_v53, %v377_v47  ;;  %v1511_v58 = vshrl.u32 %v3367_v38, 16  ;;  %v1514_v15 = vshll.u32 %v3367_v38, 16  ;;  %3925 = vmatpush3.bf16.msra.mxu0 %v4255_v8  ;;  %v4259_v28 = vld [vmem:[%s5460_s1 + $0x178] sm:$0xff]   ;;  %v4733_v53 = vld [vmem:[%s4458_s26 + $0x50] sm:$0x1] }
  0x48   : > { %3778 = vmatprep.mubr.bf16.mxu1 %v3268_v37  ;;  %v1504_v19 = vrot.slane %v1503_v63, 4  ;;  %v390_v20 = vrot.slane %v388_v6, 4  ;;  %v1520_v27 = vshll.u32 %v4696_v45, 16  ;;  %v1524_v40 = vshrl.u32 %v4696_v45, 16  ;;  %3926 = vmatprep.subr.bf16.mxu0 %v4257_v62  ;;  %5468 = vst [vmem:[#allocation3_spill] sm:$0xff] %v4733_v53 }
  0x49   : > { %v382_v30 = vrot.slane %v381_v59, 4  ;;  %v1513_v35 = vrot.slane %v1511_v58, 4  ;;  %v1516_v38 = vrot.slane %v1514_v15, 5  ;;  %v1530_v8 = vshll.u32 %v4709_v60, 16  ;;  %v3370_v63 = vld [vmem:[%s4458_s26 + $0x54] sm:$0xf] }
  0x4a   : > { %3799 = vmatpush3.bf16.msra.mxu1 %v4256_v56  ;;  %v396_v56 = vrot.slane %v394_v2, 5  ;;  %v1509_v43 = vsel %vm4503_vm2, %v1504_v19, %v1508_v49  ;;  %v391_v44 = vor.u32 %v390_v20, %v386_v1  ;;  %v1522_v3 = vrot.slane %v1520_v27, 5  ;;  %v4744_v15 = vld [vmem:[%s5460_s1 + $0x180] sm:$0xff]  }
  0x4b   : > { %3800 = vmatprep.subr.bf16.mxu1 %v4258_v22  ;;  %v3380_v50 = vcombine.low %v1499_v32, %v1509_v43  ;;  %v387_v37 = vsel %vm4503_vm2, %v382_v30, %v386_v1  ;;  %v1517_v51 = vor.u32 %v1516_v38, %v1513_v35  ;;  %v1526_v47 = vrot.slane %v1524_v40, 4  ;;  %3927 = vmatpush3.bf16.msra.mxu0 %v4257_v62  ;;  %v4750_v30 = vld [vmem:[%s4458_s26 + $0x58] sm:$0xf] }
  0x4c   : > { %v392_v6 = vrot.slane %v391_v44, 4  ;;  %v1532_v49 = vrot.slane %v1530_v8, 5  ;;  %v399_v2 = vshrl.u32 %v4722_v42, 16  ;;  %v402_v59 = vshll.u32 %v4722_v42, 16  ;;  %3928 = vmatprep.subr.bf16.mxu0 %v4259_v28  ;;  %v4755_v44 = vld [vmem:[%s4458_s26 + $0x5c] sm:$0x1] }
  0x4d   : > { %3906 = vmatprep.mubr.bf16.mxu0 %v3380_v50  ;;  %v1527_v1 = vor.u32 %v1526_v47, %v1522_v3  ;;  %v408_v32 = vshll.u32 %v4728_v46, 16  ;;  %v412_v58 = vshrl.u32 %v4728_v46, 16  ;;  %v418_v27 = vshll.u32 %v4733_v53, 16  ;;  %v4758_v8 = vld [vmem:[%s4458_s26 + $0x54] sm:$0xf] }
  0x4e   : > { %3801 = vmatpush3.bf16.msra.mxu1 %v4258_v22  ;;  %v1518_v22 = vrot.slane %v1517_v51, 4  ;;  %v397_v19 = vsel %vm4503_vm2, %v392_v6, %v396_v56  ;;  %v401_v62 = vrot.slane %v399_v2, 4  ;;  %v404_v20 = vrot.slane %v402_v59, 5  ;;  %v4761_v6 = vld [vmem:[%s4458_s26 + $0x58] sm:$0xf] }
  0x4f   : > { %3818 = vmatprep.subr.bf16.mxu1 %v4714_v18  ;;  %v3269_v35 = vcombine.low %v387_v37, %v397_v19  ;;  %v1528_v40 = vrot.slane %v1527_v1, 4  ;;  %v410_v43 = vrot.slane %v408_v32, 5  ;;  %v414_v51 = vrot.slane %v412_v58, 4  ;;  %3929 = vmatpush3.bf16.msra.mxu0 %v4259_v28  ;;  %v4785_v53 = vld [vmem:[%s4458_s26 + $0x68] sm:$0x1] }
  0x50   : > { %v1523_v38 = vsel %vm4503_vm2, %v1518_v22, %v1522_v3  ;;  %v405_v50 = vor.u32 %v404_v20, %v401_v62  ;;  %v420_v47 = vrot.slane %v418_v27, 5  ;;  %v1535_v56 = vshrl.u32 %v3370_v63, 16  ;;  %3946 = vmatprep.subr.bf16.mxu0 %v4744_v15  ;;  %v4770_v20 = vld [vmem:[%s4458_s26 + $0x5c] sm:$0x1] }
  0x51   : > { %3779 = vmatmul.mubr.bf16.gmra.mrb[8].mxu1 %v3269_v35  ;;  %v1533_v37 = vsel %vm4503_vm2, %v1528_v40, %v1532_v49  ;;  %v1538_v3 = vshll.u32 %v3370_v63, 16  ;;  %v1544_v2 = vshll.u32 %v4750_v30, 16  ;;  %v1548_v59 = vshrl.u32 %v4750_v30, 16  ;;  %v3373_v63 = vld [vmem:[%s4458_s26 + $0x60] sm:$0xf] }
  0x52   : > { %v3381_v22 = vcombine.low %v1523_v38, %v1533_v37  ;;  %v406_v1 = vrot.slane %v405_v50, 4  ;;  %v415_v32 = vor.u32 %v414_v51, %v410_v43  ;;  %v1537_v58 = vrot.slane %v1535_v56, 4 }
  0x53   : > { %v1540_v28 = vrot.slane %v1538_v3, 5  ;;  %v1546_v19 = vrot.slane %v1544_v2, 5  ;;  %v1550_v62 = vrot.slane %v1548_v59, 4  ;;  %v1554_v49 = vshll.u32 %v4755_v44, 16  ;;  %v4779_v3 = vld [vmem:[%s4458_s26 + $0x64] sm:$0xf] }
  0x54   : > { %3907 = vmatmul.mubr.bf16.gmra.mrb[8].mxu0 %v3381_v22  ;;  %v411_v27 = vsel %vm4503_vm2, %v406_v1, %v410_v43  ;;  %v416_v35 = vrot.slane %v415_v32, 4  ;;  %v423_v38 = vshrl.u32 %v4758_v8, 16  ;;  %v426_v40 = vshll.u32 %v4758_v8, 16 }
  0x55   : > { %v1541_v50 = vor.u32 %v1540_v28, %v1537_v58  ;;  %v1551_v51 = vor.u32 %v1550_v62, %v1546_v19  ;;  %v1556_v56 = vrot.slane %v1554_v49, 5  ;;  %v432_v37 = vshll.u32 %v4761_v6, 16  ;;  %v3392_v58 = vld [vmem:[%s4458_s26 + $0xc] sm:$0xe] }
  0x56   : > { %v421_v2 = vsel %vm4503_vm2, %v416_v35, %v420_v47  ;;  %v425_v59 = vrot.slane %v423_v38, 4  ;;  %v428_v22 = vrot.slane %v426_v40, 5  ;;  %v436_v43 = vshrl.u32 %v4761_v6, 16 }
  0x57   : > { %v3270_v1 = vcombine.low %v411_v27, %v421_v2  ;;  %v1542_v32 = vrot.slane %v1541_v50, 4  ;;  %v1552_v26 = vrot.slane %v1551_v51, 4  ;;  %v434_v39 = vrot.slane %v432_v37, 5 }
  0x58   : > { %v429_v28 = vor.u32 %v428_v22, %v425_v59  ;;  %v438_v62 = vrot.slane %v436_v43, 4  ;;  %v442_v49 = vshll.u32 %v4770_v20, 16  ;;  %v1559_v21 = vshrl.u32 %v3373_v63, 16 }
  0x59   : > { %3782 = vmatprep.mubr.bf16.mxu1 %v3270_v1  ;;  %v1547_v47 = vsel %vm4503_vm2, %v1542_v32, %v1546_v19  ;;  %v1557_v35 = vsel %vm4503_vm2, %v1552_v26, %v1556_v56  ;;  %v1562_v38 = vshll.u32 %v3373_v63, 16  ;;  %v1568_v27 = vshll.u32 %v4779_v3, 16 }
  0x5a   : > { %v3382_v40 = vcombine.low %v1547_v47, %v1557_v35  ;;  %v430_v50 = vrot.slane %v429_v28, 4  ;;  %v439_v51 = vor.u32 %v438_v62, %v434_v39  ;;  %v444_v37 = vrot.slane %v442_v49, 5  ;;  %v3393_v49 = vld [vmem:[%s4458_s26 + $0x18] sm:$0xe]  ;;  %v3394_v47 = vld [vmem:[%s4458_s26 + $0x24] sm:$0xe] }
  0x5b   : > { %v1561_v2 = vrot.slane %v1559_v21, 4  ;;  %v1564_v59 = vrot.slane %v1562_v38, 5  ;;  %v1570_v22 = vrot.slane %v1568_v27, 5  ;;  %v1572_v43 = vshrl.u32 %v4779_v3, 16 }
  0x5c   : > { %3910 = vmatprep.mubr.bf16.mxu0 %v3382_v40  ;;  %v435_v19 = vsel %vm4503_vm2, %v430_v50, %v434_v39  ;;  %v440_v1 = vrot.slane %v439_v51, 4  ;;  %v1578_v26 = vshll.u32 %v4785_v53, 16  ;;  %v3400_v63 = vrot.slane %v3392_v58, 9 }
  0x5d   : > { %v1565_v56 = vor.u32 %v1564_v59, %v1561_v2  ;;  %v1574_v32 = vrot.slane %v1572_v43, 4  ;;  %v1825_v21 = vrot.slane %v4482_v23, 5  ;;  %v3280_v39 = vcombine.low %v4467_v12, %v4470_v13 }
  0x5e   : > { %v445_v62 = vsel %vm4503_vm2, %v440_v1, %v444_v37  ;;  %v1580_v27 = vrot.slane %v1578_v26, 5  ;;  %v1839_v37 = vrot.slane %v4571_v52, 5  ;;  %v5471_v12 = vrot.slane %v4527_v61, 5  ;;  %v4850_v61 = vld [vmem:[%s4458_s26 + $0x48] sm:$0xe] }
  0x5f   : > { %v3271_v35 = vcombine.low %v435_v19, %v445_v62  ;;  %v1566_v58 = vrot.slane %v1565_v56, 4  ;;  %v1575_v38 = vor.u32 %v1574_v32, %v1570_v22  ;;  %v1826_v40 = vsel %vm4800_vm5, %v3400_v63, %v1825_v21  ;;  %v3395_v63 = vld [vmem:[%s4458_s26 + $0x30] sm:$0xe] }
  0x60   : > { %v1827_v50 = vrot.slane %v1825_v21, 4  ;;  %v1834_v13 = vrot.slane %v5471_v12, 4  ;;  %v1835_v2 = vrot.slane %v4539_v7, 5  ;;  %v5472_v59 = vrot.slane %v4485_v24, 5 }
  0x61   : > { %3783 = vmatmul.mubr.bf16.gmra.mrb[12].mxu1 %v3271_v35  ;;  %v1571_v23 = vsel %vm4503_vm2, %v1566_v58, %v1570_v22  ;;  %v1576_v51 = vrot.slane %v1575_v38, 4  ;;  %v3401_v22 = vrot.slane %v3393_v49, 9  ;;  %v3402_v26 = vrot.slane %v3394_v47, 9  ;;  %v3396_v49 = vld [vmem:[%s4458_s26 + $0x3c] sm:$0xe]  ;;  %v4264_v35 = vld [vmem:[%s5460_s1 + $0x88] sm:$0xff]  }
  0x62   : > { %3802 = vmatprep.mubr.bf16.mxu1 %v3280_v39  ;;  %v1829_v43 = vsel %vm4800_vm5, %v1827_v50, %v5472_v59  ;;  %v1841_v56 = vrot.slane %v1839_v37, 4  ;;  %v1842_v32 = vrot.slane %v4576_v57, 5  ;;  %v864_v7 = vrot.slane %v4473_v14, 5 }
  0x63   : > { %v1581_v19 = vsel %vm4503_vm2, %v1576_v51, %v1580_v27  ;;  %v3408_v1 = vcombine.low %v1826_v40, %v1829_v43  ;;  %v871_v24 = vrot.slane %v4519_v54, 5  ;;  %v3281_v21 = vcombine.low %v4496_v34, %v4509_v41  ;;  %v4270_v43 = vld [vmem:[%s5460_s1 + $0x98] sm:$0xff]  }
  0x64   : > { %v3383_v52 = vcombine.low %v1571_v23, %v1581_v19  ;;  %v1836_v62 = vsel %vm4800_vm5, %v1834_v13, %v1835_v2  ;;  %v3282_v39 = vcombine.low %v4548_v25, %v4556_v33  ;;  %v5473_v47 = vmov %v5471_v12  ;;  %v4860_v23 = vld [vmem:[%s4458_s26 + $0x54] sm:$0xe] }
  0x65   : > { %v1833_v57 = vsel %vm4800_vm5, %v3401_v22, %v5473_v47  ;;  %v3403_v34 = vrot.slane %v3395_v63, 9  ;;  %v1846_v41 = vrot.slane %v4602_v31, 5  ;;  %v1853_v58 = vrot.slane %v4659_v48, 5  ;;  %v4265_v48 = vld [vmem:[%s5460_s1 + $0x188] sm:$0xff]  }
  0x66   : > { %3911 = vmatmul.mubr.bf16.gmra.mrb[12].mxu0 %v3383_v52  ;;  %v1840_v25 = vsel %vm4800_vm5, %v3402_v26, %v1839_v37  ;;  %v1843_v33 = vsel %vm4800_vm5, %v1841_v56, %v1842_v32  ;;  %v1849_v38 = vrot.slane %v4621_v55, 5  ;;  %v3404_v27 = vrot.slane %v3396_v49, 9  ;;  %v4863_v55 = vld [vmem:[%s4458_s26 + $0x60] sm:$0xe]  ;;  %v4890_v56 = vld [vmem:[%s4458_s26 + $0x4] sm:$0xf] }
  0x67   : > { %3930 = vmatprep.mubr.bf16.mxu0 %v3408_v1  ;;  %v1856_v40 = vrot.slane %v4668_v0, 5  ;;  %v1860_v50 = vrot.slane %v4696_v45, 5  ;;  %v3409_v31 = vcombine.low %v1833_v57, %v1836_v62  ;;  %v3410_v51 = vcombine.low %v1840_v25, %v1843_v33  ;;  %v4274_v49 = vld [vmem:[%s5460_s1 + $0xa0] sm:$0xff]   ;;  %v4945_v45 = vld [vmem:[%s4458_s26 + $0x18] sm:$0xe] }
  0x68   : > { %v1848_v37 = vrot.slane %v1846_v41, 4  ;;  %v1855_v12 = vrot.slane %v1853_v58, 4  ;;  %v3283_v0 = vcombine.low %v4585_v4, %v4592_v16  ;;  %v1847_v13 = vsel %vm4800_vm5, %v3403_v34, %v1846_v41  ;;  %v4913_v41 = vld [vmem:[%s4458_s26 + $0x10] sm:$0xf] }
  0x69   : > { %3803 = vmatmul.mubr.bf16.vlgmr.msra.gmra.mrb[0].mxu1 %v3281_v21  ;;  %v3284_v2 = vcombine.low %v4628_v5, %v4634_v9  ;;  %v3405_v59 = vrot.slane %v4850_v61, 9  ;;  %v1862_v4 = vrot.slane %v1860_v50, 4  ;;  %v1863_v19 = vrot.slane %v4709_v60, 5  ;;  %v4269_v5 = vld [vmem:[%s5460_s1 + $0x190] sm:$0xff]   ;;  %v832_v21 = vld [vmem:[%s4458_s26] sm:$0xe] }
  0x6a   : > { %3819 = vmatpush3.bf16.msra.mxu1 %v4714_v18  ;;  %3806 = vmatprep.mubr.bf16.mxu1 %v3282_v39  ;;  %v4268_v18 = vld [vmem:[%s5460_s1 + $0x90] sm:$0xff]   ;;  %v3406_v1 = vrot.slane %v4860_v23, 9  ;;  %v1867_v22 = vrot.slane %v4750_v30, 5  ;;  %v1870_v26 = vrot.slane %v4755_v44, 5  ;;  %v3407_v63 = vrot.slane %v4863_v55, 9 }
  0x6b   : > { %3820 = vmatprep.subr.bf16.mxu1 %v4264_v35  ;;  %v1874_v52 = vrot.slane %v4779_v3, 5  ;;  %v861_v60 = vrot.slane %v4890_v56, 5  ;;  %v1850_v30 = vsel %vm4800_vm5, %v1848_v37, %v1849_v38  ;;  %v1854_v32 = vsel %vm4800_vm5, %v3404_v27, %v1853_v58  ;;  %v835_v61 = vld [vmem:[%s4458_s26 + $0x24] sm:$0xe]  ;;  %v837_v56 = vld [vmem:[%s4458_s26 + $0x3c] sm:$0xe] }
  0x6c   : > { %v1857_v44 = vsel %vm4800_vm5, %v1855_v12, %v1856_v40  ;;  %v3411_v62 = vcombine.low %v1847_v13, %v1850_v30  ;;  %v1869_v47 = vrot.slane %v1867_v22, 4  ;;  %v1877_v57 = vrot.slane %v4785_v53, 5  ;;  %v4276_v40 = vld [vmem:[%s5460_s1 + $0xa8] sm:$0xff]   ;;  %v4326_v30 = vld [vmem:[%s4458_s26 + $0x1c] sm:$0xf]  ;;  %v4281_v53 = vld [vmem:[%s5460_s1 + $0x1b0] sm:$0xff]  }
  0x6d   : > { %v3412_v39 = vcombine.low %v1854_v32, %v1857_v44  ;;  %v3296_v34 = vrot.slane %v832_v21, 9  ;;  %v868_v58 = vrot.slane %v4913_v41, 5  ;;  %v882_v25 = vrot.slane %v4592_v16, 5  ;;  %v839_v41 = vld [vmem:[%s4458_s26 + $0x54] sm:$0xe] }
  0x6e   : > { %3931 = vmatmul.mubr.bf16.vlgmr.msra.gmra.mrb[0].mxu0 %v3409_v31  ;;  %3821 = vmatpush3.bf16.msra.mxu1 %v4264_v35  ;;  %v4910_v35 = vrot.slane %v1874_v52, 4  ;;  %v863_v33 = vrot.slane %v861_v60, 4  ;;  %v885_v38 = vrot.slane %v4595_v17, 5  ;;  %v3285_v27 = vcombine.low %v4677_v10, %v4680_v11 }
  0x6f   : > { %3947 = vmatpush3.bf16.msra.mxu0 %v4744_v15  ;;  %3934 = vmatprep.mubr.bf16.mxu0 %v3410_v51  ;;  %v4271_v15 = vld [vmem:[%s5460_s1 + $0x198] sm:$0xff]   ;;  %v3286_v31 = vcombine.low %v4722_v42, %v4728_v46  ;;  %v3299_v16 = vrot.slane %v835_v61, 9  ;;  %v884_v23 = vrot.slane %v882_v25, 4  ;;  %v1861_v17 = vsel %vm4800_vm5, %v3405_v59, %v1860_v50  ;;  %v4275_v51 = vld [vmem:[%s5460_s1 + $0x1a0] sm:$0xff]  }
  0x70   : > { %3948 = vmatprep.subr.bf16.mxu0 %v4265_v48  ;;  %3822 = vmatprep.subr.bf16.mxu1 %v4268_v18  ;;  %v1864_v10 = vsel %vm4800_vm5, %v1862_v4, %v1863_v19  ;;  %v1868_v42 = vsel %vm4800_vm5, %v3406_v1, %v1867_v22  ;;  %v1871_v37 = vsel %vm4800_vm5, %v1869_v47, %v1870_v26  ;;  %v889_v13 = vrot.slane %v4634_v9, 5  ;;  %v836_v4 = vld [vmem:[%s4458_s26 + $0x30] sm:$0xe]  ;;  %v4277_v1 = vld [vmem:[%s5460_s1 + $0x1a8] sm:$0xff]  }
  0x71   : > { %3807 = vmatmul.mubr.bf16.gmra.mrb[4].mxu1 %v3283_v0  ;;  %v4949_v50 = vsel %vm4800_vm5, %v3299_v16, %v882_v25  ;;  %v4953_v12 = vsel %vm4800_vm5, %v884_v23, %v885_v38  ;;  %v3287_v59 = vcombine.low %v4758_v8, %v4761_v6  ;;  %v892_v19 = vrot.slane %v4644_v29, 5  ;;  %v4280_v29 = vld [vmem:[%s5460_s1 + $0xb0] sm:$0xff]   ;;  %v5475_v38 = vld [vmem:[#allocation3_spill] sm:$0xff]  ;;  %v4283_v16 = vld [vmem:[%s5460_s1 + $0x1b8] sm:$0xff]  }
  0x72   : > { %3823 = vmatpush3.bf16.msra.mxu1 %v4268_v18  ;;  %3810 = vmatprep.mubr.bf16.mxu1 %v3284_v2  ;;  %v3307_v18 = vcombine.low %v4949_v50, %v4953_v12  ;;  %v3413_v2 = vcombine.low %v1861_v17, %v1864_v10  ;;  %v3414_v9 = vcombine.low %v1868_v42, %v1871_v37  ;;  %v3300_v8 = vrot.slane %v836_v4, 9  ;;  %v4296_v50 = vld [vmem:[%s4458_s26 + $0x48] sm:$0xff]   ;;  %v4297_v12 = vld [vmem:[%s5460_s1 + $0xe0] sm:$0xff]  }
  0x73   : > { %3949 = vmatpush3.bf16.msra.mxu0 %v4265_v48  ;;  %3824 = vmatprep.subr.bf16.mxu1 %v4270_v43  ;;  %v4929_v48 = vld [vmem:[%s4458_s26 + $0xc] sm:$0xe]  ;;  %v862_v22 = vsel %vm4800_vm5, %v3296_v34, %v861_v60  ;;  %v865_v26 = vsel %vm4800_vm5, %v863_v33, %v864_v7  ;;  %v875_v32 = vrot.slane %v4326_v30, 5  ;;  %v896_v44 = vrot.slane %v4680_v11, 5  ;;  %v5474_v60 = vld [vmem:[#allocation2_spill] sm:$0xff]  ;;  %v4282_v7 = vld [vmem:[%s5460_s1 + $0xb8] sm:$0xff]  }
  0x74   : > { %3950 = vmatprep.subr.bf16.mxu0 %v4269_v5  ;;  %v3297_v0 = vrot.slane %v4929_v48, 9  ;;  %v899_v21 = vrot.slane %v5474_v60, 5  ;;  %v1875_v11 = vsel %vm4800_vm5, %v3407_v63, %v1874_v52  ;;  %v1878_v3 = vsel %vm4800_vm5, %v4910_v35, %v1877_v57  ;;  %v838_v35 = vld [vmem:[%s4458_s26 + $0x48] sm:$0xe] }
  0x75   : > { %v898_v25 = vrot.slane %v896_v44, 4  ;;  %v3304_v55 = vcombine.low %v862_v22, %v865_v26  ;;  %v877_v52 = vrot.slane %v875_v32, 4  ;;  %v903_v61 = vrot.slane %v4728_v46, 5  ;;  %v5080_v26 = vld [vmem:[%s4458_s26 + $0x20] sm:$0x1] }
  0x76   : > { %3935 = vmatmul.mubr.bf16.gmra.mrb[4].mxu0 %v3411_v62  ;;  %3825 = vmatpush3.bf16.msra.mxu1 %v4270_v43  ;;  %v870_v43 = vrot.slane %v868_v58, 4  ;;  %v3298_v62 = vrot.slane %v4945_v45, 9  ;;  %v869_v46 = vsel %vm4800_vm5, %v3297_v0, %v868_v58  ;;  %v910_v10 = vrot.slane %v4761_v6, 5  ;;  %v4285_v6 = vld [vmem:[%s5460_s1 + $0xc0] sm:$0xff]  }
  0x77   : > { %3951 = vmatpush3.bf16.msra.mxu0 %v4269_v5  ;;  %3938 = vmatprep.mubr.bf16.mxu0 %v3412_v39  ;;  %v891_v5 = vrot.slane %v889_v13, 4  ;;  %v3301_v39 = vrot.slane %v837_v56, 9  ;;  %v5015_v33 = vsel %vm4800_vm5, %v898_v25, %v899_v21  ;;  %v905_v48 = vrot.slane %v903_v61, 4  ;;  %v4289_v56 = vld [vmem:[%s5460_s1 + $0x1c8] sm:$0xff]  }
  0x78   : > { %3952 = vmatprep.subr.bf16.mxu0 %v4271_v15  ;;  %3826 = vmatprep.subr.bf16.mxu1 %v4274_v49  ;;  %v872_v23 = vsel %vm4800_vm5, %v870_v43, %v871_v24  ;;  %v876_v17 = vsel %vm4800_vm5, %v3298_v62, %v875_v32  ;;  %v913_v58 = vrot.slane %v4770_v20, 5  ;;  %v3303_v37 = vrot.slane %v839_v41, 9  ;;  %v4288_v43 = vld [vmem:[%s5460_s1 + $0xc8] sm:$0xff]   ;;  %v3459_v62 = vld [vmem:[%s4458_s26 + $0x24] sm:$0xf] }
  0x79   : > { %3811 = vmatmul.mubr.bf16.gmra.mrb[8].mxu1 %v3285_v27  ;;  %v4990_v14 = vsel %vm4800_vm5, %v891_v5, %v892_v19  ;;  %v5011_v63 = vsel %vm4800_vm5, %v3301_v39, %v896_v44  ;;  %v906_v27 = vrot.slane %v5475_v38, 5  ;;  %v912_v45 = vrot.slane %v910_v10, 4  ;;  %v4287_v19 = vld [vmem:[%s5460_s1 + $0x1c0] sm:$0xff]   ;;  %v4291_v44 = vld [vmem:[%s5460_s1 + $0xd0] sm:$0xff]   ;;  %v5101_v25 = vld [vmem:[%s4458_s26 + $0x28] sm:$0xf] }
  0x7a   : > { %3827 = vmatpush3.bf16.msra.mxu1 %v4274_v49  ;;  %3814 = vmatprep.mubr.bf16.mxu1 %v3286_v31  ;;  %v4327_v49 = vld [vmem:[%s4458_s26 + $0x20] sm:$0x1]  ;;  %v3309_v57 = vcombine.low %v5011_v63, %v5015_v33  ;;  %v3302_v31 = vrot.slane %v838_v35, 9  ;;  %v3305_v0 = vcombine.low %v869_v46, %v872_v23  ;;  %v4286_v5 = vld [vmem:[%s4458_s26 + $0x24] sm:$0xff]   ;;  %v4293_v39 = vld [vmem:[%s5460_s1 + $0x1d0] sm:$0xff]  }
  0x7b   : > { %3953 = vmatpush3.bf16.msra.mxu0 %v4271_v15  ;;  %3828 = vmatprep.subr.bf16.mxu1 %v4276_v40  ;;  %v4986_v15 = vsel %vm4800_vm5, %v3300_v8, %v889_v13  ;;  %v878_v47 = vrot.slane %v4327_v49, 5  ;;  %v5050_v24 = vsel %vm4800_vm5, %v905_v48, %v906_v27  ;;  %v5059_v13 = vsel %vm4800_vm5, %v3303_v37, %v910_v10  ;;  %v4292_v35 = vld [vmem:[%s4458_s26 + $0x3c] sm:$0xff]   ;;  %v5120_v46 = vld [vmem:[%s4458_s26 + $0x34] sm:$0xf]  ;;  %v5143_v37 = vld [vmem:[%s4458_s26 + $0x38] sm:$0x1] }
  0x7c   : > { %3954 = vmatprep.subr.bf16.mxu0 %v4275_v51  ;;  %v3308_v34 = vcombine.low %v4986_v15, %v4990_v14  ;;  %v5046_v54 = vsel %vm4800_vm5, %v3302_v31, %v903_v61  ;;  %v4295_v38 = vld [vmem:[%s5460_s1 + $0x1d8] sm:$0xff]   ;;  %v2388_v27 = vshll.u32 %v5101_v25, 16  ;;  %v2412_v41 = vshll.u32 %v5120_v46, 16 }
  0x7d   : > { %v879_v42 = vsel %vm4800_vm5, %v877_v52, %v878_v47  ;;  %v3310_v20 = vcombine.low %v5046_v54, %v5050_v24  ;;  %v2382_v52 = vshll.u32 %v3459_v62, 16  ;;  %v2416_v10 = vshrl.u32 %v5120_v46, 16  ;;  %v4301_v54 = vld [vmem:[%s5460_s1 + $0x1e8] sm:$0xff]   ;;  %v4303_v24 = vld [vmem:[%s5460_s1 + $0xf0] sm:$0xff]  }
  0x7e   : > { %3939 = vmatmul.mubr.bf16.gmra.mrb[8].mxu0 %v3413_v2  ;;  %3829 = vmatpush3.bf16.msra.mxu1 %v4276_v40  ;;  %v3415_v40 = vcombine.low %v1875_v11, %v1878_v3  ;;  %v3306_v2 = vcombine.low %v876_v17, %v879_v42  ;;  %v4294_v11 = vld [vmem:[%s5460_s1 + $0xd8] sm:$0xff]   ;;  %v5104_v3 = vld [vmem:[%s4458_s26 + $0x2c] sm:$0x1]  ;;  %v2803_v36 = vrot.slane %v5120_v46, 5 }
  0x7f   : > { %3955 = vmatpush3.bf16.msra.mxu0 %v4275_v51  ;;  %3942 = vmatprep.mubr.bf16.mxu0 %v3414_v9  ;;  %v4284_v51 = vld [vmem:[%s4458_s26 + $0x18] sm:$0xff]   ;;  %v2398_v48 = vshll.u32 %v5104_v3, 16  ;;  %v2799_v46 = vrot.slane %v5104_v3, 5 }
  0x80   : > { %3956 = vmatprep.subr.bf16.mxu0 %v4277_v1  ;;  %3830 = vmatprep.subr.bf16.mxu1 %v4280_v29  ;;  %v5075_v9 = vld [vmem:[%s4458_s26 + $0x1c] sm:$0xf] }
  0x81   : > { %3815 = vmatmul.mubr.bf16.gmra.mrb[12].mxu1 %v3287_v59  ;;  %v5063_v59 = vsel %vm4800_vm5, %v912_v45, %v913_v58  ;;  %v2364_v30 = vshll.u32 %v5075_v9, 16  ;;  %v2368_v32 = vshrl.u32 %v5075_v9, 16  ;;  %v4299_v58 = vld [vmem:[%s5460_s1 + $0x1e0] sm:$0xff]  }
  0x82   : > { %3831 = vmatpush3.bf16.msra.mxu1 %v4280_v29  ;;  %3834 = vmatprep.mubr.bf16.mxu1 %v3304_v55  ;;  %v3311_v4 = vcombine.low %v5059_v13, %v5063_v59  ;;  %v4290_v29 = vld [vmem:[%s4458_s26 + $0x30] sm:$0xff]   ;;  %v2379_v55 = vshrl.u32 %v3459_v62, 16  ;;  %v5187_v62 = vrot.slane %v2398_v48, 5 }
  0x83   : > { %3957 = vmatpush3.bf16.msra.mxu0 %v4277_v1  ;;  %3832 = vmatprep.subr.bf16.mxu1 %v4282_v7  ;;  %v3456_v1 = vld [vmem:[%s4458_s26 + $0x18] sm:$0xf]  ;;  %v5098_v49 = vrot.slane %v2364_v30, 5  ;;  %v2370_v47 = vrot.slane %v2368_v32, 4 }
  0x84   : > { %3958 = vmatprep.subr.bf16.mxu0 %v4281_v53  ;;  %v2355_v22 = vshrl.u32 %v3456_v1, 16  ;;  %v2358_v8 = vshll.u32 %v3456_v1, 16  ;;  %v2381_v14 = vrot.slane %v2379_v55, 4  ;;  %v4302_v1 = vld [vmem:[%s4458_s26 + $0x60] sm:$0xff]   ;;  %v4306_v55 = vld [vmem:[%s5460_s1 + $0xf8] sm:$0xff]  }
  0x86   : > { %3943 = vmatmul.mubr.bf16.gmra.mrb[12].mxu0 %v3415_v40  ;;  %3833 = vmatpush3.bf16.msra.mxu1 %v4282_v7  ;;  %v2357_v60 = vrot.slane %v2355_v22, 4  ;;  %v2360_v21 = vrot.slane %v2358_v8, 5  ;;  %v2374_v7 = vshll.u32 %v5080_v26, 16  ;;  %v2392_v40 = vshrl.u32 %v5101_v25, 16 }
  0x87   : > { %3959 = vmatpush3.bf16.msra.mxu0 %v4281_v53  ;;  %3962 = vmatprep.mubr.bf16.mxu0 %v4284_v51  ;;  %v3462_v53 = vld [vmem:[%s4458_s26 + $0x30] sm:$0xf]  ;;  %v5140_v51 = vrot.slane %v2388_v27, 5  ;;  %v5158_v8 = vrot.slane %v2412_v41, 5  ;;  %v5205_v27 = vld [vmem:[%s4458_s26 + $0x44] sm:$0x1] }
  0x88   : > { %3960 = vmatprep.subr.bf16.mxu0 %v4283_v16  ;;  %3850 = vmatprep.subr.bf16.mxu1 %v4285_v6  ;;  %v2361_v61 = vor.u32 %v2360_v21, %v2357_v60  ;;  %v2403_v31 = vshrl.u32 %v3462_v53, 16  ;;  %v5127_v15 = vrot.slane %v2374_v7, 5  ;;  %v2406_v17 = vshll.u32 %v3462_v53, 16 }
  0x89   : > { %3835 = vmatmul.mubr.bf16.vlgmr.msra.gmra.mrb[0].mxu1 %v3305_v0  ;;  %v2394_v42 = vrot.slane %v2392_v40, 4  ;;  %v3465_v0 = vld [vmem:[%s4458_s26 + $0x3c] sm:$0xf] }
  0x8a   : > { %3851 = vmatpush3.bf16.msra.mxu1 %v4285_v6  ;;  %3838 = vmatprep.mubr.bf16.mxu1 %v3306_v2  ;;  %v5133_v23 = vrot.slane %v2361_v61, 4  ;;  %v5147_v45 = vrot.slane %v2403_v31, 4  ;;  %v2408_v22 = vrot.slane %v2406_v17, 5  ;;  %v2427_v32 = vshrl.u32 %v3465_v0, 16  ;;  %v4304_v31 = vld [vmem:[%s4458_s26 + $0x6c] sm:$0xff]  }
  0x8b   : > { %3961 = vmatpush3.bf16.msra.mxu0 %v4283_v16  ;;  %3852 = vmatprep.subr.bf16.mxu1 %v4288_v43  ;;  %v4300_v16 = vld [vmem:[%s5460_s1 + $0xe8] sm:$0xff]   ;;  %v2395_v30 = vor.u32 %v2394_v42, %v5140_v51  ;;  %v2430_v63 = vshll.u32 %v3465_v0, 16 }
  0x8c   : > { %3978 = vmatprep.subr.bf16.mxu0 %v4287_v19  ;;  %v2409_v53 = vor.u32 %v2408_v22, %v5147_v45  ;;  %v2429_v40 = vrot.slane %v2427_v32, 4  ;;  %v4309_v45 = vld [vmem:[%s4458_s26 + $0x18] sm:$0xff]   ;;  %v5243_v32 = vld [vmem:[%s4458_s26 + $0x64] sm:$0xf] }
  0x8d   : > { %v5198_v61 = vrot.slane %v2395_v30, 4  ;;  %v3474_v30 = vld [vmem:[%s4458_s26 + $0x60] sm:$0xf] }
  0x8e   : > { %3963 = vmatmul.mubr.bf16.vlgmr.msra.gmra.mrb[0].mxu0 %v4286_v5  ;;  %3853 = vmatpush3.bf16.msra.mxu1 %v4288_v43  ;;  %v5151_v43 = vld [vmem:[%s4458_s26 + $0x40] sm:$0xf]  ;;  %v2418_v5 = vrot.slane %v2416_v10, 4  ;;  %v2410_v41 = vrot.slane %v2409_v53, 4  ;;  %v2446_v10 = vshll.u32 %v5205_v27, 16 }
  0x8f   : > { %3979 = vmatpush3.bf16.msra.mxu0 %v4287_v19  ;;  %3966 = vmatprep.mubr.bf16.mxu0 %v4290_v29  ;;  %v4298_v19 = vld [vmem:[%s4458_s26 + $0x54] sm:$0xff]   ;;  %v2422_v29 = vshll.u32 %v5143_v37, 16  ;;  %v2436_v33 = vshll.u32 %v5151_v43, 16  ;;  %v5271_v53 = vld [vmem:[%s4458_s26 + $0x5c] sm:$0x1] }
  0x90   : > { %3980 = vmatprep.subr.bf16.mxu0 %v4289_v56  ;;  %3854 = vmatprep.subr.bf16.mxu1 %v4291_v44 }
  0x91   : > { %3839 = vmatmul.mubr.bf16.gmra.mrb[4].mxu1 %v3307_v18  ;;  %v2371_v18 = vor.u32 %v2370_v47, %v5098_v49 }
  0x92   : > { %3855 = vmatpush3.bf16.msra.mxu1 %v4291_v44  ;;  %3842 = vmatprep.mubr.bf16.mxu1 %v3308_v34  ;;  %v2384_v34 = vrot.slane %v2382_v52, 5  ;;  %v5169_v44 = vld [vmem:[%s4458_s26 + $0x4c] sm:$0xf] }
  0x93   : > { %3981 = vmatpush3.bf16.msra.mxu0 %v4289_v56  ;;  %3856 = vmatprep.subr.bf16.mxu1 %v4294_v11  ;;  %v5145_v6 = vrot.slane %v2371_v18, 4  ;;  %v3468_v56 = vld [vmem:[%s4458_s26 + $0x48] sm:$0xf]  ;;  %v2460_v7 = vshll.u32 %v5169_v44, 16  ;;  %v2464_v47 = vshrl.u32 %v5169_v44, 16  ;;  %v4308_v52 = vld [vmem:[%s4458_s26 + $0xc] sm:$0xff]  }
  0x94   : > { %3982 = vmatprep.subr.bf16.mxu0 %v4293_v39  ;;  %v2385_v2 = vor.u32 %v2384_v34, %v2381_v14 }
  0x95   : > { %v2377_v60 = vsel %vm4503_vm2, %v5145_v6, %v5127_v15  ;;  %v5211_v15 = vld [vmem:[%s4458_s26 + $0x50] sm:$0x1]  ;;  %v5216_v48 = vrot.slane %v2460_v7, 5  ;;  %v5226_v6 = vld [vmem:[%s4458_s26 + $0x58] sm:$0xf] }
  0x96   : > { %3967 = vmatmul.mubr.bf16.gmra.mrb[4].mxu0 %v4292_v35  ;;  %3857 = vmatpush3.bf16.msra.mxu1 %v4294_v11  ;;  %v5185_v21 = vrot.slane %v2385_v2, 4  ;;  %v2454_v11 = vshll.u32 %v3468_v56, 16  ;;  %v2419_v35 = vor.u32 %v2418_v5, %v5158_v8  ;;  %v2470_v42 = vshll.u32 %v5211_v15, 16 }
  0x97   : > { %3983 = vmatpush3.bf16.msra.mxu0 %v4293_v39  ;;  %3970 = vmatprep.mubr.bf16.mxu0 %v4296_v50  ;;  %v2451_v39 = vshrl.u32 %v3468_v56, 16  ;;  %v2432_v50 = vrot.slane %v2430_v63, 5  ;;  %v2401_v2 = vsel %vm4503_vm2, %v5198_v61, %v5187_v62  ;;  %v2415_v63 = vsel %vm4503_vm2, %v2410_v41, %v5158_v8  ;;  %v5268_v61 = vld [vmem:[%s5460_s1 + $0x210] sm:$0xff]  }
  0x98   : > { %3984 = vmatprep.subr.bf16.mxu0 %v4295_v38  ;;  %3858 = vmatprep.subr.bf16.mxu1 %v4297_v12  ;;  %v2456_v34 = vrot.slane %v2454_v11, 5  ;;  %v2420_v13 = vrot.slane %v2419_v35, 4  ;;  %v2391_v0 = vsel %vm4503_vm2, %v5185_v21, %v5140_v51  ;;  %v4312_v51 = vld [vmem:[%s4458_s26 + $0x24] sm:$0xff]   ;;  %v2488_v56 = vshrl.u32 %v5226_v6, 16 }
  0x99   : > { %3843 = vmatmul.mubr.bf16.gmra.mrb[8].mxu1 %v3309_v57  ;;  %v2440_v57 = vshrl.u32 %v5151_v43, 16  ;;  %v2453_v14 = vrot.slane %v2451_v39, 4  ;;  %v2433_v59 = vor.u32 %v2432_v50, %v2429_v40  ;;  %v5261_v8 = vrot.slane %v2470_v42, 5  ;;  %v3477_v50 = vld [vmem:[%s4458_s26 + $0x6c] sm:$0xf] }
  0x9a   : > { %3859 = vmatpush3.bf16.msra.mxu1 %v4297_v12  ;;  %3846 = vmatprep.mubr.bf16.mxu1 %v3310_v20  ;;  %v2367_v20 = vsel %vm4503_vm2, %v5133_v23, %v5098_v49  ;;  %v4305_v49 = vld [vmem:[%s5460_s1 + $0x1f0] sm:$0xff]   ;;  %v5207_v12 = vrot.slane %v2436_v33, 5  ;;  %v4307_v23 = vld [vmem:[%s5460_s1 + $0x1f8] sm:$0xff]   ;;  %v5249_v33 = vrot.slane %v2446_v10, 5  ;;  %v2499_v21 = vshrl.u32 %v3474_v30, 16 }
  0x9b   : > { %3985 = vmatpush3.bf16.msra.mxu0 %v4295_v38  ;;  %3860 = vmatprep.subr.bf16.mxu1 %v4300_v16  ;;  %v5202_v38 = vrot.slane %v2422_v29, 5  ;;  %v2442_v18 = vrot.slane %v2440_v57, 4  ;;  %v3480_v17 = vcombine.low %v2367_v20, %v2377_v60  ;;  %v2484_v57 = vshll.u32 %v5226_v6, 16 }
  0x9c   : > { %3986 = vmatprep.subr.bf16.mxu0 %v4299_v58  ;;  %v2434_v20 = vrot.slane %v2433_v59, 4  ;;  %v2502_v62 = vshll.u32 %v3474_v30, 16  ;;  %v2508_v39 = vshll.u32 %v5243_v32, 16  ;;  %v2512_v11 = vshrl.u32 %v5243_v32, 16 }
  0x9d   : > { %v5273_v35 = vrot.slane %v2484_v57, 5  ;;  %v2523_v59 = vshrl.u32 %v3477_v50, 16 }
  0x9e   : > { %3971 = vmatmul.mubr.bf16.gmra.mrb[8].mxu0 %v4298_v19  ;;  %3861 = vmatpush3.bf16.msra.mxu1 %v4300_v16  ;;  %v2466_v16 = vrot.slane %v2464_v47, 4  ;;  %v4310_v19 = vld [vmem:[%s5460_s1 + $0x200] sm:$0xff]   ;;  %v2439_v41 = vsel %vm4503_vm2, %v2434_v20, %v5207_v12 }
  0x9f   : > { %3987 = vmatpush3.bf16.msra.mxu0 %v4299_v58  ;;  %3974 = vmatprep.mubr.bf16.mxu0 %v4302_v1  ;;  %v3471_v58 = vld [vmem:[%s4458_s26 + $0x54] sm:$0xf]  ;;  %v2457_v1 = vor.u32 %v2456_v34, %v2453_v14  ;;  %v2504_v14 = vrot.slane %v2502_v62, 5  ;;  %v5280_v34 = vrot.slane %v2508_v39, 5 }
  0xa0   : > { %3988 = vmatprep.subr.bf16.mxu0 %v4301_v54  ;;  %3862 = vmatprep.subr.bf16.mxu1 %v4303_v24  ;;  %v2467_v22 = vor.u32 %v2466_v16, %v5216_v48  ;;  %v2475_v5 = vshrl.u32 %v3471_v58, 16  ;;  %v2478_v29 = vshll.u32 %v3471_v58, 16  ;;  %v2514_v16 = vrot.slane %v2512_v11, 4  ;;  %v5290_v58 = vld [vmem:[%s4458_s26 + $0x68] sm:$0x1] }
  0xa1   : > { %3847 = vmatmul.mubr.bf16.gmra.mrb[12].mxu1 %v3311_v4  ;;  %v2443_v4 = vor.u32 %v2442_v18, %v5207_v12  ;;  %v2458_v7 = vrot.slane %v2457_v1, 4  ;;  %v5278_v18 = vld [vmem:[%s4458_s26 + $0x70] sm:$0xf]  ;;  %v5299_v12 = vld [vmem:[%s5460_s1 + $0x218] sm:$0xff]   ;;  %v2494_v1 = vshll.u32 %v5271_v53, 16 }
  0xa2   : > { %3863 = vmatpush3.bf16.msra.mxu1 %v4303_v24  ;;  %3866 = vmatprep.mubr.bf16.mxu1 %v4308_v52  ;;  %v2425_v24 = vsel %vm4503_vm2, %v2420_v13, %v5202_v38  ;;  %v2468_v47 = vrot.slane %v2467_v22, 4  ;;  %v3481_v52 = vcombine.low %v2391_v0, %v2401_v2  ;;  %v2490_v38 = vrot.slane %v2488_v56, 4  ;;  %v4316_v13 = vld [vmem:[%s4458_s26 + $0x3c] sm:$0xff]   ;;  %v3500_v11 = vld [vmem:[%s4458_s26 + $0x48] sm:$0xe] }
  0xa3   : > { %3989 = vmatpush3.bf16.msra.mxu0 %v4301_v54  ;;  %3864 = vmatprep.subr.bf16.mxu1 %v4306_v55  ;;  %v5256_v54 = vld [vmem:[%s5460_s1 + $0x208] sm:$0xff]   ;;  %v2444_v60 = vrot.slane %v2443_v4, 4  ;;  %v3482_v40 = vcombine.low %v2415_v63, %v2425_v24  ;;  %v2526_v4 = vshll.u32 %v3477_v50, 16  ;;  %v2532_v42 = vshll.u32 %v5278_v18, 16 }
  0xa4   : > { %3990 = vmatprep.subr.bf16.mxu0 %v4305_v49  ;;  %v2463_v0 = vsel %vm4503_vm2, %v2458_v7, %v5216_v48  ;;  %v2491_v2 = vor.u32 %v2490_v38, %v5273_v35  ;;  %v2496_v20 = vrot.slane %v2494_v1, 5  ;;  %v4317_v7 = vld [vmem:[%s4458_s26 + $0x48] sm:$0xff]  }
  0xa5   : > { %v2528_v63 = vrot.slane %v2526_v4, 5  ;;  %v4319_v50 = vld [vmem:[%s5460_s1 + $0x228] sm:$0xff]  }
  0xa6   : > { %3975 = vmatmul.mubr.bf16.gmra.mrb[12].mxu0 %v4304_v31  ;;  %3865 = vmatpush3.bf16.msra.mxu1 %v4306_v55  ;;  %v2480_v55 = vrot.slane %v2478_v29, 5  ;;  %v2501_v31 = vrot.slane %v2499_v21, 4  ;;  %v2518_v29 = vshll.u32 %v5290_v58, 16  ;;  %v2492_v24 = vrot.slane %v2491_v2, 4  ;;  %v4318_v21 = vld [vmem:[%s5460_s1 + $0x220] sm:$0xff]  }
  0xa7   : > { %3991 = vmatpush3.bf16.msra.mxu0 %v4305_v49  ;;  %3994 = vmatprep.mubr.bf16.mxu0 %v3480_v17  ;;  %v2477_v49 = vrot.slane %v2475_v5, 4  ;;  %v4313_v17 = vld [vmem:[%s4458_s26 + $0x30] sm:$0xff]   ;;  %v2515_v5 = vor.u32 %v2514_v16, %v5280_v34  ;;  %v3502_v2 = vld [vmem:[%s4458_s26 + $0x60] sm:$0xe] }
  0xa8   : > { %3992 = vmatprep.subr.bf16.mxu0 %v4307_v23  ;;  %4042 = vmatprep.subr.bf16.mxu1 %v4310_v19  ;;  %v2505_v22 = vor.u32 %v2504_v14, %v2501_v31  ;;  %v3508_v31 = vrot.slane %v3500_v11, 9 }
  0xa9   : > { %3867 = vmatmul.mubr.bf16.vlgmr.msra.gmra.mrb[0].mxu1 %v4309_v45  ;;  %v2481_v10 = vor.u32 %v2480_v55, %v2477_v49  ;;  %v2536_v45 = vshrl.u32 %v5278_v18, 16  ;;  %v2516_v39 = vrot.slane %v2515_v5, 4  ;;  %v4320_v49 = vld [vmem:[%s4458_s26 + $0x54] sm:$0xff]  }
  0xaa   : > { %4050 = vmatpush3.bf16.msra.mxu1 %v4310_v19  ;;  %3870 = vmatprep.mubr.bf16.mxu1 %v4312_v51  ;;  %v2525_v51 = vrot.slane %v2523_v59, 4  ;;  %v2506_v62 = vrot.slane %v2505_v22, 4 }
  0xab   : > { %3993 = vmatpush3.bf16.msra.mxu0 %v4307_v23  ;;  %4043 = vmatprep.subr.bf16.mxu1 %v5256_v54  ;;  %v2449_v23 = vsel %vm4503_vm2, %v2444_v60, %v5249_v33  ;;  %v2482_v30 = vrot.slane %v2481_v10, 4  ;;  %v5314_v33 = vrot.slane %v2532_v42, 5  ;;  %v2538_v57 = vrot.slane %v2536_v45, 4  ;;  %v5319_v60 = vld [vmem:[%s4458_s26 + $0x74] sm:$0x1] }
  0xac   : > { %4010 = vmatprep.subr.bf16.mxu0 %v4310_v19  ;;  %v3483_v48 = vcombine.low %v2439_v41, %v2449_v23  ;;  %v2529_v55 = vor.u32 %v2528_v63, %v2525_v51  ;;  %v2542_v38 = vshll.u32 %v5319_v60, 16  ;;  %v2511_v16 = vsel %vm4503_vm2, %v2506_v62, %v5280_v34  ;;  %v4323_v51 = vld [vmem:[%s5460_s1 + $0x238] sm:$0xff]  }
  0xad   : > { %v2792_v10 = vrot.slane %v5080_v26, 5  ;;  %v3501_v26 = vld [vmem:[%s4458_s26 + $0x54] sm:$0xe]  ;;  %v2831_v45 = vrot.slane %v5243_v32, 5  ;;  %v2796_v63 = vrot.slane %v5101_v25, 5  ;;  %v2841_v3 = vrot.slane %v5319_v60, 5 }
  0xae   : > { %3995 = vmatmul.mubr.bf16.vlgmr.msra.gmra.mrb[0].mxu0 %v3481_v52  ;;  %4051 = vmatpush3.bf16.msra.mxu1 %v5256_v54  ;;  %v2539_v52 = vor.u32 %v2538_v57, %v5314_v33  ;;  %v2544_v4 = vrot.slane %v2542_v38, 5  ;;  %v3510_v57 = vrot.slane %v3502_v2, 9 }
  0xaf   : > { %4011 = vmatpush3.bf16.msra.mxu0 %v4310_v19  ;;  %3998 = vmatprep.mubr.bf16.mxu0 %v3482_v40  ;;  %v2473_v19 = vsel %vm4503_vm2, %v2468_v47, %v5261_v8  ;;  %v2817_v8 = vrot.slane %v5169_v44, 5  ;;  %v2789_v47 = vrot.slane %v5075_v9, 5  ;;  %v2487_v44 = vsel %vm4503_vm2, %v2482_v30, %v5273_v35  ;;  %v3496_v40 = vld [vmem:[%s4458_s26 + $0x18] sm:$0xe]  ;;  %v3497_v30 = vld [vmem:[%s4458_s26 + $0x24] sm:$0xe] }
  0xb0   : > { %4012 = vmatprep.subr.bf16.mxu0 %v5256_v54  ;;  %4044 = vmatprep.subr.bf16.mxu1 %v5268_v61  ;;  %v3484_v56 = vcombine.low %v2463_v0, %v2473_v19  ;;  %v2497_v9 = vsel %vm4503_vm2, %v2492_v24, %v2496_v20  ;;  %v2820_v35 = vrot.slane %v5211_v15, 5  ;;  %v3504_v41 = vrot.slane %v3496_v40, 9  ;;  %v4322_v0 = vld [vmem:[%s5460_s1 + $0x230] sm:$0xff]   ;;  %v4321_v19 = vld [vmem:[%s4458_s26 + $0x60] sm:$0xff]  }
  0xb1   : > { %3871 = vmatmul.mubr.bf16.gmra.mrb[4].mxu1 %v4313_v17  ;;  %v2819_v14 = vrot.slane %v2817_v8, 4  ;;  %v2824_v17 = vrot.slane %v5226_v6, 5  ;;  %v2791_v23 = vrot.slane %v2789_v47, 4  ;;  %v3485_v15 = vcombine.low %v2487_v44, %v2497_v9 }
  0xb2   : > { %4052 = vmatpush3.bf16.msra.mxu1 %v5268_v61  ;;  %3874 = vmatprep.mubr.bf16.mxu1 %v4316_v13  ;;  %v2530_v13 = vrot.slane %v2529_v55, 4  ;;  %v2540_v59 = vrot.slane %v2539_v52, 4  ;;  %v2818_v42 = vsel %vm4800_vm5, %v3508_v31, %v2817_v8  ;;  %v2790_v22 = vsel %vm4800_vm5, %v3504_v41, %v2789_v47  ;;  %v3498_v8 = vld [vmem:[%s4458_s26 + $0x30] sm:$0xe] }
  0xb3   : > { %4013 = vmatpush3.bf16.msra.mxu0 %v5256_v54  ;;  %4045 = vmatprep.subr.bf16.mxu1 %v5299_v12  ;;  %v2520_v54 = vrot.slane %v2518_v29, 5  ;;  %v2821_v6 = vsel %vm4800_vm5, %v2819_v14, %v2820_v35  ;;  %v2826_v1 = vrot.slane %v2824_v17, 4  ;;  %v2793_v5 = vsel %vm4800_vm5, %v2791_v23, %v2792_v10  ;;  %v3499_v14 = vld [vmem:[%s4458_s26 + $0x3c] sm:$0xe] }
  0xb4   : > { %4014 = vmatprep.subr.bf16.mxu0 %v5268_v61  ;;  %v2535_v32 = vsel %vm4503_vm2, %v2530_v13, %v5314_v33  ;;  %v2545_v29 = vsel %vm4503_vm2, %v2540_v59, %v2544_v4  ;;  %v2834_v24 = vrot.slane %v5290_v58, 5  ;;  %v3505_v33 = vrot.slane %v3497_v30, 9 }
  0xb5   : > { %v3512_v62 = vcombine.low %v2790_v22, %v2793_v5  ;;  %v2838_v58 = vrot.slane %v5278_v18, 5  ;;  %v3506_v47 = vrot.slane %v3498_v8, 9  ;;  %v2805_v44 = vrot.slane %v2803_v36, 4 }
  0xb6   : > { %3999 = vmatmul.mubr.bf16.gmra.mrb[4].mxu0 %v3483_v48  ;;  %4053 = vmatpush3.bf16.msra.mxu1 %v5299_v12  ;;  %v3516_v48 = vcombine.low %v2818_v42, %v2821_v6  ;;  %v2797_v40 = vsel %vm4800_vm5, %v3505_v33, %v2796_v63  ;;  %v2813_v41 = vrot.slane %v5205_v27, 5 }
  0xb7   : > { %4015 = vmatpush3.bf16.msra.mxu0 %v5268_v61  ;;  %4002 = vmatprep.mubr.bf16.mxu0 %v3484_v56  ;;  %v2521_v61 = vsel %vm4503_vm2, %v2516_v39, %v2520_v54  ;;  %v2833_v56 = vrot.slane %v2831_v45, 4  ;;  %v2798_v39 = vrot.slane %v2796_v63, 4  ;;  %v2832_v54 = vsel %vm4800_vm5, %v3510_v57, %v2831_v45 }
  0xb8   : > { %4016 = vmatprep.subr.bf16.mxu0 %v5299_v12  ;;  %4046 = vmatprep.subr.bf16.mxu1 %v4318_v21  ;;  %v3486_v34 = vcombine.low %v2511_v16, %v2521_v61  ;;  %v2840_v38 = vrot.slane %v2838_v58, 4 }
  0xb9   : > { %3875 = vmatmul.mubr.bf16.gmra.mrb[8].mxu1 %v4317_v7  ;;  %v2835_v11 = vsel %vm4800_vm5, %v2833_v56, %v2834_v24  ;;  %v3503_v7 = vld [vmem:[%s4458_s26 + $0x6c] sm:$0xe]  ;;  %v2800_v9 = vsel %vm4800_vm5, %v2798_v39, %v2799_v46  ;;  %s3260_s26 = sshll.u32 %s4350_s12, 3  ;;  %v3528_v46 = vld [vmem:[%s5461_s2] ss:$0 sm:$0xff] }
  0xba   : > { %4054 = vmatpush3.bf16.msra.mxu1 %v4318_v21  ;;  %3878 = vmatprep.mubr.bf16.mxu1 %v4320_v49  ;;  %v2806_v49 = vrot.slane %v5143_v37, 5  ;;  %v3518_v18 = vcombine.low %v2832_v54, %v2835_v11  ;;  %v3511_v52 = vrot.slane %v3503_v7, 9  ;;  %v2804_v37 = vsel %vm4800_vm5, %v3506_v47, %v2803_v36  ;;  %p202_p7 = scmp.lt.s32.totalorder %s3260_s26, 15 }
  0xbb   : > { %4017 = vmatpush3.bf16.msra.mxu0 %v5299_v12  ;;  %4047 = vmatprep.subr.bf16.mxu1 %v4319_v50  ;;  %v2827_v12 = vrot.slane %v5271_v53, 5  ;;  %v3509_v53 = vrot.slane %v3501_v26, 9  ;;  %v3513_v60 = vcombine.low %v2797_v40, %v2800_v9  ;;  %v2842_v16 = vsel %vm4800_vm5, %v2840_v38, %v2841_v3 }
  0xbc   : > { %4018 = vmatprep.subr.bf16.mxu0 %v4318_v21  ;;  %v2807_v31 = vsel %vm4800_vm5, %v2805_v44, %v2806_v49  ;;  %v2839_v35 = vsel %vm4800_vm5, %v3511_v52, %v2838_v58  ;;  %s5489_s26 = smov (!%p202_p7, %s3260_s26), 15 }
  0xbd   : > { %v2828_v20 = vsel %vm4800_vm5, %v2826_v1, %v2827_v12  ;;  %v2825_v25 = vsel %vm4800_vm5, %v3509_v53, %v2824_v17  ;;  %v3514_v61 = vcombine.low %v2804_v37, %v2807_v31  ;;  %v3519_v23 = vcombine.low %v2839_v35, %v2842_v16  ;;  %s3261_s10 = sshll.u32 %s5489_s26, 1 }
  0xbe   : > { %4003 = vmatmul.mubr.bf16.gmra.mrb[8].mxu0 %v3485_v15  ;;  %4055 = vmatpush3.bf16.msra.mxu1 %v4319_v50  ;;  %v3517_v55 = vcombine.low %v2825_v25, %v2828_v20  ;;  %s206_s12 = sadd.s32 %s3262_s11, %s3261_s10 }
  0xbf   : > { %4019 = vmatpush3.bf16.msra.mxu0 %v4318_v21  ;;  %4006 = vmatprep.mubr.bf16.mxu0 %v3486_v34  ;;  %v3487_v21 = vcombine.low %v2535_v32, %v2545_v29  ;;  %s3263_s21 = sshll.u32 %s206_s12, 2 }
  0xc0   : > { %4020 = vmatprep.subr.bf16.mxu0 %v4319_v50  ;;  %4048 = vmatprep.subr.bf16.mxu1 %v4322_v0  ;;  %s5430_s23 = scalar_lea.vmem %s5462_s3, %s3263_s21 }
  0xc1   : > { %3879 = vmatmul.mubr.bf16.gmra.mrb[12].mxu1 %v4321_v19 }
  0xc2   : > { %4056 = vmatpush3.bf16.msra.mxu1 %v4322_v0  ;;  %4034 = vmatprep.mubr.bf16.mxu1 %v3516_v48 }
  0xc3   : > { %4021 = vmatpush3.bf16.msra.mxu0 %v4319_v50  ;;  %4049 = vmatprep.subr.bf16.mxu1 %v4323_v51  ;;  %v2810_v50 = vrot.slane %v5151_v43, 5  ;;  %v3507_v43 = vrot.slane %v3499_v14, 9 }
  0xc4   : > { %4022 = vmatprep.subr.bf16.mxu0 %v4322_v0 }
  0xc5   : > { %v2812_v17 = vrot.slane %v2810_v50, 4  ;;  %v2811_v10 = vsel %vm4800_vm5, %v3507_v43, %v2810_v50 }
  0xc6   : > { %4007 = vmatmul.mubr.bf16.gmra.mrb[12].mxu0 %v3487_v21  ;;  %4057 = vmatpush3.bf16.msra.mxu1 %v4323_v51 }
  0xc7   : > { %4023 = vmatpush3.bf16.msra.mxu0 %v4322_v0  ;;  %4026 = vmatprep.mubr.bf16.mxu0 %v3512_v62  ;;  %v2814_v15 = vsel %vm4800_vm5, %v2812_v17, %v2813_v41 }
  0xc8   : > { %4024 = vmatprep.subr.bf16.mxu0 %v4323_v51  ;;  %v3515_v13 = vcombine.low %v2811_v10, %v2814_v15 }
  0xc9   : > { %4035 = vmatmul.mubr.bf16.vlgmr.msra.gmra.mrb[16].mxu1 %v3517_v55 }
  0xca   : > { %4038 = vmatprep.mubr.bf16.mxu1 %v3518_v18 }
  0xcb   : > { %4025 = vmatpush3.bf16.msra.mxu0 %v4323_v51 }
  0xce   : > { %4027 = vmatmul.mubr.bf16.vlgmr.msra.gmra.mrb[0].mxu0 %v3513_v60 }
  0xcf   : > { %4030 = vmatprep.mubr.bf16.mxu0 %v3514_v61 }
  0xd1   : > { %4039 = vmatmul.mubr.bf16.gmra.mrb[20].mxu1 %v3519_v23 }
  0xd6   : > { %4031 = vmatmul.mubr.bf16.gmra.mrb[4].mxu0 %v3515_v13 }
 0x17c   : > { %v3868_v59 = vpop.f32.mrb[0].mxu1 }
 0x17d   : > { %v1287_v4 = vpop.f32.mrb[1].mxu1 }
 0x17e   : > { %v3869_v34 = vpop.f32.mrb[2].mxu1 }
 0x17f   : > { %v1290_v42 = vpop.f32.mrb[3].mxu1 }
 0x184   : > { %v5414_v6 = vpop.f32.mrb[4].mxu1 }
 0x185   : > { %v5416_v27 = vpop.f32.mrb[5].mxu1 }
 0x186   : > { %v5418_v26 = vpop.f32.mrb[6].mxu1 }
 0x187   : > { %v5420_v45 = vpop.f32.mrb[7].mxu1 }
 0x18c   : > { %v3876_v0 = vpop.f32.mrb[8].mxu1 }
 0x18d   : > { %v1319_v2 = vpop.f32.mrb[9].mxu1 }
 0x18e   : > { %v3877_v28 = vpop.f32.mrb[10].mxu1 }
 0x18f   : > { %v1322_v1 = vpop.f32.mrb[11].mxu1 }
 0x191   : > { %v4004_v12 = vpop.f32.mrb[8].mxu0 }
 0x192   : > { %v4066_v19 = vadd.f32 %v4004_v12, %v3876_v0  ;;  %v2708_v22 = vpop.f32.mrb[9].mxu0 }
 0x193   : > { %v4068_v5 = vadd.f32 %v2708_v22, %v1319_v2  ;;  %v4005_v32 = vpop.f32.mrb[10].mxu0 }
 0x194   : > { %v4070_v29 = vadd.f32 %v4005_v32, %v3877_v28  ;;  %v2711_v48 = vpop.f32.mrb[11].mxu0  ;;  %v3880_v30 = vpop.f32.mrb[12].mxu1 }
 0x195   : > { %v4072_v53 = vadd.f32 %v2711_v48, %v1322_v1  ;;  %v1335_v51 = vpop.f32.mrb[13].mxu1 }
 0x196   : > { %v3881_v63 = vpop.f32.mrb[14].mxu1 }
 0x197   : > { %v1338_v57 = vpop.f32.mrb[15].mxu1 }
 0x199   : > { %v4008_v56 = vpop.f32.mrb[12].mxu0 }
 0x19a   : > { %v4074_v24 = vadd.f32 %v4008_v56, %v3880_v30  ;;  %v2724_v36 = vpop.f32.mrb[13].mxu0 }
 0x19b   : > { %v4076_v33 = vadd.f32 %v2724_v36, %v1335_v51  ;;  %v4009_v20 = vpop.f32.mrb[14].mxu0 }
 0x19c   : > { %v4078_v8 = vadd.f32 %v4009_v20, %v3881_v63  ;;  %v2727_v21 = vpop.f32.mrb[15].mxu0  ;;  %v4036_v62 = vpop.f32.mrb[16].mxu1 }
 0x19d   : > { %v4080_v25 = vadd.f32 %v2727_v21, %v1338_v57  ;;  %v4067_v58 = vadd.f32 %v4066_v19, %v4036_v62  ;;  %v3005_v39 = vpop.f32.mrb[17].mxu1 }
 0x19e   : > { %v4069_v54 = vadd.f32 %v4068_v5, %v3005_v39  ;;  %v4037_v11 = vpop.f32.mrb[18].mxu1 }
 0x19f   : > { %v4071_v7 = vadd.f32 %v4070_v29, %v4037_v11  ;;  %v3008_v47 = vpop.f32.mrb[19].mxu1  ;;  %v3069_v55 = vadd.f32 %v4067_v58, %v3528_v46 }
 0x1a0   : > { %v4073_v44 = vadd.f32 %v4072_v53, %v3008_v47  ;;  %v3067_v3 = vadd.f32 %v4069_v54, %v3528_v46 }
 0x1a1   : > { %v4028_v49 = vpop.f32.mrb[0].mxu0  ;;  %v3070_v18 = vadd.f32 %v4071_v7, %v3528_v46 }
 0x1a2   : > { %v4058_v52 = vadd.f32 %v4028_v49, %v3868_v59  ;;  %v2973_v38 = vpop.f32.mrb[1].mxu0  ;;  %v3068_v40 = vadd.f32 %v4073_v44, %v3528_v46 }
 0x1a3   : > { %v4059_v9 = vadd.f32 %v2973_v38, %v1287_v4  ;;  %v4029_v50 = vpop.f32.mrb[2].mxu0  ;;  %v3591_v37 = vpack.c.bf16 %v3070_v18, %v3069_v55 }
 0x1a4   : > { %v4060_v31 = vadd.f32 %v4029_v50, %v3869_v34  ;;  %v2976_v14 = vpop.f32.mrb[3].mxu0  ;;  %v3586_v60 = vpack.c.bf16 %v3068_v40, %v3067_v3  ;;  %v4040_v35 = vpop.f32.mrb[20].mxu1  ;;  %v3061_v17 = vadd.f32 %v4058_v52, %v3528_v46 }
 0x1a5   : > { %3607 = vst [vmem:[%s5430_s23 + $0x28] sm:$0xff] %v3591_v37   ;;  %v4061_v16 = vadd.f32 %v2976_v14, %v1290_v42  ;;  %v4075_v61 = vadd.f32 %v4074_v24, %v4040_v35  ;;  %v3021_v43 = vpop.f32.mrb[21].mxu1  ;;  %v3059_v15 = vadd.f32 %v4059_v9, %v3528_v46 }
 0x1a6   : > { %v3062_v41 = vadd.f32 %v4060_v31, %v3528_v46  ;;  %3606 = vst [vmem:[%s5430_s23 + $0x20] sm:$0xff] %v3586_v60   ;;  %v4077_v23 = vadd.f32 %v4076_v33, %v3021_v43  ;;  %v4041_v10 = vpop.f32.mrb[22].mxu1 }
 0x1a7   : > { %v3060_v13 = vadd.f32 %v4061_v16, %v3528_v46  ;;  %v4079_v59 = vadd.f32 %v4078_v8, %v4041_v10  ;;  %v3024_v4 = vpop.f32.mrb[23].mxu1  ;;  %v3073_v1 = vadd.f32 %v4075_v61, %v3528_v46 }
 0x1a8   : > { %v3571_v0 = vpack.c.bf16 %v3062_v41, %v3061_v17  ;;  %v4081_v34 = vadd.f32 %v4080_v25, %v3024_v4  ;;  %v3071_v22 = vadd.f32 %v4077_v23, %v3528_v46 }
 0x1a9   : > { %v3566_v2 = vpack.c.bf16 %v3060_v13, %v3059_v15  ;;  %v4032_v28 = vpop.f32.mrb[4].mxu0  ;;  %v3074_v42 = vadd.f32 %v4079_v59, %v3528_v46 }
 0x1aa   : > { %3603 = vst [vmem:[%s5430_s23 + $0x8] sm:$0xff] %v3571_v0   ;;  %v4062_v12 = vadd.f32 %v4032_v28, %v5414_v6  ;;  %v2989_v19 = vpop.f32.mrb[5].mxu0  ;;  %v3072_v5 = vadd.f32 %v4081_v34, %v3528_v46 }
 0x1ab   : > { %3567 = vst [vmem:[%s5430_s23] sm:$0xff] %v3566_v2   ;;  %v4063_v32 = vadd.f32 %v2989_v19, %v5416_v27  ;;  %v4033_v29 = vpop.f32.mrb[6].mxu0  ;;  %v3601_v48 = vpack.c.bf16 %v3074_v42, %v3073_v1 }
 0x1ac   : > { %v4064_v30 = vadd.f32 %v4033_v29, %v5418_v26  ;;  %v2992_v53 = vpop.f32.mrb[7].mxu0  ;;  %v3596_v51 = vpack.c.bf16 %v3072_v5, %v3071_v22  ;;  %v3065_v57 = vadd.f32 %v4062_v12, %v3528_v46 }
 0x1ad   : > { %3609 = vst [vmem:[%s5430_s23 + $0x38] sm:$0xff] %v3601_v48   ;;  %v4065_v63 = vadd.f32 %v2992_v53, %v5420_v45  ;;  %v3063_v6 = vadd.f32 %v4063_v32, %v3528_v46 }
 0x1ae   : > { %v3066_v56 = vadd.f32 %v4064_v30, %v3528_v46  ;;  %3608 = vst [vmem:[%s5430_s23 + $0x30] sm:$0xff] %v3596_v51  }
 0x1af   : > { %v3064_v24 = vadd.f32 %v4065_v63, %v3528_v46 }
 0x1b0   : > { %v3581_v36 = vpack.c.bf16 %v3066_v56, %v3065_v57 }
 0x1b1   : > { %v3576_v33 = vpack.c.bf16 %v3064_v24, %v3063_v6 }
 0x1b2   : > { %3605 = vst [vmem:[%s5430_s23 + $0x18] sm:$0xff] %v3581_v36  }
 0x1b3   : > { %3604 = vst [vmem:[%s5430_s23 + $0x10] sm:$0xff] %v3576_v33  }
 0x1b4 PF: > { %s13_s16 = sadd.s32 1, %s4366_s16   ;;  %s5476_s12 = smov %s4358_s14 }
 0x1b5   : > { %p10_p8 = scmp.ge.s32.totalorder %s13_s16, 6   ;;  %s5477_s13 = smov %s4362_s15 }
 0x1b6   : > { %s5478_s14 = smov %s5481_s17  ;;  %s5479_s15 = smov %s5485_s18 }
 0x1b7   :  { %12 = sbr.rel (!%p10_p8) target bundleno = 3 (0x3), region = 64 }

// kernel: dn1_forward.11
= control target key start
LH: loop header
LB: loop body
LE: loop exit
PB: predicated region body
PF: predicated region fallthrough
CT: control target
= control target key end

     0   :  { %s4436_s12 = smov 0   ;;  %s4438_s13 = smov 0   ;;  %s5544_s0 = inlined_call_operand.vmem [shape: bf16[2,2,10,18,128], index: 0, kind: input, shape index: {}]   ;;  %s5545_s1 = inlined_call_operand.vmem [shape: bf16[1152,128], index: 1, kind: input, shape index: {}]   ;;  %s5546_s2 = inlined_call_operand.vmem [shape: f32[1,128], index: 2, kind: input, shape index: {}]   ;;  %s5547_s3 = inlined_call_operand.vmem [shape: bf16[2,16,16,128], index: 3, kind: output, shape index: {}]  }
   0x1   :  { %s4440_s14 = smov 0   ;;  %s4442_s15 = smov 0  }
   0x2   :  { %s4444_s16 = smov 0  }
   0x3 LB: > { %s22_s17 = sadd.s32 1, %s4406_s14  ;;  %s25_s18 = sadd.s32 1, %s4410_s15  ;;  %s4414_s16 = sphi %s4444_s16, %s13_s16   ;;  %s4410_s15 = sphi %s4442_s15, %s5564_s15   ;;  %s4406_s14 = sphi %s4440_s14, %s5563_s14   ;;  %s4402_s13 = sphi %s4438_s13, %s5562_s13   ;;  %s4398_s12 = sphi %s4436_s12, %s5561_s12  }
   0x4   : > { %p23_p0 = scmp.ge.s32.totalorder %s22_s17, 2  ;;  %p3306_p1 = scmp.ge.s32.totalorder %s4414_s16, 1 }
   0x5   : > { %p157_p2 = scmp.lt.s32.totalorder %s4414_s16, 5 }
   0x6   : > { %s5566_s17 = smov (%p23_p0, %s22_s17), 0  ;;  %s5568_s18 = smov (!%p23_p0, %s25_s18), %s4410_s15 }
   0x7   : > { %p158_p3 = pnand %p3306_p1, %p157_p2  ;;  %p27_p4 = scmp.ge.s32.totalorder %s5568_s18, 2 }
   0x9   : > { %s5570_s18 = smov (%p27_p4, %s5568_s18), 0  ;;  %161 = sbr.rel (%p158_p3) target bundleno = 442 (0x1ba), region = 32 }
  0x10   : > { %v4276_v0 = vld [vmem:[%s5545_s1 + $0x40] sm:$0xff]   ;;  %p190_p5 = scmp.lt.s32.totalorder %s4402_s13, 1  ;;  %p192_p6 = scmp.lt.s32.totalorder %s4398_s12, 1  ;;  %v4278_v2 = vld [vmem:[%s5545_s1 + $0x48] sm:$0xff]   ;;  %v4280_v4 = vld [vmem:[%s5545_s1 + $0x50] sm:$0xff]   ;;  %vm856_vm3 = vcmask 1042432  }
  0x11   : > { %v4277_v1 = vld [vmem:[%s5545_s1 + $0x100] sm:$0xff]   ;;  %3802 = vmatprep.subr.bf16.mxu1 %v4276_v0  ;;  %v4279_v3 = vld [vmem:[%s5545_s1 + $0x108] sm:$0xff]   ;;  %v4281_v5 = vld [vmem:[%s5545_s1 + $0x110] sm:$0xff]   ;;  %vm251_vm0 = vsmask.f32 3328  ;;  %vm857_vm4 = vcmask 1046532  }
  0x12   : > { %s5572_s13 = smov (!%p190_p5, %s4402_s13), 1  ;;  %3930 = vmatprep.subr.bf16.mxu0 %v4277_v1  ;;  %3803 = vmatpush3.bf16.msra.mxu1 %v4276_v0  ;;  %v4282_v6 = vld [vmem:[%s5545_s1 + $0x58] sm:$0xff]   ;;  %v4284_v8 = vld [vmem:[%s5545_s1 + $0x60] sm:$0xff]   ;;  %v4286_v10 = vld [vmem:[%s5545_s1 + $0x68] sm:$0xff]   ;;  %vm252_vm1 = vsmask.f32 7440 }
  0x13   : > { %s193_s27 = scalar_select %p192_p6, %s4398_s12, 1  ;;  %3931 = vmatpush3.bf16.msra.mxu0 %v4277_v1  ;;  %3804 = vmatprep.subr.bf16.mxu1 %v4278_v2  ;;  %v4283_v7 = vld [vmem:[%s5545_s1 + $0x118] sm:$0xff]   ;;  %v4285_v9 = vld [vmem:[%s5545_s1 + $0x120] sm:$0xff]   ;;  %v4287_v11 = vld [vmem:[%s5545_s1 + $0x128] sm:$0xff]  }
  0x14   : > { %s4235_s30 = smul.u32 60, %s5572_s13  ;;  %3932 = vmatprep.subr.bf16.mxu0 %v4279_v3  ;;  %v4288_v25 = vld [vmem:[%s5545_s1 + $0x70] sm:$0xff]   ;;  %v4290_v35 = vld [vmem:[%s5545_s1 + $0x78] sm:$0xff]   ;;  %vm4551_vm2 = vmor %vm251_vm0, %vm252_vm1 }
  0x15   : > { %s4234_s6 = smul.u32 30, %s193_s27  ;;  %v4289_v29 = vld [vmem:[%s5545_s1 + $0x130] sm:$0xff]   ;;  %v4291_v50 = vld [vmem:[%s5545_s1 + $0x138] sm:$0xff]   ;;  %vm4848_vm5 = vmor %vm856_vm3, %vm857_vm4 }
  0x16   : > { %3805 = vmatpush3.bf16.msra.mxu1 %v4278_v2  ;;  %v4292_v2 = vld [vmem:[%s5545_s1] sm:$0xff]  }
  0x17   : > { %s196_s7 = sadd.s32 %s4235_s30, %s4234_s6  ;;  %3933 = vmatpush3.bf16.msra.mxu0 %v4279_v3  ;;  %3806 = vmatprep.subr.bf16.mxu1 %v4280_v4  ;;  %v4583_v3 = vld [vmem:[%s5545_s1 + $0x140] sm:$0xff]  }
  0x18   : > { %3934 = vmatprep.subr.bf16.mxu0 %v4281_v5  ;;  %s3307_s19 = sshll.u32 %s196_s7, 2 }
  0x19   : > { %s4506_s26 = scalar_lea.vmem %s5544_s0, %s3307_s19  ;;  %s3310_s19 = sshll.u32 %s5572_s13, 5 }
  0x1a   : > { %3807 = vmatpush3.bf16.msra.mxu1 %v4280_v4  ;;  %v4515_v12 = vld [vmem:[%s4506_s26] sm:$0xf]  ;;  %v4518_v13 = vld [vmem:[%s4506_s26 + $0x4] sm:$0xf]  ;;  %v4521_v14 = vld [vmem:[%s4506_s26 + $0x8] sm:$0x1] }
  0x1b   : > { %3935 = vmatpush3.bf16.msra.mxu0 %v4281_v5  ;;  %3808 = vmatprep.subr.bf16.mxu1 %v4282_v6  ;;  %v255_v15 = vshrl.u32 %v4515_v12, 16  ;;  %v258_v16 = vshll.u32 %v4515_v12, 16  ;;  %v264_v17 = vshll.u32 %v4518_v13, 16  ;;  %v268_v18 = vshrl.u32 %v4518_v13, 16  ;;  %v3400_v20 = vld [vmem:[%s4506_s26 + $0xc] sm:$0xf] }
  0x1c   : > { %3936 = vmatprep.subr.bf16.mxu0 %v4283_v7  ;;  %v274_v19 = vshll.u32 %v4521_v14, 16  ;;  %v4530_v23 = vld [vmem:[%s4506_s26 + $0x10] sm:$0xf]  ;;  %v4533_v24 = vld [vmem:[%s4506_s26 + $0x14] sm:$0x1]  ;;  %v1391_v28 = vshrl.u32 %v3400_v20, 16 }
  0x1d   : > { %v257_v21 = vrot.slane %v255_v15, 4  ;;  %v260_v22 = vrot.slane %v258_v16, 5  ;;  %v266_v26 = vrot.slane %v264_v17, 5  ;;  %v270_v27 = vrot.slane %v268_v18, 4  ;;  %v4544_v34 = vld [vmem:[%s4506_s26 + $0xc] sm:$0xf] }
  0x1e   : > { %3809 = vmatpush3.bf16.msra.mxu1 %v4282_v6  ;;  %v1394_v31 = vshll.u32 %v3400_v20, 16  ;;  %v1400_v32 = vshll.u32 %v4530_v23, 16  ;;  %v1404_v33 = vshrl.u32 %v4530_v23, 16  ;;  %v276_v38 = vrot.slane %v274_v19, 5  ;;  %v4557_v41 = vld [vmem:[%s4506_s26 + $0x10] sm:$0xf] }
  0x1f   : > { %3937 = vmatpush3.bf16.msra.mxu0 %v4283_v7  ;;  %3810 = vmatprep.subr.bf16.mxu1 %v4284_v8  ;;  %v261_v30 = vor.u32 %v260_v22, %v257_v21  ;;  %v271_v37 = vor.u32 %v270_v27, %v266_v26  ;;  %v1393_v39 = vrot.slane %v1391_v28, 4  ;;  %v1410_v40 = vshll.u32 %v4533_v24, 16  ;;  %v4567_v54 = vld [vmem:[%s4506_s26 + $0x14] sm:$0x1]  ;;  %v3403_v56 = vld [vmem:[%s4506_s26 + $0x18] sm:$0xf] }
  0x20   : > { %3938 = vmatprep.subr.bf16.mxu0 %v4285_v9  ;;  %v1396_v43 = vrot.slane %v1394_v31, 5  ;;  %v1402_v44 = vrot.slane %v1400_v32, 5  ;;  %v1406_v45 = vrot.slane %v1404_v33, 4  ;;  %v279_v48 = vshrl.u32 %v4544_v34, 16  ;;  %v4575_v61 = vld [vmem:[%s4506_s26 + $0x1c] sm:$0xf] }
  0x21   : > { %v262_v42 = vrot.slane %v261_v30, 4  ;;  %v272_v46 = vrot.slane %v271_v37, 4  ;;  %v1412_v47 = vrot.slane %v1410_v40, 5  ;;  %v282_v49 = vshll.u32 %v4544_v34, 16  ;;  %v4587_v7 = vld [vmem:[%s4506_s26 + $0x20] sm:$0x1] }
  0x22   : > { %3811 = vmatpush3.bf16.msra.mxu1 %v4284_v8  ;;  %v1397_v52 = vor.u32 %v1396_v43, %v1393_v39  ;;  %v1407_v53 = vor.u32 %v1406_v45, %v1402_v44  ;;  %v288_v55 = vshll.u32 %v4557_v41, 16  ;;  %v281_v58 = vrot.slane %v279_v48, 4  ;;  %v4604_v33 = vld [vmem:[%s4506_s26 + $0x1c] sm:$0xf] }
  0x23   : > { %3939 = vmatpush3.bf16.msra.mxu0 %v4285_v9  ;;  %3812 = vmatprep.subr.bf16.mxu1 %v4286_v10  ;;  %v267_v51 = vsel %vm4551_vm2, %v262_v42, %v266_v26  ;;  %v277_v57 = vsel %vm4551_vm2, %v272_v46, %v276_v38  ;;  %v284_v59 = vrot.slane %v282_v49, 5  ;;  %v292_v60 = vshrl.u32 %v4557_v41, 16  ;;  %v3406_v42 = vld [vmem:[%s4506_s26 + $0x24] sm:$0xf]  ;;  %v4294_v46 = vld [vmem:[%s5545_s1 + $0x8] sm:$0xff]  }
  0x24   : > { %3940 = vmatprep.subr.bf16.mxu0 %v4287_v11  ;;  %v3312_v62 = vcombine.low %v267_v51, %v277_v57  ;;  %v1398_v63 = vrot.slane %v1397_v52, 4  ;;  %v1408_v0 = vrot.slane %v1407_v53, 4  ;;  %v290_v1 = vrot.slane %v288_v55, 5  ;;  %v4619_v52 = vld [vmem:[%s4506_s26 + $0x28] sm:$0xf] }
  0x25   : > { %v285_v4 = vor.u32 %v284_v59, %v281_v58  ;;  %v294_v5 = vrot.slane %v292_v60, 4  ;;  %v298_v6 = vshll.u32 %v4567_v54, 16  ;;  %v1424_v21 = vshll.u32 %v4575_v61, 16  ;;  %v4624_v57 = vld [vmem:[%s4506_s26 + $0x2c] sm:$0x1]  ;;  %v4296_v59 = vld [vmem:[%s5545_s1 + $0x10] sm:$0xff]  }
  0x26   : > { %3813 = vmatpush3.bf16.msra.mxu1 %v4286_v10  ;;  %3818 = vmatprep.mubr.bf16.mxu1 %v3312_v62  ;;  %v1403_v8 = vsel %vm4551_vm2, %v1398_v63, %v1402_v44  ;;  %v1413_v9 = vsel %vm4551_vm2, %v1408_v0, %v1412_v47  ;;  %v1415_v10 = vshrl.u32 %v3403_v56, 16  ;;  %v1428_v22 = vshrl.u32 %v4575_v61, 16  ;;  %v4295_v60 = vld [vmem:[%s5545_s1 + $0x148] sm:$0xff]  }
  0x27   : > { %3941 = vmatpush3.bf16.msra.mxu0 %v4287_v11  ;;  %3814 = vmatprep.subr.bf16.mxu1 %v4288_v25  ;;  %v1418_v11 = vshll.u32 %v3403_v56, 16  ;;  %v3424_v15 = vcombine.low %v1403_v8, %v1413_v9  ;;  %v286_v16 = vrot.slane %v285_v4, 4  ;;  %v295_v17 = vor.u32 %v294_v5, %v290_v1  ;;  %v4633_v4 = vld [vmem:[%s4506_s26 + $0x24] sm:$0xf] }
  0x28   : > { %3942 = vmatprep.subr.bf16.mxu0 %v4289_v29  ;;  %v300_v18 = vrot.slane %v298_v6, 5  ;;  %v1417_v19 = vrot.slane %v1415_v10, 4  ;;  %v1426_v31 = vrot.slane %v1424_v21, 5  ;;  %v1430_v32 = vrot.slane %v1428_v22, 4  ;;  %v3409_v22 = vld [vmem:[%s4506_s26 + $0x30] sm:$0xf] }
  0x29   : > { %v1420_v20 = vrot.slane %v1418_v11, 5  ;;  %3946 = vmatprep.mubr.bf16.mxu0 %v3424_v15  ;;  %v291_v27 = vsel %vm4551_vm2, %v286_v16, %v290_v1  ;;  %v296_v28 = vrot.slane %v295_v17, 4  ;;  %v312_v49 = vshll.u32 %v4604_v33, 16  ;;  %v4640_v16 = vld [vmem:[%s4506_s26 + $0x28] sm:$0xf] }
  0x2a   : > { %3815 = vmatpush3.bf16.msra.mxu1 %v4288_v25  ;;  %v4596_v25 = vld [vmem:[%s4506_s26 + $0x18] sm:$0xf]  ;;  %v1431_v45 = vor.u32 %v1430_v32, %v1426_v31  ;;  %v1439_v58 = vshrl.u32 %v3406_v42, 16  ;;  %v1442_v1 = vshll.u32 %v3406_v42, 16  ;;  %v1452_v15 = vshrl.u32 %v4619_v52, 16  ;;  %v4297_v32 = vld [vmem:[%s5545_s1 + $0x150] sm:$0xff]  }
  0x2b   : > { %3943 = vmatpush3.bf16.msra.mxu0 %v4289_v29  ;;  %3816 = vmatprep.subr.bf16.mxu1 %v4290_v35  ;;  %v1434_v29 = vshll.u32 %v4587_v7, 16  ;;  %v1421_v30 = vor.u32 %v1420_v20, %v1417_v19  ;;  %v301_v37 = vsel %vm4551_vm2, %v296_v28, %v300_v18  ;;  %v303_v40 = vshrl.u32 %v4596_v25, 16  ;;  %v4643_v17 = vld [vmem:[%s4506_s26 + $0x2c] sm:$0x1]  ;;  %v4298_v42 = vld [vmem:[%s5545_s1 + $0x18] sm:$0xff]  }
  0x2c   : > { %3944 = vmatprep.subr.bf16.mxu0 %v4291_v50  ;;  %v3313_v43 = vcombine.low %v291_v27, %v301_v37  ;;  %v306_v47 = vshll.u32 %v4596_v25, 16  ;;  %v1432_v55 = vrot.slane %v1431_v45, 4  ;;  %v314_v62 = vrot.slane %v312_v49, 5 }
  0x2d   : > { %v1436_v38 = vrot.slane %v1434_v29, 5  ;;  %v1422_v44 = vrot.slane %v1421_v30, 4  ;;  %v305_v48 = vrot.slane %v303_v40, 4  ;;  %v1441_v8 = vrot.slane %v1439_v58, 4  ;;  %v4299_v58 = vld [vmem:[%s5545_s1 + $0x158] sm:$0xff]  }
  0x2e   : > { %3817 = vmatpush3.bf16.msra.mxu1 %v4290_v35  ;;  %v245_v35 = vld [vmem:[%s4506_s26 + $0x20] sm:$0x1]  ;;  %v308_v56 = vrot.slane %v306_v47, 5  ;;  %v1444_v11 = vrot.slane %v1442_v1, 5  ;;  %v1458_v20 = vshll.u32 %v4624_v57, 16  ;;  %v327_v21 = vshrl.u32 %v4633_v4, 16 }
  0x2f   : > { %3945 = vmatpush3.bf16.msra.mxu0 %v4291_v50  ;;  %3834 = vmatprep.subr.bf16.mxu1 %v4292_v2  ;;  %v316_v50 = vshrl.u32 %v4604_v33, 16  ;;  %v322_v51 = vshll.u32 %v245_v35, 16  ;;  %v1427_v53 = vsel %vm4551_vm2, %v1422_v44, %v1426_v31  ;;  %v1437_v5 = vsel %vm4551_vm2, %v1432_v55, %v1436_v38  ;;  %v4650_v31 = vld [vmem:[%s4506_s26 + $0x34] sm:$0xf]  ;;  %v4669_v55 = vld [vmem:[%s4506_s26 + $0x38] sm:$0x1] }
  0x30   : > { %3962 = vmatprep.subr.bf16.mxu0 %v4583_v3  ;;  %v309_v6 = vor.u32 %v308_v56, %v305_v48  ;;  %v3425_v9 = vcombine.low %v1427_v53, %v1437_v5  ;;  %v1445_v28 = vor.u32 %v1444_v11, %v1441_v8  ;;  %v1454_v29 = vrot.slane %v1452_v15, 4  ;;  %v4676_v5 = vld [vmem:[%s4506_s26 + $0x30] sm:$0xf] }
  0x31   : > { %3819 = vmatmul.mubr.bf16.vlgmr.msra.gmra.mrb[0].mxu1 %v3313_v43  ;;  %v318_v63 = vrot.slane %v316_v50, 4  ;;  %v324_v0 = vrot.slane %v322_v51, 5  ;;  %v330_v30 = vshll.u32 %v4633_v4, 16  ;;  %v1460_v37 = vrot.slane %v1458_v20, 5 }
  0x32   : > { %3835 = vmatpush3.bf16.msra.mxu1 %v4292_v2  ;;  %v1448_v2 = vshll.u32 %v4619_v52, 16  ;;  %v310_v18 = vrot.slane %v309_v6, 4  ;;  %3947 = vmatmul.mubr.bf16.vlgmr.msra.gmra.mrb[0].mxu0 %v3425_v9  ;;  %v329_v38 = vrot.slane %v327_v21, 4  ;;  %v336_v40 = vshll.u32 %v4640_v16, 16  ;;  %v4682_v9 = vld [vmem:[%s4506_s26 + $0x34] sm:$0xf] }
  0x33   : > { %3836 = vmatprep.subr.bf16.mxu1 %v4294_v46  ;;  %v319_v10 = vor.u32 %v318_v63, %v314_v62  ;;  %3963 = vmatpush3.bf16.msra.mxu0 %v4583_v3  ;;  %v1446_v44 = vrot.slane %v1445_v28, 4  ;;  %v332_v3 = vrot.slane %v330_v30, 5  ;;  %v340_v48 = vshrl.u32 %v4640_v16, 16 }
  0x34   : > { %v1450_v19 = vrot.slane %v1448_v2, 5  ;;  %v315_v35 = vsel %vm4551_vm2, %v310_v18, %v314_v62  ;;  %3964 = vmatprep.subr.bf16.mxu0 %v4295_v60  ;;  %v338_v47 = vrot.slane %v336_v40, 5  ;;  %v346_v49 = vshll.u32 %v4643_v17, 16 }
  0x35   : > { %v320_v27 = vrot.slane %v319_v10, 4  ;;  %v333_v53 = vor.u32 %v332_v3, %v329_v38  ;;  %v1463_v56 = vshrl.u32 %v3409_v22, 16  ;;  %v342_v62 = vrot.slane %v340_v48, 4  ;;  %v4707_v48 = vld [vmem:[%s4506_s26 + $0x40] sm:$0xf] }
  0x36   : > { %3837 = vmatpush3.bf16.msra.mxu1 %v4294_v46  ;;  %v1455_v45 = vor.u32 %v1454_v29, %v1450_v19  ;;  %v1451_v50 = vsel %vm4551_vm2, %v1446_v44, %v1450_v19  ;;  %v348_v63 = vrot.slane %v346_v49, 5  ;;  %v1472_v1 = vshll.u32 %v4650_v31, 16  ;;  %v4692_v29 = vld [vmem:[%s4506_s26 + $0x38] sm:$0x1]  ;;  %v3412_v44 = vld [vmem:[%s4506_s26 + $0x3c] sm:$0xf] }
  0x37   : > { %3838 = vmatprep.subr.bf16.mxu1 %v4296_v59  ;;  %v325_v43 = vsel %vm4551_vm2, %v320_v27, %v324_v0  ;;  %3965 = vmatpush3.bf16.msra.mxu0 %v4295_v60  ;;  %v1466_v0 = vshll.u32 %v3409_v22, 16  ;;  %v334_v8 = vrot.slane %v333_v53, 4  ;;  %v1465_v2 = vrot.slane %v1463_v56, 4  ;;  %v4300_v60 = vld [vmem:[%s5545_s1 + $0x20] sm:$0xff]   ;;  %v4304_v56 = vld [vmem:[%s5545_s1 + $0x30] sm:$0xff]  }
  0x38   : > { %v3314_v46 = vcombine.low %v315_v35, %v325_v43  ;;  %v1456_v51 = vrot.slane %v1455_v45, 4  ;;  %3966 = vmatprep.subr.bf16.mxu0 %v4297_v32  ;;  %v343_v11 = vor.u32 %v342_v62, %v338_v47  ;;  %v1474_v18 = vrot.slane %v1472_v1, 5 }
  0x39   : > { %v1468_v15 = vrot.slane %v1466_v0, 5  ;;  %v339_v19 = vsel %vm4551_vm2, %v334_v8, %v338_v47  ;;  %v1482_v21 = vshll.u32 %v4669_v55, 16  ;;  %v351_v22 = vshrl.u32 %v4676_v5, 16  ;;  %v4716_v0 = vld [vmem:[%s4506_s26 + $0x44] sm:$0x1]  ;;  %v4303_v8 = vld [vmem:[%s5545_s1 + $0x168] sm:$0xff]  }
  0x3a   : > { %3839 = vmatpush3.bf16.msra.mxu1 %v4296_v59  ;;  %3822 = vmatprep.mubr.bf16.mxu1 %v3314_v46  ;;  %v1461_v6 = vsel %vm4551_vm2, %v1456_v51, %v1460_v37  ;;  %v1476_v59 = vshrl.u32 %v4650_v31, 16  ;;  %v344_v27 = vrot.slane %v343_v11, 4  ;;  %v354_v30 = vshll.u32 %v4676_v5, 16  ;;  %v4302_v37 = vld [vmem:[%s5545_s1 + $0x28] sm:$0xff]   ;;  %v4728_v11 = vld [vmem:[%s4506_s26 + $0x40] sm:$0xf] }
  0x3b   : > { %3840 = vmatprep.subr.bf16.mxu1 %v4298_v42  ;;  %v3426_v10 = vcombine.low %v1451_v50, %v1461_v6  ;;  %v1469_v28 = vor.u32 %v1468_v15, %v1465_v2  ;;  %3967 = vmatpush3.bf16.msra.mxu0 %v4297_v32  ;;  %v360_v35 = vshll.u32 %v4682_v9, 16  ;;  %v1484_v40 = vrot.slane %v1482_v21, 5  ;;  %v4301_v32 = vld [vmem:[%s5545_s1 + $0x160] sm:$0xff]  }
  0x3c   : > { %v1478_v20 = vrot.slane %v1476_v59, 4  ;;  %3968 = vmatprep.subr.bf16.mxu0 %v4299_v58  ;;  %v364_v43 = vshrl.u32 %v4682_v9, 16  ;;  %v349_v45 = vsel %vm4551_vm2, %v344_v27, %v348_v63  ;;  %v356_v46 = vrot.slane %v354_v30, 5  ;;  %v4731_v21 = vld [vmem:[%s4506_s26 + $0x44] sm:$0x1] }
  0x3d   : > { %3950 = vmatprep.mubr.bf16.mxu0 %v3426_v10  ;;  %v1470_v3 = vrot.slane %v1469_v28, 4  ;;  %v362_v47 = vrot.slane %v360_v35, 5  ;;  %v3315_v49 = vcombine.low %v339_v19, %v349_v45  ;;  %v370_v53 = vshll.u32 %v4692_v29, 16  ;;  %v4725_v10 = vld [vmem:[%s4506_s26 + $0x3c] sm:$0xf]  ;;  %5552 = vst [vmem:[#allocation2_spill] sm:$0xff] %v4731_v21 }
  0x3e   : > { %3841 = vmatpush3.bf16.msra.mxu1 %v4298_v42  ;;  %v1479_v38 = vor.u32 %v1478_v20, %v1474_v18  ;;  %v353_v42 = vrot.slane %v351_v22, 4  ;;  %v366_v51 = vrot.slane %v364_v43, 4  ;;  %v1487_v1 = vshrl.u32 %v3412_v44, 16  ;;  %v4306_v22 = vld [vmem:[%s5545_s1 + $0x38] sm:$0xff]   ;;  %v4744_v45 = vld [vmem:[%s4506_s26 + $0x4c] sm:$0xf] }
  0x3f   : > { %3842 = vmatprep.subr.bf16.mxu1 %v4300_v60  ;;  %v1475_v62 = vsel %vm4551_vm2, %v1470_v3, %v1474_v18  ;;  %3969 = vmatpush3.bf16.msra.mxu0 %v4299_v58  ;;  %v1490_v6 = vshll.u32 %v3412_v44, 16  ;;  %v1496_v58 = vshll.u32 %v4707_v48, 16  ;;  %v1500_v30 = vshrl.u32 %v4707_v48, 16 }
  0x40   : > { %v1480_v50 = vrot.slane %v1479_v38, 4  ;;  %v357_v63 = vor.u32 %v356_v46, %v353_v42  ;;  %3823 = vmatmul.mubr.bf16.gmra.mrb[4].mxu1 %v3315_v49  ;;  %v367_v59 = vor.u32 %v366_v51, %v362_v47  ;;  %3970 = vmatprep.subr.bf16.mxu0 %v4301_v32  ;;  %v1489_v19 = vrot.slane %v1487_v1, 4  ;;  %v3415_v38 = vld [vmem:[%s4506_s26 + $0x48] sm:$0xf] }
  0x41   : > { %v1492_v20 = vrot.slane %v1490_v6, 5  ;;  %v1498_v28 = vrot.slane %v1496_v58, 5  ;;  %v1506_v35 = vshll.u32 %v4716_v0, 16  ;;  %v375_v43 = vshrl.u32 %v4725_v10, 16 }
  0x42   : > { %3843 = vmatpush3.bf16.msra.mxu1 %v4300_v60  ;;  %v1485_v2 = vsel %vm4551_vm2, %v1480_v50, %v1484_v40  ;;  %v372_v60 = vrot.slane %v370_v53, 5  ;;  %v358_v18 = vrot.slane %v357_v63, 4  ;;  %v368_v27 = vrot.slane %v367_v59, 4 }
  0x43   : > { %3844 = vmatprep.subr.bf16.mxu1 %v4302_v37  ;;  %v3427_v15 = vcombine.low %v1475_v62, %v1485_v2  ;;  %v1493_v42 = vor.u32 %v1492_v20, %v1489_v19  ;;  %v378_v44 = vshll.u32 %v4725_v10, 16  ;;  %v1502_v46 = vrot.slane %v1500_v30, 4  ;;  %3971 = vmatpush3.bf16.msra.mxu0 %v4301_v32  ;;  %v4305_v62 = vld [vmem:[%s5545_s1 + $0x170] sm:$0xff]  }
  0x44   : > { %v363_v40 = vsel %vm4551_vm2, %v358_v18, %v362_v47  ;;  %v373_v3 = vsel %vm4551_vm2, %v368_v27, %v372_v60  ;;  %v1508_v49 = vrot.slane %v1506_v35, 5  ;;  %v384_v50 = vshll.u32 %v4728_v11, 16  ;;  %3972 = vmatprep.subr.bf16.mxu0 %v4303_v8  ;;  %v4757_v60 = vld [vmem:[%s4506_s26 + $0x50] sm:$0x1]  ;;  %v4762_v18 = vld [vmem:[%s5545_s1 + $0x80] sm:$0xff]  }
  0x45   : > { %3951 = vmatmul.mubr.bf16.gmra.mrb[4].mxu0 %v3427_v15  ;;  %v1494_v51 = vrot.slane %v1493_v42, 4  ;;  %v377_v47 = vrot.slane %v375_v43, 4  ;;  %v380_v53 = vrot.slane %v378_v44, 5  ;;  %v1503_v63 = vor.u32 %v1502_v46, %v1498_v28  ;;  %v4770_v42 = vld [vmem:[%s4506_s26 + $0x48] sm:$0xf] }
  0x46   : > { %3845 = vmatpush3.bf16.msra.mxu1 %v4302_v37  ;;  %v3316_v37 = vcombine.low %v363_v40, %v373_v3  ;;  %v386_v1 = vrot.slane %v384_v50, 5  ;;  %v388_v6 = vshrl.u32 %v4728_v11, 16  ;;  %v394_v2 = vshll.u32 %v4731_v21, 16  ;;  %v4776_v46 = vld [vmem:[%s4506_s26 + $0x4c] sm:$0xf] }
  0x47   : > { %3846 = vmatprep.subr.bf16.mxu1 %v4304_v56  ;;  %v1499_v32 = vsel %vm4551_vm2, %v1494_v51, %v1498_v28  ;;  %v381_v59 = vor.u32 %v380_v53, %v377_v47  ;;  %v1511_v58 = vshrl.u32 %v3415_v38, 16  ;;  %v1514_v15 = vshll.u32 %v3415_v38, 16  ;;  %3973 = vmatpush3.bf16.msra.mxu0 %v4303_v8  ;;  %v4307_v28 = vld [vmem:[%s5545_s1 + $0x178] sm:$0xff]   ;;  %v4781_v53 = vld [vmem:[%s4506_s26 + $0x50] sm:$0x1] }
  0x48   : > { %3826 = vmatprep.mubr.bf16.mxu1 %v3316_v37  ;;  %v1504_v19 = vrot.slane %v1503_v63, 4  ;;  %v390_v20 = vrot.slane %v388_v6, 4  ;;  %v1520_v27 = vshll.u32 %v4744_v45, 16  ;;  %v1524_v40 = vshrl.u32 %v4744_v45, 16  ;;  %3974 = vmatprep.subr.bf16.mxu0 %v4305_v62  ;;  %5553 = vst [vmem:[#allocation3_spill] sm:$0xff] %v4781_v53 }
  0x49   : > { %v382_v30 = vrot.slane %v381_v59, 4  ;;  %v1513_v35 = vrot.slane %v1511_v58, 4  ;;  %v1516_v38 = vrot.slane %v1514_v15, 5  ;;  %v1530_v8 = vshll.u32 %v4757_v60, 16  ;;  %v3418_v63 = vld [vmem:[%s4506_s26 + $0x54] sm:$0xf] }
  0x4a   : > { %3847 = vmatpush3.bf16.msra.mxu1 %v4304_v56  ;;  %v396_v56 = vrot.slane %v394_v2, 5  ;;  %v1509_v43 = vsel %vm4551_vm2, %v1504_v19, %v1508_v49  ;;  %v391_v44 = vor.u32 %v390_v20, %v386_v1  ;;  %v1522_v3 = vrot.slane %v1520_v27, 5  ;;  %v4792_v15 = vld [vmem:[%s5545_s1 + $0x180] sm:$0xff]  }
  0x4b   : > { %3848 = vmatprep.subr.bf16.mxu1 %v4306_v22  ;;  %v3428_v50 = vcombine.low %v1499_v32, %v1509_v43  ;;  %v387_v37 = vsel %vm4551_vm2, %v382_v30, %v386_v1  ;;  %v1517_v51 = vor.u32 %v1516_v38, %v1513_v35  ;;  %v1526_v47 = vrot.slane %v1524_v40, 4  ;;  %3975 = vmatpush3.bf16.msra.mxu0 %v4305_v62  ;;  %v4798_v30 = vld [vmem:[%s4506_s26 + $0x58] sm:$0xf] }
  0x4c   : > { %v392_v6 = vrot.slane %v391_v44, 4  ;;  %v1532_v49 = vrot.slane %v1530_v8, 5  ;;  %v399_v2 = vshrl.u32 %v4770_v42, 16  ;;  %v402_v59 = vshll.u32 %v4770_v42, 16  ;;  %3976 = vmatprep.subr.bf16.mxu0 %v4307_v28  ;;  %v4803_v44 = vld [vmem:[%s4506_s26 + $0x5c] sm:$0x1] }
  0x4d   : > { %3954 = vmatprep.mubr.bf16.mxu0 %v3428_v50  ;;  %v1527_v1 = vor.u32 %v1526_v47, %v1522_v3  ;;  %v408_v32 = vshll.u32 %v4776_v46, 16  ;;  %v412_v58 = vshrl.u32 %v4776_v46, 16  ;;  %v418_v27 = vshll.u32 %v4781_v53, 16  ;;  %v4806_v8 = vld [vmem:[%s4506_s26 + $0x54] sm:$0xf] }
  0x4e   : > { %3849 = vmatpush3.bf16.msra.mxu1 %v4306_v22  ;;  %v1518_v22 = vrot.slane %v1517_v51, 4  ;;  %v397_v19 = vsel %vm4551_vm2, %v392_v6, %v396_v56  ;;  %v401_v62 = vrot.slane %v399_v2, 4  ;;  %v404_v20 = vrot.slane %v402_v59, 5  ;;  %v4809_v6 = vld [vmem:[%s4506_s26 + $0x58] sm:$0xf] }
  0x4f   : > { %3866 = vmatprep.subr.bf16.mxu1 %v4762_v18  ;;  %v3317_v35 = vcombine.low %v387_v37, %v397_v19  ;;  %v1528_v40 = vrot.slane %v1527_v1, 4  ;;  %v410_v43 = vrot.slane %v408_v32, 5  ;;  %v414_v51 = vrot.slane %v412_v58, 4  ;;  %3977 = vmatpush3.bf16.msra.mxu0 %v4307_v28  ;;  %v4833_v53 = vld [vmem:[%s4506_s26 + $0x68] sm:$0x1] }
  0x50   : > { %v1523_v38 = vsel %vm4551_vm2, %v1518_v22, %v1522_v3  ;;  %v405_v50 = vor.u32 %v404_v20, %v401_v62  ;;  %v420_v47 = vrot.slane %v418_v27, 5  ;;  %v1535_v56 = vshrl.u32 %v3418_v63, 16  ;;  %3994 = vmatprep.subr.bf16.mxu0 %v4792_v15  ;;  %v4818_v20 = vld [vmem:[%s4506_s26 + $0x5c] sm:$0x1] }
  0x51   : > { %3827 = vmatmul.mubr.bf16.gmra.mrb[8].mxu1 %v3317_v35  ;;  %v1533_v37 = vsel %vm4551_vm2, %v1528_v40, %v1532_v49  ;;  %v1538_v3 = vshll.u32 %v3418_v63, 16  ;;  %v1544_v2 = vshll.u32 %v4798_v30, 16  ;;  %v1548_v59 = vshrl.u32 %v4798_v30, 16  ;;  %v3421_v63 = vld [vmem:[%s4506_s26 + $0x60] sm:$0xf] }
  0x52   : > { %v3429_v22 = vcombine.low %v1523_v38, %v1533_v37  ;;  %v406_v1 = vrot.slane %v405_v50, 4  ;;  %v415_v32 = vor.u32 %v414_v51, %v410_v43  ;;  %v1537_v58 = vrot.slane %v1535_v56, 4 }
  0x53   : > { %v1540_v28 = vrot.slane %v1538_v3, 5  ;;  %v1546_v19 = vrot.slane %v1544_v2, 5  ;;  %v1550_v62 = vrot.slane %v1548_v59, 4  ;;  %v1554_v49 = vshll.u32 %v4803_v44, 16  ;;  %v4827_v3 = vld [vmem:[%s4506_s26 + $0x64] sm:$0xf] }
  0x54   : > { %3955 = vmatmul.mubr.bf16.gmra.mrb[8].mxu0 %v3429_v22  ;;  %v411_v27 = vsel %vm4551_vm2, %v406_v1, %v410_v43  ;;  %v416_v35 = vrot.slane %v415_v32, 4  ;;  %v423_v38 = vshrl.u32 %v4806_v8, 16  ;;  %v426_v40 = vshll.u32 %v4806_v8, 16 }
  0x55   : > { %v1541_v50 = vor.u32 %v1540_v28, %v1537_v58  ;;  %v1551_v51 = vor.u32 %v1550_v62, %v1546_v19  ;;  %v1556_v56 = vrot.slane %v1554_v49, 5  ;;  %v432_v37 = vshll.u32 %v4809_v6, 16  ;;  %v3440_v58 = vld [vmem:[%s4506_s26 + $0xc] sm:$0xe] }
  0x56   : > { %v421_v2 = vsel %vm4551_vm2, %v416_v35, %v420_v47  ;;  %v425_v59 = vrot.slane %v423_v38, 4  ;;  %v428_v22 = vrot.slane %v426_v40, 5  ;;  %v436_v43 = vshrl.u32 %v4809_v6, 16 }
  0x57   : > { %v3318_v1 = vcombine.low %v411_v27, %v421_v2  ;;  %v1542_v32 = vrot.slane %v1541_v50, 4  ;;  %v1552_v26 = vrot.slane %v1551_v51, 4  ;;  %v434_v39 = vrot.slane %v432_v37, 5 }
  0x58   : > { %v429_v28 = vor.u32 %v428_v22, %v425_v59  ;;  %v438_v62 = vrot.slane %v436_v43, 4  ;;  %v442_v49 = vshll.u32 %v4818_v20, 16  ;;  %v1559_v21 = vshrl.u32 %v3421_v63, 16 }
  0x59   : > { %3830 = vmatprep.mubr.bf16.mxu1 %v3318_v1  ;;  %v1547_v47 = vsel %vm4551_vm2, %v1542_v32, %v1546_v19  ;;  %v1557_v35 = vsel %vm4551_vm2, %v1552_v26, %v1556_v56  ;;  %v1562_v38 = vshll.u32 %v3421_v63, 16  ;;  %v1568_v27 = vshll.u32 %v4827_v3, 16 }
  0x5a   : > { %v3430_v40 = vcombine.low %v1547_v47, %v1557_v35  ;;  %v430_v50 = vrot.slane %v429_v28, 4  ;;  %v439_v51 = vor.u32 %v438_v62, %v434_v39  ;;  %v444_v37 = vrot.slane %v442_v49, 5  ;;  %v3441_v49 = vld [vmem:[%s4506_s26 + $0x18] sm:$0xe]  ;;  %v3442_v47 = vld [vmem:[%s4506_s26 + $0x24] sm:$0xe] }
  0x5b   : > { %v1561_v2 = vrot.slane %v1559_v21, 4  ;;  %v1564_v59 = vrot.slane %v1562_v38, 5  ;;  %v1570_v22 = vrot.slane %v1568_v27, 5  ;;  %v1572_v43 = vshrl.u32 %v4827_v3, 16 }
  0x5c   : > { %3958 = vmatprep.mubr.bf16.mxu0 %v3430_v40  ;;  %v435_v19 = vsel %vm4551_vm2, %v430_v50, %v434_v39  ;;  %v440_v1 = vrot.slane %v439_v51, 4  ;;  %v1578_v26 = vshll.u32 %v4833_v53, 16  ;;  %v3448_v63 = vrot.slane %v3440_v58, 9 }
  0x5d   : > { %v1565_v56 = vor.u32 %v1564_v59, %v1561_v2  ;;  %v1574_v32 = vrot.slane %v1572_v43, 4  ;;  %v1825_v21 = vrot.slane %v4530_v23, 5  ;;  %v3328_v39 = vcombine.low %v4515_v12, %v4518_v13 }
  0x5e   : > { %v445_v62 = vsel %vm4551_vm2, %v440_v1, %v444_v37  ;;  %v1580_v27 = vrot.slane %v1578_v26, 5  ;;  %v1839_v37 = vrot.slane %v4619_v52, 5  ;;  %v5556_v12 = vrot.slane %v4575_v61, 5  ;;  %v4898_v61 = vld [vmem:[%s4506_s26 + $0x48] sm:$0xe] }
  0x5f   : > { %v3319_v35 = vcombine.low %v435_v19, %v445_v62  ;;  %v1566_v58 = vrot.slane %v1565_v56, 4  ;;  %v1575_v38 = vor.u32 %v1574_v32, %v1570_v22  ;;  %v1826_v40 = vsel %vm4848_vm5, %v3448_v63, %v1825_v21  ;;  %v3443_v63 = vld [vmem:[%s4506_s26 + $0x30] sm:$0xe] }
  0x60   : > { %v1827_v50 = vrot.slane %v1825_v21, 4  ;;  %v1834_v13 = vrot.slane %v5556_v12, 4  ;;  %v1835_v2 = vrot.slane %v4587_v7, 5  ;;  %v5557_v59 = vrot.slane %v4533_v24, 5 }
  0x61   : > { %3831 = vmatmul.mubr.bf16.gmra.mrb[12].mxu1 %v3319_v35  ;;  %v1571_v23 = vsel %vm4551_vm2, %v1566_v58, %v1570_v22  ;;  %v1576_v51 = vrot.slane %v1575_v38, 4  ;;  %v3449_v22 = vrot.slane %v3441_v49, 9  ;;  %v3450_v26 = vrot.slane %v3442_v47, 9  ;;  %v3444_v49 = vld [vmem:[%s4506_s26 + $0x3c] sm:$0xe]  ;;  %v4312_v35 = vld [vmem:[%s5545_s1 + $0x88] sm:$0xff]  }
  0x62   : > { %3850 = vmatprep.mubr.bf16.mxu1 %v3328_v39  ;;  %v1829_v43 = vsel %vm4848_vm5, %v1827_v50, %v5557_v59  ;;  %v1841_v56 = vrot.slane %v1839_v37, 4  ;;  %v1842_v32 = vrot.slane %v4624_v57, 5  ;;  %v864_v7 = vrot.slane %v4521_v14, 5 }
  0x63   : > { %v1581_v19 = vsel %vm4551_vm2, %v1576_v51, %v1580_v27  ;;  %v3456_v1 = vcombine.low %v1826_v40, %v1829_v43  ;;  %v871_v24 = vrot.slane %v4567_v54, 5  ;;  %v3329_v21 = vcombine.low %v4544_v34, %v4557_v41  ;;  %v4318_v43 = vld [vmem:[%s5545_s1 + $0x98] sm:$0xff]  }
  0x64   : > { %v3431_v52 = vcombine.low %v1571_v23, %v1581_v19  ;;  %v1836_v62 = vsel %vm4848_vm5, %v1834_v13, %v1835_v2  ;;  %v3330_v39 = vcombine.low %v4596_v25, %v4604_v33  ;;  %v5558_v47 = vmov %v5556_v12  ;;  %v4908_v23 = vld [vmem:[%s4506_s26 + $0x54] sm:$0xe] }
  0x65   : > { %v1833_v57 = vsel %vm4848_vm5, %v3449_v22, %v5558_v47  ;;  %v3451_v34 = vrot.slane %v3443_v63, 9  ;;  %v1846_v41 = vrot.slane %v4650_v31, 5  ;;  %v1853_v58 = vrot.slane %v4707_v48, 5  ;;  %v4313_v48 = vld [vmem:[%s5545_s1 + $0x188] sm:$0xff]  }
  0x66   : > { %3959 = vmatmul.mubr.bf16.gmra.mrb[12].mxu0 %v3431_v52  ;;  %v1840_v25 = vsel %vm4848_vm5, %v3450_v26, %v1839_v37  ;;  %v1843_v33 = vsel %vm4848_vm5, %v1841_v56, %v1842_v32  ;;  %v1849_v38 = vrot.slane %v4669_v55, 5  ;;  %v3452_v27 = vrot.slane %v3444_v49, 9  ;;  %v4911_v55 = vld [vmem:[%s4506_s26 + $0x60] sm:$0xe]  ;;  %v4938_v56 = vld [vmem:[%s4506_s26 + $0x4] sm:$0xf] }
  0x67   : > { %3978 = vmatprep.mubr.bf16.mxu0 %v3456_v1  ;;  %v1856_v40 = vrot.slane %v4716_v0, 5  ;;  %v1860_v50 = vrot.slane %v4744_v45, 5  ;;  %v3457_v31 = vcombine.low %v1833_v57, %v1836_v62  ;;  %v3458_v51 = vcombine.low %v1840_v25, %v1843_v33  ;;  %v4322_v49 = vld [vmem:[%s5545_s1 + $0xa0] sm:$0xff]   ;;  %v4993_v45 = vld [vmem:[%s4506_s26 + $0x18] sm:$0xe] }
  0x68   : > { %v1848_v37 = vrot.slane %v1846_v41, 4  ;;  %v1855_v12 = vrot.slane %v1853_v58, 4  ;;  %v3331_v0 = vcombine.low %v4633_v4, %v4640_v16  ;;  %v1847_v13 = vsel %vm4848_vm5, %v3451_v34, %v1846_v41  ;;  %v4961_v41 = vld [vmem:[%s4506_s26 + $0x10] sm:$0xf] }
  0x69   : > { %3851 = vmatmul.mubr.bf16.vlgmr.msra.gmra.mrb[0].mxu1 %v3329_v21  ;;  %v3332_v2 = vcombine.low %v4676_v5, %v4682_v9  ;;  %v3453_v59 = vrot.slane %v4898_v61, 9  ;;  %v1862_v4 = vrot.slane %v1860_v50, 4  ;;  %v1863_v19 = vrot.slane %v4757_v60, 5  ;;  %v4317_v5 = vld [vmem:[%s5545_s1 + $0x190] sm:$0xff]   ;;  %v832_v21 = vld [vmem:[%s4506_s26] sm:$0xe] }
  0x6a   : > { %3867 = vmatpush3.bf16.msra.mxu1 %v4762_v18  ;;  %3854 = vmatprep.mubr.bf16.mxu1 %v3330_v39  ;;  %v4316_v18 = vld [vmem:[%s5545_s1 + $0x90] sm:$0xff]   ;;  %v3454_v1 = vrot.slane %v4908_v23, 9  ;;  %v1867_v22 = vrot.slane %v4798_v30, 5  ;;  %v1870_v26 = vrot.slane %v4803_v44, 5  ;;  %v3455_v63 = vrot.slane %v4911_v55, 9 }
  0x6b   : > { %3868 = vmatprep.subr.bf16.mxu1 %v4312_v35  ;;  %v1874_v52 = vrot.slane %v4827_v3, 5  ;;  %v861_v60 = vrot.slane %v4938_v56, 5  ;;  %v1850_v30 = vsel %vm4848_vm5, %v1848_v37, %v1849_v38  ;;  %v1854_v32 = vsel %vm4848_vm5, %v3452_v27, %v1853_v58  ;;  %v835_v61 = vld [vmem:[%s4506_s26 + $0x24] sm:$0xe]  ;;  %v837_v56 = vld [vmem:[%s4506_s26 + $0x3c] sm:$0xe] }
  0x6c   : > { %v1857_v44 = vsel %vm4848_vm5, %v1855_v12, %v1856_v40  ;;  %v3459_v62 = vcombine.low %v1847_v13, %v1850_v30  ;;  %v1869_v47 = vrot.slane %v1867_v22, 4  ;;  %v1877_v57 = vrot.slane %v4833_v53, 5  ;;  %v4324_v40 = vld [vmem:[%s5545_s1 + $0xa8] sm:$0xff]   ;;  %v4374_v30 = vld [vmem:[%s4506_s26 + $0x1c] sm:$0xf]  ;;  %v4329_v53 = vld [vmem:[%s5545_s1 + $0x1b0] sm:$0xff]  }
  0x6d   : > { %v3460_v39 = vcombine.low %v1854_v32, %v1857_v44  ;;  %v3344_v34 = vrot.slane %v832_v21, 9  ;;  %v868_v58 = vrot.slane %v4961_v41, 5  ;;  %v882_v25 = vrot.slane %v4640_v16, 5  ;;  %v839_v41 = vld [vmem:[%s4506_s26 + $0x54] sm:$0xe] }
  0x6e   : > { %3979 = vmatmul.mubr.bf16.vlgmr.msra.gmra.mrb[0].mxu0 %v3457_v31  ;;  %3869 = vmatpush3.bf16.msra.mxu1 %v4312_v35  ;;  %v4958_v35 = vrot.slane %v1874_v52, 4  ;;  %v863_v33 = vrot.slane %v861_v60, 4  ;;  %v885_v38 = vrot.slane %v4643_v17, 5  ;;  %v3333_v27 = vcombine.low %v4725_v10, %v4728_v11 }
  0x6f   : > { %3995 = vmatpush3.bf16.msra.mxu0 %v4792_v15  ;;  %3982 = vmatprep.mubr.bf16.mxu0 %v3458_v51  ;;  %v4319_v15 = vld [vmem:[%s5545_s1 + $0x198] sm:$0xff]   ;;  %v3334_v31 = vcombine.low %v4770_v42, %v4776_v46  ;;  %v3347_v16 = vrot.slane %v835_v61, 9  ;;  %v884_v23 = vrot.slane %v882_v25, 4  ;;  %v1861_v17 = vsel %vm4848_vm5, %v3453_v59, %v1860_v50  ;;  %v4323_v51 = vld [vmem:[%s5545_s1 + $0x1a0] sm:$0xff]  }
  0x70   : > { %3996 = vmatprep.subr.bf16.mxu0 %v4313_v48  ;;  %3870 = vmatprep.subr.bf16.mxu1 %v4316_v18  ;;  %v1864_v10 = vsel %vm4848_vm5, %v1862_v4, %v1863_v19  ;;  %v1868_v42 = vsel %vm4848_vm5, %v3454_v1, %v1867_v22  ;;  %v1871_v37 = vsel %vm4848_vm5, %v1869_v47, %v1870_v26  ;;  %v889_v13 = vrot.slane %v4682_v9, 5  ;;  %v836_v4 = vld [vmem:[%s4506_s26 + $0x30] sm:$0xe]  ;;  %v4325_v1 = vld [vmem:[%s5545_s1 + $0x1a8] sm:$0xff]  }
  0x71   : > { %3855 = vmatmul.mubr.bf16.gmra.mrb[4].mxu1 %v3331_v0  ;;  %v4997_v50 = vsel %vm4848_vm5, %v3347_v16, %v882_v25  ;;  %v5001_v12 = vsel %vm4848_vm5, %v884_v23, %v885_v38  ;;  %v3335_v59 = vcombine.low %v4806_v8, %v4809_v6  ;;  %v892_v19 = vrot.slane %v4692_v29, 5  ;;  %v4328_v29 = vld [vmem:[%s5545_s1 + $0xb0] sm:$0xff]   ;;  %v5560_v38 = vld [vmem:[#allocation3_spill] sm:$0xff]  ;;  %v4331_v16 = vld [vmem:[%s5545_s1 + $0x1b8] sm:$0xff]  }
  0x72   : > { %3871 = vmatpush3.bf16.msra.mxu1 %v4316_v18  ;;  %3858 = vmatprep.mubr.bf16.mxu1 %v3332_v2  ;;  %v3355_v18 = vcombine.low %v4997_v50, %v5001_v12  ;;  %v3461_v2 = vcombine.low %v1861_v17, %v1864_v10  ;;  %v3462_v9 = vcombine.low %v1868_v42, %v1871_v37  ;;  %v3348_v8 = vrot.slane %v836_v4, 9  ;;  %v4344_v50 = vld [vmem:[%s4506_s26 + $0x48] sm:$0xff]   ;;  %v4345_v12 = vld [vmem:[%s5545_s1 + $0xe0] sm:$0xff]  }
  0x73   : > { %3997 = vmatpush3.bf16.msra.mxu0 %v4313_v48  ;;  %3872 = vmatprep.subr.bf16.mxu1 %v4318_v43  ;;  %v4977_v48 = vld [vmem:[%s4506_s26 + $0xc] sm:$0xe]  ;;  %v862_v22 = vsel %vm4848_vm5, %v3344_v34, %v861_v60  ;;  %v865_v26 = vsel %vm4848_vm5, %v863_v33, %v864_v7  ;;  %v875_v32 = vrot.slane %v4374_v30, 5  ;;  %v896_v44 = vrot.slane %v4728_v11, 5  ;;  %v5559_v60 = vld [vmem:[#allocation2_spill] sm:$0xff]  ;;  %v4330_v7 = vld [vmem:[%s5545_s1 + $0xb8] sm:$0xff]  }
  0x74   : > { %3998 = vmatprep.subr.bf16.mxu0 %v4317_v5  ;;  %v3345_v0 = vrot.slane %v4977_v48, 9  ;;  %v899_v21 = vrot.slane %v5559_v60, 5  ;;  %v1875_v11 = vsel %vm4848_vm5, %v3455_v63, %v1874_v52  ;;  %v1878_v3 = vsel %vm4848_vm5, %v4958_v35, %v1877_v57  ;;  %v838_v35 = vld [vmem:[%s4506_s26 + $0x48] sm:$0xe] }
  0x75   : > { %v898_v25 = vrot.slane %v896_v44, 4  ;;  %v3352_v55 = vcombine.low %v862_v22, %v865_v26  ;;  %v877_v52 = vrot.slane %v875_v32, 4  ;;  %v903_v61 = vrot.slane %v4776_v46, 5  ;;  %v5128_v26 = vld [vmem:[%s4506_s26 + $0x20] sm:$0x1] }
  0x76   : > { %3983 = vmatmul.mubr.bf16.gmra.mrb[4].mxu0 %v3459_v62  ;;  %3873 = vmatpush3.bf16.msra.mxu1 %v4318_v43  ;;  %v870_v43 = vrot.slane %v868_v58, 4  ;;  %v3346_v62 = vrot.slane %v4993_v45, 9  ;;  %v869_v46 = vsel %vm4848_vm5, %v3345_v0, %v868_v58  ;;  %v910_v10 = vrot.slane %v4809_v6, 5  ;;  %v4333_v6 = vld [vmem:[%s5545_s1 + $0xc0] sm:$0xff]  }
  0x77   : > { %3999 = vmatpush3.bf16.msra.mxu0 %v4317_v5  ;;  %3986 = vmatprep.mubr.bf16.mxu0 %v3460_v39  ;;  %v891_v5 = vrot.slane %v889_v13, 4  ;;  %v3349_v39 = vrot.slane %v837_v56, 9  ;;  %v5063_v33 = vsel %vm4848_vm5, %v898_v25, %v899_v21  ;;  %v905_v48 = vrot.slane %v903_v61, 4  ;;  %v4337_v56 = vld [vmem:[%s5545_s1 + $0x1c8] sm:$0xff]  }
  0x78   : > { %4000 = vmatprep.subr.bf16.mxu0 %v4319_v15  ;;  %3874 = vmatprep.subr.bf16.mxu1 %v4322_v49  ;;  %v872_v23 = vsel %vm4848_vm5, %v870_v43, %v871_v24  ;;  %v876_v17 = vsel %vm4848_vm5, %v3346_v62, %v875_v32  ;;  %v913_v58 = vrot.slane %v4818_v20, 5  ;;  %v3351_v37 = vrot.slane %v839_v41, 9  ;;  %v4336_v43 = vld [vmem:[%s5545_s1 + $0xc8] sm:$0xff]   ;;  %v3507_v62 = vld [vmem:[%s4506_s26 + $0x24] sm:$0xf] }
  0x79   : > { %3859 = vmatmul.mubr.bf16.gmra.mrb[8].mxu1 %v3333_v27  ;;  %v5038_v14 = vsel %vm4848_vm5, %v891_v5, %v892_v19  ;;  %v5059_v63 = vsel %vm4848_vm5, %v3349_v39, %v896_v44  ;;  %v906_v27 = vrot.slane %v5560_v38, 5  ;;  %v912_v45 = vrot.slane %v910_v10, 4  ;;  %v4335_v19 = vld [vmem:[%s5545_s1 + $0x1c0] sm:$0xff]   ;;  %v4339_v44 = vld [vmem:[%s5545_s1 + $0xd0] sm:$0xff]   ;;  %v5149_v25 = vld [vmem:[%s4506_s26 + $0x28] sm:$0xf] }
  0x7a   : > { %3875 = vmatpush3.bf16.msra.mxu1 %v4322_v49  ;;  %3862 = vmatprep.mubr.bf16.mxu1 %v3334_v31  ;;  %v4375_v49 = vld [vmem:[%s4506_s26 + $0x20] sm:$0x1]  ;;  %v3357_v57 = vcombine.low %v5059_v63, %v5063_v33  ;;  %v3350_v31 = vrot.slane %v838_v35, 9  ;;  %v3353_v0 = vcombine.low %v869_v46, %v872_v23  ;;  %v4334_v5 = vld [vmem:[%s4506_s26 + $0x24] sm:$0xff]   ;;  %v4341_v39 = vld [vmem:[%s5545_s1 + $0x1d0] sm:$0xff]  }
  0x7b   : > { %4001 = vmatpush3.bf16.msra.mxu0 %v4319_v15  ;;  %3876 = vmatprep.subr.bf16.mxu1 %v4324_v40  ;;  %v5034_v15 = vsel %vm4848_vm5, %v3348_v8, %v889_v13  ;;  %v878_v47 = vrot.slane %v4375_v49, 5  ;;  %v5098_v24 = vsel %vm4848_vm5, %v905_v48, %v906_v27  ;;  %v5107_v13 = vsel %vm4848_vm5, %v3351_v37, %v910_v10  ;;  %v4340_v35 = vld [vmem:[%s4506_s26 + $0x3c] sm:$0xff]   ;;  %v5168_v46 = vld [vmem:[%s4506_s26 + $0x34] sm:$0xf]  ;;  %v5191_v37 = vld [vmem:[%s4506_s26 + $0x38] sm:$0x1] }
  0x7c   : > { %4002 = vmatprep.subr.bf16.mxu0 %v4323_v51  ;;  %v3356_v34 = vcombine.low %v5034_v15, %v5038_v14  ;;  %v5094_v54 = vsel %vm4848_vm5, %v3350_v31, %v903_v61  ;;  %v4343_v38 = vld [vmem:[%s5545_s1 + $0x1d8] sm:$0xff]   ;;  %v2388_v27 = vshll.u32 %v5149_v25, 16  ;;  %v2412_v41 = vshll.u32 %v5168_v46, 16 }
  0x7d   : > { %v879_v42 = vsel %vm4848_vm5, %v877_v52, %v878_v47  ;;  %v3358_v20 = vcombine.low %v5094_v54, %v5098_v24  ;;  %v2382_v52 = vshll.u32 %v3507_v62, 16  ;;  %v2416_v10 = vshrl.u32 %v5168_v46, 16  ;;  %v4349_v54 = vld [vmem:[%s5545_s1 + $0x1e8] sm:$0xff]   ;;  %v4351_v24 = vld [vmem:[%s5545_s1 + $0xf0] sm:$0xff]  }
  0x7e   : > { %3987 = vmatmul.mubr.bf16.gmra.mrb[8].mxu0 %v3461_v2  ;;  %3877 = vmatpush3.bf16.msra.mxu1 %v4324_v40  ;;  %v3463_v40 = vcombine.low %v1875_v11, %v1878_v3  ;;  %v3354_v2 = vcombine.low %v876_v17, %v879_v42  ;;  %v4342_v11 = vld [vmem:[%s5545_s1 + $0xd8] sm:$0xff]   ;;  %v5152_v3 = vld [vmem:[%s4506_s26 + $0x2c] sm:$0x1]  ;;  %v2803_v36 = vrot.slane %v5168_v46, 5 }
  0x7f   : > { %4003 = vmatpush3.bf16.msra.mxu0 %v4323_v51  ;;  %3990 = vmatprep.mubr.bf16.mxu0 %v3462_v9  ;;  %v4332_v51 = vld [vmem:[%s4506_s26 + $0x18] sm:$0xff]   ;;  %v2398_v48 = vshll.u32 %v5152_v3, 16  ;;  %v2799_v46 = vrot.slane %v5152_v3, 5 }
  0x80   : > { %4004 = vmatprep.subr.bf16.mxu0 %v4325_v1  ;;  %3878 = vmatprep.subr.bf16.mxu1 %v4328_v29  ;;  %v5123_v9 = vld [vmem:[%s4506_s26 + $0x1c] sm:$0xf] }
  0x81   : > { %3863 = vmatmul.mubr.bf16.gmra.mrb[12].mxu1 %v3335_v59  ;;  %v5111_v59 = vsel %vm4848_vm5, %v912_v45, %v913_v58  ;;  %v2364_v30 = vshll.u32 %v5123_v9, 16  ;;  %v2368_v32 = vshrl.u32 %v5123_v9, 16  ;;  %v4347_v58 = vld [vmem:[%s5545_s1 + $0x1e0] sm:$0xff]  }
  0x82   : > { %3879 = vmatpush3.bf16.msra.mxu1 %v4328_v29  ;;  %3882 = vmatprep.mubr.bf16.mxu1 %v3352_v55  ;;  %v3359_v4 = vcombine.low %v5107_v13, %v5111_v59  ;;  %v4338_v29 = vld [vmem:[%s4506_s26 + $0x30] sm:$0xff]   ;;  %v2379_v55 = vshrl.u32 %v3507_v62, 16  ;;  %v5235_v62 = vrot.slane %v2398_v48, 5 }
  0x83   : > { %4005 = vmatpush3.bf16.msra.mxu0 %v4325_v1  ;;  %3880 = vmatprep.subr.bf16.mxu1 %v4330_v7  ;;  %v3504_v1 = vld [vmem:[%s4506_s26 + $0x18] sm:$0xf]  ;;  %v5146_v49 = vrot.slane %v2364_v30, 5  ;;  %v2370_v47 = vrot.slane %v2368_v32, 4 }
  0x84   : > { %4006 = vmatprep.subr.bf16.mxu0 %v4329_v53  ;;  %v2355_v22 = vshrl.u32 %v3504_v1, 16  ;;  %v2358_v8 = vshll.u32 %v3504_v1, 16  ;;  %v2381_v14 = vrot.slane %v2379_v55, 4  ;;  %v4350_v1 = vld [vmem:[%s4506_s26 + $0x60] sm:$0xff]   ;;  %v4354_v55 = vld [vmem:[%s5545_s1 + $0xf8] sm:$0xff]  }
  0x86   : > { %3991 = vmatmul.mubr.bf16.gmra.mrb[12].mxu0 %v3463_v40  ;;  %3881 = vmatpush3.bf16.msra.mxu1 %v4330_v7  ;;  %v2357_v60 = vrot.slane %v2355_v22, 4  ;;  %v2360_v21 = vrot.slane %v2358_v8, 5  ;;  %v2374_v7 = vshll.u32 %v5128_v26, 16  ;;  %v2392_v40 = vshrl.u32 %v5149_v25, 16 }
  0x87   : > { %4007 = vmatpush3.bf16.msra.mxu0 %v4329_v53  ;;  %4010 = vmatprep.mubr.bf16.mxu0 %v4332_v51  ;;  %v3510_v53 = vld [vmem:[%s4506_s26 + $0x30] sm:$0xf]  ;;  %v5188_v51 = vrot.slane %v2388_v27, 5  ;;  %v5206_v8 = vrot.slane %v2412_v41, 5  ;;  %v5253_v27 = vld [vmem:[%s4506_s26 + $0x44] sm:$0x1] }
  0x88   : > { %4008 = vmatprep.subr.bf16.mxu0 %v4331_v16  ;;  %3898 = vmatprep.subr.bf16.mxu1 %v4333_v6  ;;  %v2361_v61 = vor.u32 %v2360_v21, %v2357_v60  ;;  %v2403_v31 = vshrl.u32 %v3510_v53, 16  ;;  %v5175_v15 = vrot.slane %v2374_v7, 5  ;;  %v2406_v17 = vshll.u32 %v3510_v53, 16 }
  0x89   : > { %3883 = vmatmul.mubr.bf16.vlgmr.msra.gmra.mrb[0].mxu1 %v3353_v0  ;;  %v2394_v42 = vrot.slane %v2392_v40, 4  ;;  %v3513_v0 = vld [vmem:[%s4506_s26 + $0x3c] sm:$0xf] }
  0x8a   : > { %3899 = vmatpush3.bf16.msra.mxu1 %v4333_v6  ;;  %3886 = vmatprep.mubr.bf16.mxu1 %v3354_v2  ;;  %v5181_v23 = vrot.slane %v2361_v61, 4  ;;  %v5195_v45 = vrot.slane %v2403_v31, 4  ;;  %v2408_v22 = vrot.slane %v2406_v17, 5  ;;  %v2427_v32 = vshrl.u32 %v3513_v0, 16  ;;  %v4352_v31 = vld [vmem:[%s4506_s26 + $0x6c] sm:$0xff]  }
  0x8b   : > { %4009 = vmatpush3.bf16.msra.mxu0 %v4331_v16  ;;  %3900 = vmatprep.subr.bf16.mxu1 %v4336_v43  ;;  %v4348_v16 = vld [vmem:[%s5545_s1 + $0xe8] sm:$0xff]   ;;  %v2395_v30 = vor.u32 %v2394_v42, %v5188_v51  ;;  %v2430_v63 = vshll.u32 %v3513_v0, 16 }
  0x8c   : > { %4026 = vmatprep.subr.bf16.mxu0 %v4335_v19  ;;  %v2409_v53 = vor.u32 %v2408_v22, %v5195_v45  ;;  %v2429_v40 = vrot.slane %v2427_v32, 4  ;;  %v4357_v45 = vld [vmem:[%s4506_s26 + $0x18] sm:$0xff]   ;;  %v5291_v32 = vld [vmem:[%s4506_s26 + $0x64] sm:$0xf] }
  0x8d   : > { %v5246_v61 = vrot.slane %v2395_v30, 4  ;;  %v3522_v30 = vld [vmem:[%s4506_s26 + $0x60] sm:$0xf] }
  0x8e   : > { %4011 = vmatmul.mubr.bf16.vlgmr.msra.gmra.mrb[0].mxu0 %v4334_v5  ;;  %3901 = vmatpush3.bf16.msra.mxu1 %v4336_v43  ;;  %v5199_v43 = vld [vmem:[%s4506_s26 + $0x40] sm:$0xf]  ;;  %v2418_v5 = vrot.slane %v2416_v10, 4  ;;  %v2410_v41 = vrot.slane %v2409_v53, 4  ;;  %v2446_v10 = vshll.u32 %v5253_v27, 16 }
  0x8f   : > { %4027 = vmatpush3.bf16.msra.mxu0 %v4335_v19  ;;  %4014 = vmatprep.mubr.bf16.mxu0 %v4338_v29  ;;  %v4346_v19 = vld [vmem:[%s4506_s26 + $0x54] sm:$0xff]   ;;  %v2422_v29 = vshll.u32 %v5191_v37, 16  ;;  %v2436_v33 = vshll.u32 %v5199_v43, 16  ;;  %v5319_v53 = vld [vmem:[%s4506_s26 + $0x5c] sm:$0x1] }
  0x90   : > { %4028 = vmatprep.subr.bf16.mxu0 %v4337_v56  ;;  %3902 = vmatprep.subr.bf16.mxu1 %v4339_v44 }
  0x91   : > { %3887 = vmatmul.mubr.bf16.gmra.mrb[4].mxu1 %v3355_v18  ;;  %v2371_v18 = vor.u32 %v2370_v47, %v5146_v49 }
  0x92   : > { %3903 = vmatpush3.bf16.msra.mxu1 %v4339_v44  ;;  %3890 = vmatprep.mubr.bf16.mxu1 %v3356_v34  ;;  %v2384_v34 = vrot.slane %v2382_v52, 5  ;;  %v5217_v44 = vld [vmem:[%s4506_s26 + $0x4c] sm:$0xf] }
  0x93   : > { %4029 = vmatpush3.bf16.msra.mxu0 %v4337_v56  ;;  %3904 = vmatprep.subr.bf16.mxu1 %v4342_v11  ;;  %v5193_v6 = vrot.slane %v2371_v18, 4  ;;  %v3516_v56 = vld [vmem:[%s4506_s26 + $0x48] sm:$0xf]  ;;  %v2460_v7 = vshll.u32 %v5217_v44, 16  ;;  %v2464_v47 = vshrl.u32 %v5217_v44, 16  ;;  %v4356_v52 = vld [vmem:[%s4506_s26 + $0xc] sm:$0xff]  }
  0x94   : > { %4030 = vmatprep.subr.bf16.mxu0 %v4341_v39  ;;  %v2385_v2 = vor.u32 %v2384_v34, %v2381_v14 }
  0x95   : > { %v2377_v60 = vsel %vm4551_vm2, %v5193_v6, %v5175_v15  ;;  %v5259_v15 = vld [vmem:[%s4506_s26 + $0x50] sm:$0x1]  ;;  %v5264_v48 = vrot.slane %v2460_v7, 5  ;;  %v5274_v6 = vld [vmem:[%s4506_s26 + $0x58] sm:$0xf] }
  0x96   : > { %4015 = vmatmul.mubr.bf16.gmra.mrb[4].mxu0 %v4340_v35  ;;  %3905 = vmatpush3.bf16.msra.mxu1 %v4342_v11  ;;  %v5233_v21 = vrot.slane %v2385_v2, 4  ;;  %v2454_v11 = vshll.u32 %v3516_v56, 16  ;;  %v2419_v35 = vor.u32 %v2418_v5, %v5206_v8  ;;  %v2470_v42 = vshll.u32 %v5259_v15, 16 }
  0x97   : > { %4031 = vmatpush3.bf16.msra.mxu0 %v4341_v39  ;;  %4018 = vmatprep.mubr.bf16.mxu0 %v4344_v50  ;;  %v2451_v39 = vshrl.u32 %v3516_v56, 16  ;;  %v2432_v50 = vrot.slane %v2430_v63, 5  ;;  %v2401_v2 = vsel %vm4551_vm2, %v5246_v61, %v5235_v62  ;;  %v2415_v63 = vsel %vm4551_vm2, %v2410_v41, %v5206_v8  ;;  %v5316_v61 = vld [vmem:[%s5545_s1 + $0x210] sm:$0xff]  }
  0x98   : > { %4032 = vmatprep.subr.bf16.mxu0 %v4343_v38  ;;  %3906 = vmatprep.subr.bf16.mxu1 %v4345_v12  ;;  %v2456_v34 = vrot.slane %v2454_v11, 5  ;;  %v2420_v13 = vrot.slane %v2419_v35, 4  ;;  %v2391_v0 = vsel %vm4551_vm2, %v5233_v21, %v5188_v51  ;;  %v4360_v51 = vld [vmem:[%s4506_s26 + $0x24] sm:$0xff]   ;;  %v2488_v56 = vshrl.u32 %v5274_v6, 16 }
  0x99   : > { %3891 = vmatmul.mubr.bf16.gmra.mrb[8].mxu1 %v3357_v57  ;;  %v2440_v57 = vshrl.u32 %v5199_v43, 16  ;;  %v2453_v14 = vrot.slane %v2451_v39, 4  ;;  %v2433_v59 = vor.u32 %v2432_v50, %v2429_v40  ;;  %v5309_v8 = vrot.slane %v2470_v42, 5  ;;  %v3525_v50 = vld [vmem:[%s4506_s26 + $0x6c] sm:$0xf] }
  0x9a   : > { %3907 = vmatpush3.bf16.msra.mxu1 %v4345_v12  ;;  %3894 = vmatprep.mubr.bf16.mxu1 %v3358_v20  ;;  %v2367_v20 = vsel %vm4551_vm2, %v5181_v23, %v5146_v49  ;;  %v4353_v49 = vld [vmem:[%s5545_s1 + $0x1f0] sm:$0xff]   ;;  %v5255_v12 = vrot.slane %v2436_v33, 5  ;;  %v4355_v23 = vld [vmem:[%s5545_s1 + $0x1f8] sm:$0xff]   ;;  %v5297_v33 = vrot.slane %v2446_v10, 5  ;;  %v2499_v21 = vshrl.u32 %v3522_v30, 16 }
  0x9b   : > { %4033 = vmatpush3.bf16.msra.mxu0 %v4343_v38  ;;  %3908 = vmatprep.subr.bf16.mxu1 %v4348_v16  ;;  %v5250_v38 = vrot.slane %v2422_v29, 5  ;;  %v2442_v18 = vrot.slane %v2440_v57, 4  ;;  %v3528_v17 = vcombine.low %v2367_v20, %v2377_v60  ;;  %v2484_v57 = vshll.u32 %v5274_v6, 16 }
  0x9c   : > { %4034 = vmatprep.subr.bf16.mxu0 %v4347_v58  ;;  %v2434_v20 = vrot.slane %v2433_v59, 4  ;;  %v2502_v62 = vshll.u32 %v3522_v30, 16  ;;  %v2508_v39 = vshll.u32 %v5291_v32, 16  ;;  %v2512_v11 = vshrl.u32 %v5291_v32, 16 }
  0x9d   : > { %v5321_v35 = vrot.slane %v2484_v57, 5  ;;  %v2523_v59 = vshrl.u32 %v3525_v50, 16 }
  0x9e   : > { %4019 = vmatmul.mubr.bf16.gmra.mrb[8].mxu0 %v4346_v19  ;;  %3909 = vmatpush3.bf16.msra.mxu1 %v4348_v16  ;;  %v2466_v16 = vrot.slane %v2464_v47, 4  ;;  %v4358_v19 = vld [vmem:[%s5545_s1 + $0x200] sm:$0xff]   ;;  %v2439_v41 = vsel %vm4551_vm2, %v2434_v20, %v5255_v12 }
  0x9f   : > { %4035 = vmatpush3.bf16.msra.mxu0 %v4347_v58  ;;  %4022 = vmatprep.mubr.bf16.mxu0 %v4350_v1  ;;  %v3519_v58 = vld [vmem:[%s4506_s26 + $0x54] sm:$0xf]  ;;  %v2457_v1 = vor.u32 %v2456_v34, %v2453_v14  ;;  %v2504_v14 = vrot.slane %v2502_v62, 5  ;;  %v5328_v34 = vrot.slane %v2508_v39, 5 }
  0xa0   : > { %4036 = vmatprep.subr.bf16.mxu0 %v4349_v54  ;;  %3910 = vmatprep.subr.bf16.mxu1 %v4351_v24  ;;  %v2467_v22 = vor.u32 %v2466_v16, %v5264_v48  ;;  %v2475_v5 = vshrl.u32 %v3519_v58, 16  ;;  %v2478_v29 = vshll.u32 %v3519_v58, 16  ;;  %v2514_v16 = vrot.slane %v2512_v11, 4  ;;  %v5338_v58 = vld [vmem:[%s4506_s26 + $0x68] sm:$0x1] }
  0xa1   : > { %3895 = vmatmul.mubr.bf16.gmra.mrb[12].mxu1 %v3359_v4  ;;  %v2443_v4 = vor.u32 %v2442_v18, %v5255_v12  ;;  %v2458_v7 = vrot.slane %v2457_v1, 4  ;;  %v5326_v18 = vld [vmem:[%s4506_s26 + $0x70] sm:$0xf]  ;;  %v5347_v12 = vld [vmem:[%s5545_s1 + $0x218] sm:$0xff]   ;;  %v2494_v1 = vshll.u32 %v5319_v53, 16 }
  0xa2   : > { %3911 = vmatpush3.bf16.msra.mxu1 %v4351_v24  ;;  %3914 = vmatprep.mubr.bf16.mxu1 %v4356_v52  ;;  %v2425_v24 = vsel %vm4551_vm2, %v2420_v13, %v5250_v38  ;;  %v2468_v47 = vrot.slane %v2467_v22, 4  ;;  %v3529_v52 = vcombine.low %v2391_v0, %v2401_v2  ;;  %v2490_v38 = vrot.slane %v2488_v56, 4  ;;  %v4364_v13 = vld [vmem:[%s4506_s26 + $0x3c] sm:$0xff]   ;;  %v3548_v11 = vld [vmem:[%s4506_s26 + $0x48] sm:$0xe] }
  0xa3   : > { %4037 = vmatpush3.bf16.msra.mxu0 %v4349_v54  ;;  %3912 = vmatprep.subr.bf16.mxu1 %v4354_v55  ;;  %v5304_v54 = vld [vmem:[%s5545_s1 + $0x208] sm:$0xff]   ;;  %v2444_v60 = vrot.slane %v2443_v4, 4  ;;  %v3530_v40 = vcombine.low %v2415_v63, %v2425_v24  ;;  %v2526_v4 = vshll.u32 %v3525_v50, 16  ;;  %v2532_v42 = vshll.u32 %v5326_v18, 16 }
  0xa4   : > { %4038 = vmatprep.subr.bf16.mxu0 %v4353_v49  ;;  %v2463_v0 = vsel %vm4551_vm2, %v2458_v7, %v5264_v48  ;;  %v2491_v2 = vor.u32 %v2490_v38, %v5321_v35  ;;  %v2496_v20 = vrot.slane %v2494_v1, 5  ;;  %v4365_v7 = vld [vmem:[%s4506_s26 + $0x48] sm:$0xff]  }
  0xa5   : > { %v2528_v63 = vrot.slane %v2526_v4, 5  ;;  %v4367_v50 = vld [vmem:[%s5545_s1 + $0x228] sm:$0xff]  }
  0xa6   : > { %4023 = vmatmul.mubr.bf16.gmra.mrb[12].mxu0 %v4352_v31  ;;  %3913 = vmatpush3.bf16.msra.mxu1 %v4354_v55  ;;  %v2480_v55 = vrot.slane %v2478_v29, 5  ;;  %v2501_v31 = vrot.slane %v2499_v21, 4  ;;  %v2518_v29 = vshll.u32 %v5338_v58, 16  ;;  %v2492_v24 = vrot.slane %v2491_v2, 4  ;;  %v4366_v21 = vld [vmem:[%s5545_s1 + $0x220] sm:$0xff]  }
  0xa7   : > { %4039 = vmatpush3.bf16.msra.mxu0 %v4353_v49  ;;  %4042 = vmatprep.mubr.bf16.mxu0 %v3528_v17  ;;  %v2477_v49 = vrot.slane %v2475_v5, 4  ;;  %v4361_v17 = vld [vmem:[%s4506_s26 + $0x30] sm:$0xff]   ;;  %v2515_v5 = vor.u32 %v2514_v16, %v5328_v34  ;;  %v3550_v2 = vld [vmem:[%s4506_s26 + $0x60] sm:$0xe] }
  0xa8   : > { %4040 = vmatprep.subr.bf16.mxu0 %v4355_v23  ;;  %4090 = vmatprep.subr.bf16.mxu1 %v4358_v19  ;;  %v2505_v22 = vor.u32 %v2504_v14, %v2501_v31  ;;  %v3556_v31 = vrot.slane %v3548_v11, 9 }
  0xa9   : > { %3915 = vmatmul.mubr.bf16.vlgmr.msra.gmra.mrb[0].mxu1 %v4357_v45  ;;  %v2481_v10 = vor.u32 %v2480_v55, %v2477_v49  ;;  %v2536_v45 = vshrl.u32 %v5326_v18, 16  ;;  %v2516_v39 = vrot.slane %v2515_v5, 4  ;;  %v4368_v49 = vld [vmem:[%s4506_s26 + $0x54] sm:$0xff]  }
  0xaa   : > { %4098 = vmatpush3.bf16.msra.mxu1 %v4358_v19  ;;  %3918 = vmatprep.mubr.bf16.mxu1 %v4360_v51  ;;  %v2525_v51 = vrot.slane %v2523_v59, 4  ;;  %v2506_v62 = vrot.slane %v2505_v22, 4 }
  0xab   : > { %4041 = vmatpush3.bf16.msra.mxu0 %v4355_v23  ;;  %4091 = vmatprep.subr.bf16.mxu1 %v5304_v54  ;;  %v2449_v23 = vsel %vm4551_vm2, %v2444_v60, %v5297_v33  ;;  %v2482_v30 = vrot.slane %v2481_v10, 4  ;;  %v5362_v33 = vrot.slane %v2532_v42, 5  ;;  %v2538_v57 = vrot.slane %v2536_v45, 4  ;;  %v5367_v60 = vld [vmem:[%s4506_s26 + $0x74] sm:$0x1] }
  0xac   : > { %4058 = vmatprep.subr.bf16.mxu0 %v4358_v19  ;;  %v3531_v48 = vcombine.low %v2439_v41, %v2449_v23  ;;  %v2529_v55 = vor.u32 %v2528_v63, %v2525_v51  ;;  %v2542_v38 = vshll.u32 %v5367_v60, 16  ;;  %v2511_v16 = vsel %vm4551_vm2, %v2506_v62, %v5328_v34  ;;  %v4371_v51 = vld [vmem:[%s5545_s1 + $0x238] sm:$0xff]  }
  0xad   : > { %v2792_v10 = vrot.slane %v5128_v26, 5  ;;  %v3549_v26 = vld [vmem:[%s4506_s26 + $0x54] sm:$0xe]  ;;  %v2831_v45 = vrot.slane %v5291_v32, 5  ;;  %v2796_v63 = vrot.slane %v5149_v25, 5  ;;  %v2841_v3 = vrot.slane %v5367_v60, 5 }
  0xae   : > { %4043 = vmatmul.mubr.bf16.vlgmr.msra.gmra.mrb[0].mxu0 %v3529_v52  ;;  %4099 = vmatpush3.bf16.msra.mxu1 %v5304_v54  ;;  %v2539_v52 = vor.u32 %v2538_v57, %v5362_v33  ;;  %v2544_v4 = vrot.slane %v2542_v38, 5  ;;  %v3558_v57 = vrot.slane %v3550_v2, 9 }
  0xaf   : > { %4059 = vmatpush3.bf16.msra.mxu0 %v4358_v19  ;;  %4046 = vmatprep.mubr.bf16.mxu0 %v3530_v40  ;;  %v2473_v19 = vsel %vm4551_vm2, %v2468_v47, %v5309_v8  ;;  %v2817_v8 = vrot.slane %v5217_v44, 5  ;;  %v2789_v47 = vrot.slane %v5123_v9, 5  ;;  %v2487_v44 = vsel %vm4551_vm2, %v2482_v30, %v5321_v35  ;;  %v3544_v40 = vld [vmem:[%s4506_s26 + $0x18] sm:$0xe]  ;;  %v3545_v30 = vld [vmem:[%s4506_s26 + $0x24] sm:$0xe] }
  0xb0   : > { %4060 = vmatprep.subr.bf16.mxu0 %v5304_v54  ;;  %4092 = vmatprep.subr.bf16.mxu1 %v5316_v61  ;;  %v3532_v56 = vcombine.low %v2463_v0, %v2473_v19  ;;  %v2497_v9 = vsel %vm4551_vm2, %v2492_v24, %v2496_v20  ;;  %v2820_v35 = vrot.slane %v5259_v15, 5  ;;  %v3552_v41 = vrot.slane %v3544_v40, 9  ;;  %v4370_v0 = vld [vmem:[%s5545_s1 + $0x230] sm:$0xff]   ;;  %v4369_v19 = vld [vmem:[%s4506_s26 + $0x60] sm:$0xff]  }
  0xb1   : > { %3919 = vmatmul.mubr.bf16.gmra.mrb[4].mxu1 %v4361_v17  ;;  %v2819_v14 = vrot.slane %v2817_v8, 4  ;;  %v2824_v17 = vrot.slane %v5274_v6, 5  ;;  %v2791_v23 = vrot.slane %v2789_v47, 4  ;;  %v3533_v15 = vcombine.low %v2487_v44, %v2497_v9 }
  0xb2   : > { %4100 = vmatpush3.bf16.msra.mxu1 %v5316_v61  ;;  %3922 = vmatprep.mubr.bf16.mxu1 %v4364_v13  ;;  %v2530_v13 = vrot.slane %v2529_v55, 4  ;;  %v2540_v59 = vrot.slane %v2539_v52, 4  ;;  %v2818_v42 = vsel %vm4848_vm5, %v3556_v31, %v2817_v8  ;;  %v2790_v22 = vsel %vm4848_vm5, %v3552_v41, %v2789_v47  ;;  %v3546_v8 = vld [vmem:[%s4506_s26 + $0x30] sm:$0xe] }
  0xb3   : > { %4061 = vmatpush3.bf16.msra.mxu0 %v5304_v54  ;;  %4093 = vmatprep.subr.bf16.mxu1 %v5347_v12  ;;  %v2520_v54 = vrot.slane %v2518_v29, 5  ;;  %v2821_v6 = vsel %vm4848_vm5, %v2819_v14, %v2820_v35  ;;  %v2826_v1 = vrot.slane %v2824_v17, 4  ;;  %v2793_v5 = vsel %vm4848_vm5, %v2791_v23, %v2792_v10  ;;  %v3547_v14 = vld [vmem:[%s4506_s26 + $0x3c] sm:$0xe] }
  0xb4   : > { %4062 = vmatprep.subr.bf16.mxu0 %v5316_v61  ;;  %v2535_v32 = vsel %vm4551_vm2, %v2530_v13, %v5362_v33  ;;  %v2545_v29 = vsel %vm4551_vm2, %v2540_v59, %v2544_v4  ;;  %v2834_v24 = vrot.slane %v5338_v58, 5  ;;  %v3553_v33 = vrot.slane %v3545_v30, 9 }
  0xb5   : > { %v3560_v62 = vcombine.low %v2790_v22, %v2793_v5  ;;  %v2838_v58 = vrot.slane %v5326_v18, 5  ;;  %v3554_v47 = vrot.slane %v3546_v8, 9  ;;  %v2805_v44 = vrot.slane %v2803_v36, 4 }
  0xb6   : > { %4047 = vmatmul.mubr.bf16.gmra.mrb[4].mxu0 %v3531_v48  ;;  %4101 = vmatpush3.bf16.msra.mxu1 %v5347_v12  ;;  %v3564_v48 = vcombine.low %v2818_v42, %v2821_v6  ;;  %v2797_v40 = vsel %vm4848_vm5, %v3553_v33, %v2796_v63  ;;  %v2813_v41 = vrot.slane %v5253_v27, 5 }
  0xb7   : > { %4063 = vmatpush3.bf16.msra.mxu0 %v5316_v61  ;;  %4050 = vmatprep.mubr.bf16.mxu0 %v3532_v56  ;;  %v2521_v61 = vsel %vm4551_vm2, %v2516_v39, %v2520_v54  ;;  %v2833_v56 = vrot.slane %v2831_v45, 4  ;;  %v2798_v39 = vrot.slane %v2796_v63, 4  ;;  %v2832_v54 = vsel %vm4848_vm5, %v3558_v57, %v2831_v45 }
  0xb8   : > { %4064 = vmatprep.subr.bf16.mxu0 %v5347_v12  ;;  %4094 = vmatprep.subr.bf16.mxu1 %v4366_v21  ;;  %v3534_v34 = vcombine.low %v2511_v16, %v2521_v61  ;;  %v2840_v38 = vrot.slane %v2838_v58, 4 }
  0xb9   : > { %3923 = vmatmul.mubr.bf16.gmra.mrb[8].mxu1 %v4365_v7  ;;  %v2835_v11 = vsel %vm4848_vm5, %v2833_v56, %v2834_v24  ;;  %v3551_v7 = vld [vmem:[%s4506_s26 + $0x6c] sm:$0xe]  ;;  %v2800_v9 = vsel %vm4848_vm5, %v2798_v39, %v2799_v46  ;;  %s3308_s26 = sshll.u32 %s4398_s12, 3 }
  0xba   : > { %4102 = vmatpush3.bf16.msra.mxu1 %v4366_v21  ;;  %3926 = vmatprep.mubr.bf16.mxu1 %v4368_v49  ;;  %v2806_v49 = vrot.slane %v5191_v37, 5  ;;  %v3566_v18 = vcombine.low %v2832_v54, %v2835_v11  ;;  %v3559_v52 = vrot.slane %v3551_v7, 9  ;;  %v2804_v37 = vsel %vm4848_vm5, %v3554_v47, %v2803_v36  ;;  %p202_p7 = scmp.lt.s32.totalorder %s3308_s26, 15 }
  0xbb   : > { %4065 = vmatpush3.bf16.msra.mxu0 %v5347_v12  ;;  %4095 = vmatprep.subr.bf16.mxu1 %v4367_v50  ;;  %v2827_v12 = vrot.slane %v5319_v53, 5  ;;  %v3557_v53 = vrot.slane %v3549_v26, 9  ;;  %v3561_v60 = vcombine.low %v2797_v40, %v2800_v9  ;;  %v2842_v16 = vsel %vm4848_vm5, %v2840_v38, %v2841_v3 }
  0xbc   : > { %4066 = vmatprep.subr.bf16.mxu0 %v4366_v21  ;;  %v2807_v31 = vsel %vm4848_vm5, %v2805_v44, %v2806_v49  ;;  %v2839_v35 = vsel %vm4848_vm5, %v3559_v52, %v2838_v58  ;;  %s5574_s26 = smov (!%p202_p7, %s3308_s26), 15 }
  0xbd   : > { %v2828_v20 = vsel %vm4848_vm5, %v2826_v1, %v2827_v12  ;;  %v2825_v25 = vsel %vm4848_vm5, %v3557_v53, %v2824_v17  ;;  %v3562_v61 = vcombine.low %v2804_v37, %v2807_v31  ;;  %v3567_v23 = vcombine.low %v2839_v35, %v2842_v16  ;;  %s3309_s11 = sshll.u32 %s5574_s26, 1 }
  0xbe   : > { %4051 = vmatmul.mubr.bf16.gmra.mrb[8].mxu0 %v3533_v15  ;;  %4103 = vmatpush3.bf16.msra.mxu1 %v4367_v50  ;;  %v3565_v55 = vcombine.low %v2825_v25, %v2828_v20  ;;  %s206_s20 = sadd.s32 %s3310_s19, %s3309_s11 }
  0xbf   : > { %4067 = vmatpush3.bf16.msra.mxu0 %v4366_v21  ;;  %4054 = vmatprep.mubr.bf16.mxu0 %v3534_v34  ;;  %v3535_v21 = vcombine.low %v2535_v32, %v2545_v29  ;;  %s3311_s13 = sshll.u32 %s206_s20, 2 }
  0xc0   : > { %4068 = vmatprep.subr.bf16.mxu0 %v4367_v50  ;;  %4096 = vmatprep.subr.bf16.mxu1 %v4370_v0  ;;  %s5499_s23 = scalar_lea.vmem %s5547_s3, %s3311_s13 }
  0xc1   : > { %3927 = vmatmul.mubr.bf16.gmra.mrb[12].mxu1 %v4369_v19 }
  0xc2   : > { %4104 = vmatpush3.bf16.msra.mxu1 %v4370_v0  ;;  %4082 = vmatprep.mubr.bf16.mxu1 %v3564_v48 }
  0xc3   : > { %4069 = vmatpush3.bf16.msra.mxu0 %v4367_v50  ;;  %4097 = vmatprep.subr.bf16.mxu1 %v4371_v51  ;;  %v2810_v50 = vrot.slane %v5199_v43, 5  ;;  %v3555_v43 = vrot.slane %v3547_v14, 9 }
  0xc4   : > { %4070 = vmatprep.subr.bf16.mxu0 %v4370_v0 }
  0xc5   : > { %v2812_v17 = vrot.slane %v2810_v50, 4  ;;  %v2811_v10 = vsel %vm4848_vm5, %v3555_v43, %v2810_v50 }
  0xc6   : > { %4055 = vmatmul.mubr.bf16.gmra.mrb[12].mxu0 %v3535_v21  ;;  %4105 = vmatpush3.bf16.msra.mxu1 %v4371_v51 }
  0xc7   : > { %4071 = vmatpush3.bf16.msra.mxu0 %v4370_v0  ;;  %4074 = vmatprep.mubr.bf16.mxu0 %v3560_v62  ;;  %v2814_v15 = vsel %vm4848_vm5, %v2812_v17, %v2813_v41  ;;  %v5484_v62 = vld [vmem:[%s5546_s2] ss:$0 sm:$0xff] }
  0xc8   : > { %4072 = vmatprep.subr.bf16.mxu0 %v4371_v51  ;;  %v3563_v13 = vcombine.low %v2811_v10, %v2814_v15 }
  0xc9   : > { %4083 = vmatmul.mubr.bf16.vlgmr.msra.gmra.mrb[16].mxu1 %v3565_v55 }
  0xca   : > { %4086 = vmatprep.mubr.bf16.mxu1 %v3566_v18 }
  0xcb   : > { %4073 = vmatpush3.bf16.msra.mxu0 %v4371_v51 }
  0xce   : > { %4075 = vmatmul.mubr.bf16.vlgmr.msra.gmra.mrb[0].mxu0 %v3561_v60 }
  0xcf   : > { %4078 = vmatprep.mubr.bf16.mxu0 %v3562_v61 }
  0xd1   : > { %4087 = vmatmul.mubr.bf16.gmra.mrb[20].mxu1 %v3567_v23 }
  0xd6   : > { %4079 = vmatmul.mubr.bf16.gmra.mrb[4].mxu0 %v3563_v13 }
 0x17c   : > { %v3916_v59 = vpop.f32.mrb[0].mxu1 }
 0x17d   : > { %v1287_v4 = vpop.f32.mrb[1].mxu1 }
 0x17e   : > { %v5462_v34 = vpop.f32.mrb[2].mxu1 }
 0x17f   : > { %v5464_v42 = vpop.f32.mrb[3].mxu1 }
 0x184   : > { %v5466_v27 = vpop.f32.mrb[4].mxu1 }
 0x185   : > { %v5468_v6 = vpop.f32.mrb[5].mxu1 }
 0x186   : > { %v5470_v26 = vpop.f32.mrb[6].mxu1 }
 0x187   : > { %v5472_v45 = vpop.f32.mrb[7].mxu1 }
 0x18c   : > { %v3924_v28 = vpop.f32.mrb[8].mxu1 }
 0x18d   : > { %v1319_v0 = vpop.f32.mrb[9].mxu1 }
 0x18e   : > { %v3925_v2 = vpop.f32.mrb[10].mxu1 }
 0x18f   : > { %v1322_v1 = vpop.f32.mrb[11].mxu1 }
 0x191   : > { %v4052_v12 = vpop.f32.mrb[8].mxu0 }
 0x192   : > { %v4114_v19 = vadd.f32 %v4052_v12, %v3924_v28  ;;  %v2708_v22 = vpop.f32.mrb[9].mxu0 }
 0x193   : > { %v4116_v5 = vadd.f32 %v2708_v22, %v1319_v0  ;;  %v4053_v32 = vpop.f32.mrb[10].mxu0 }
 0x194   : > { %v4118_v29 = vadd.f32 %v4053_v32, %v3925_v2  ;;  %v2711_v48 = vpop.f32.mrb[11].mxu0  ;;  %v3928_v30 = vpop.f32.mrb[12].mxu1 }
 0x195   : > { %v4120_v53 = vadd.f32 %v2711_v48, %v1322_v1  ;;  %v1335_v51 = vpop.f32.mrb[13].mxu1 }
 0x196   : > { %v3929_v63 = vpop.f32.mrb[14].mxu1 }
 0x197   : > { %v1338_v57 = vpop.f32.mrb[15].mxu1 }
 0x199   : > { %v4056_v56 = vpop.f32.mrb[12].mxu0 }
 0x19a   : > { %v5475_v24 = vadd.f32 %v4056_v56, %v3928_v30  ;;  %v2724_v36 = vpop.f32.mrb[13].mxu0 }
 0x19b   : > { %v5477_v33 = vadd.f32 %v2724_v36, %v1335_v51  ;;  %v4057_v20 = vpop.f32.mrb[14].mxu0 }
 0x19c   : > { %v5479_v8 = vadd.f32 %v4057_v20, %v3929_v63  ;;  %v2727_v21 = vpop.f32.mrb[15].mxu0  ;;  %v4084_v25 = vpop.f32.mrb[16].mxu1 }
 0x19d   : > { %v5487_v58 = vadd.f32 %v2727_v21, %v1338_v57  ;;  %v4115_v39 = vadd.f32 %v4114_v19, %v4084_v25  ;;  %v3005_v46 = vpop.f32.mrb[17].mxu1 }
 0x19e   : > { %v4117_v54 = vadd.f32 %v4116_v5, %v3005_v46  ;;  %v4085_v11 = vpop.f32.mrb[18].mxu1 }
 0x19f   : > { %v3069_v7 = vadd.f32 %v4115_v39, %v5484_v62  ;;  %v4119_v47 = vadd.f32 %v4118_v29, %v4085_v11  ;;  %v3008_v44 = vpop.f32.mrb[19].mxu1 }
 0x1a0   : > { %v3067_v49 = vadd.f32 %v4117_v54, %v5484_v62  ;;  %v4121_v55 = vadd.f32 %v4120_v53, %v3008_v44 }
 0x1a1   : > { %v4076_v18 = vpop.f32.mrb[0].mxu0  ;;  %vm3085_vm6 = vcmp.ge.f32.partialorder %v3069_v7, 0.0  ;;  %v3101_v52 = vmul.f32 0.2, %v3069_v7  ;;  %v3070_v38 = vadd.f32 %v4119_v47, %v5484_v62 }
 0x1a2   : > { %v4106_v3 = vadd.f32 %v4076_v18, %v3916_v59  ;;  %v2973_v40 = vpop.f32.mrb[1].mxu0  ;;  %vm3083_vm7 = vcmp.ge.f32.partialorder %v3067_v49, 0.0  ;;  %v3099_v9 = vmul.f32 0.2, %v3067_v49  ;;  %v3068_v50 = vadd.f32 %v4121_v55, %v5484_v62 }
 0x1a3   : > { %v3117_v37 = vsel %vm3085_vm6, %v3069_v7, %v3101_v52  ;;  %v4107_v31 = vadd.f32 %v2973_v40, %v1287_v4  ;;  %v4077_v14 = vpop.f32.mrb[2].mxu0  ;;  %vm3086_vm8 = vcmp.ge.f32.partialorder %v3070_v38, 0.0  ;;  %v3102_v60 = vmul.f32 0.2, %v3070_v38 }
 0x1a4   : > { %v3061_v35 = vadd.f32 %v4106_v3, %v5484_v62  ;;  %v3115_v16 = vsel %vm3083_vm7, %v3067_v49, %v3099_v9  ;;  %v4108_v61 = vadd.f32 %v4077_v14, %v5462_v34  ;;  %v2976_v43 = vpop.f32.mrb[3].mxu0  ;;  %vm3084_vm9 = vcmp.ge.f32.partialorder %v3068_v50, 0.0  ;;  %v4088_v17 = vpop.f32.mrb[20].mxu1 }
 0x1a5   : > { %v3059_v41 = vadd.f32 %v4107_v31, %v5484_v62  ;;  %v3118_v23 = vsel %vm3086_vm8, %v3070_v38, %v3102_v60  ;;  %v4109_v10 = vadd.f32 %v2976_v43, %v5464_v42  ;;  %v3100_v15 = vmul.f32 0.2, %v3068_v50  ;;  %v3021_v13 = vpop.f32.mrb[21].mxu1 }
 0x1a6   : > { %vm3077_vm10 = vcmp.ge.f32.partialorder %v3061_v35, 0.0  ;;  %v3093_v59 = vmul.f32 0.2, %v3061_v35  ;;  %v3062_v4 = vadd.f32 %v4108_v61, %v5484_v62  ;;  %v3639_v34 = vpack.c.bf16 %v3118_v23, %v3117_v37  ;;  %v4089_v28 = vpop.f32.mrb[22].mxu1 }
 0x1a7   : > { %vm3075_vm11 = vcmp.ge.f32.partialorder %v3059_v41, 0.0  ;;  %v3091_v0 = vmul.f32 0.2, %v3059_v41  ;;  %v3060_v2 = vadd.f32 %v4109_v10, %v5484_v62  ;;  %v3116_v1 = vsel %vm3084_vm9, %v3068_v50, %v3100_v15  ;;  %v3024_v12 = vpop.f32.mrb[23].mxu1 }
 0x1a8   : > { %v3109_v19 = vsel %vm3077_vm10, %v3061_v35, %v3093_v59  ;;  %vm3078_vm12 = vcmp.ge.f32.partialorder %v3062_v4, 0.0  ;;  %v3094_v42 = vmul.f32 0.2, %v3062_v4  ;;  %3655 = vst [vmem:[%s5499_s23 + $0x28] sm:$0xff] %v3639_v34   ;;  %v3634_v22 = vpack.c.bf16 %v3116_v1, %v3115_v16 }
 0x1a9   : > { %v3107_v5 = vsel %vm3075_vm11, %v3059_v41, %v3091_v0  ;;  %vm3076_vm13 = vcmp.ge.f32.partialorder %v3060_v2, 0.0  ;;  %v3092_v32 = vmul.f32 0.2, %v3060_v2  ;;  %v4080_v29 = vpop.f32.mrb[4].mxu0  ;;  %v4123_v48 = vadd.f32 %v5475_v24, %v4088_v17 }
 0x1aa   : > { %v3110_v30 = vsel %vm3078_vm12, %v3062_v4, %v3094_v42  ;;  %3654 = vst [vmem:[%s5499_s23 + $0x20] sm:$0xff] %v3634_v22   ;;  %v4110_v53 = vadd.f32 %v4080_v29, %v5466_v27  ;;  %v2989_v51 = vpop.f32.mrb[5].mxu0  ;;  %v4125_v63 = vadd.f32 %v5477_v33, %v3021_v13  ;;  %v4127_v57 = vadd.f32 %v5479_v8, %v4089_v28 }
 0x1ab   : > { %v3619_v56 = vpack.c.bf16 %v3110_v30, %v3109_v19  ;;  %v3108_v36 = vsel %vm3076_vm13, %v3060_v2, %v3092_v32  ;;  %v3073_v20 = vadd.f32 %v4123_v48, %v5484_v62  ;;  %v4111_v21 = vadd.f32 %v2989_v51, %v5468_v6  ;;  %v4081_v25 = vpop.f32.mrb[6].mxu0 }
 0x1ac   : > { %v3614_v39 = vpack.c.bf16 %v3108_v36, %v3107_v5  ;;  %v3065_v24 = vadd.f32 %v4110_v53, %v5484_v62  ;;  %v4112_v46 = vadd.f32 %v4081_v25, %v5470_v26  ;;  %v2992_v54 = vpop.f32.mrb[7].mxu0  ;;  %v3074_v27 = vadd.f32 %v4127_v57, %v5484_v62 }
 0x1ad   : > { %3651 = vst [vmem:[%s5499_s23 + $0x8] sm:$0xff] %v3619_v56   ;;  %v3105_v33 = vmul.f32 0.2, %v3073_v20  ;;  %v3063_v8 = vadd.f32 %v4111_v21, %v5484_v62  ;;  %vm3089_vm14 = vcmp.ge.f32.partialorder %v3073_v20, 0.0  ;;  %v3071_v6 = vadd.f32 %v4125_v63, %v5484_v62 }
 0x1ae   : > { %3615 = vst [vmem:[%s5499_s23] sm:$0xff] %v3614_v39   ;;  %v3097_v11 = vmul.f32 0.2, %v3065_v24  ;;  %v3066_v7 = vadd.f32 %v4112_v46, %v5484_v62  ;;  %vm3081_vm15 = vcmp.ge.f32.partialorder %v3065_v24, 0.0  ;;  %vm3090_vm0 = vcmp.ge.f32.partialorder %v3074_v27, 0.0 }
 0x1af   : > { %v3106_v47 = vmul.f32 0.2, %v3074_v27  ;;  %v4113_v44 = vadd.f32 %v2992_v54, %v5472_v45  ;;  %v3121_v49 = vsel %vm3089_vm14, %v3073_v20, %v3105_v33  ;;  %v3095_v55 = vmul.f32 0.2, %v3063_v8 }
 0x1b0   : > { %vm3082_vm1 = vcmp.ge.f32.partialorder %v3066_v7, 0.0  ;;  %v3098_v26 = vmul.f32 0.2, %v3066_v7  ;;  %v4129_v52 = vadd.f32 %v5487_v58, %v3024_v12  ;;  %v3113_v38 = vsel %vm3081_vm15, %v3065_v24, %v3097_v11 }
 0x1b1   : > { %v3122_v18 = vsel %vm3090_vm0, %v3074_v27, %v3106_v47  ;;  %v3064_v9 = vadd.f32 %v4113_v44, %v5484_v62  ;;  %vm3079_vm2 = vcmp.ge.f32.partialorder %v3063_v8, 0.0  ;;  %v3103_v50 = vmul.f32 0.2, %v3071_v6 }
 0x1b2   : > { %v3114_v3 = vsel %vm3082_vm1, %v3066_v7, %v3098_v26  ;;  %v3649_v40 = vpack.c.bf16 %v3122_v18, %v3121_v49  ;;  %v3072_v31 = vadd.f32 %v4129_v52, %v5484_v62  ;;  %vm3087_vm3 = vcmp.ge.f32.partialorder %v3071_v6, 0.0 }
 0x1b3   : > { %v3629_v37 = vpack.c.bf16 %v3114_v3, %v3113_v38  ;;  %vm3080_vm4 = vcmp.ge.f32.partialorder %v3064_v9, 0.0  ;;  %v3096_v45 = vmul.f32 0.2, %v3064_v9  ;;  %v3111_v58 = vsel %vm3079_vm2, %v3063_v8, %v3095_v55 }
 0x1b4   : > { %3657 = vst [vmem:[%s5499_s23 + $0x38] sm:$0xff] %v3649_v40   ;;  %vm3088_vm5 = vcmp.ge.f32.partialorder %v3072_v31, 0.0  ;;  %v3104_v14 = vmul.f32 0.2, %v3072_v31  ;;  %v3119_v35 = vsel %vm3087_vm3, %v3071_v6, %v3103_v50 }
 0x1b5   : > { %3653 = vst [vmem:[%s5499_s23 + $0x18] sm:$0xff] %v3629_v37   ;;  %v3112_v60 = vsel %vm3080_vm4, %v3064_v9, %v3096_v45 }
 0x1b6   : > { %v3624_v16 = vpack.c.bf16 %v3112_v60, %v3111_v58  ;;  %v3120_v61 = vsel %vm3088_vm5, %v3072_v31, %v3104_v14 }
 0x1b7   : > { %v3644_v43 = vpack.c.bf16 %v3120_v61, %v3119_v35 }
 0x1b8   : > { %3652 = vst [vmem:[%s5499_s23 + $0x10] sm:$0xff] %v3624_v16  }
 0x1b9   : > { %3656 = vst [vmem:[%s5499_s23 + $0x30] sm:$0xff] %v3644_v43  }
 0x1ba PF: > { %s13_s16 = sadd.s32 1, %s4414_s16   ;;  %s5561_s12 = smov %s4406_s14 }
 0x1bb   : > { %p10_p8 = scmp.ge.s32.totalorder %s13_s16, 6   ;;  %s5562_s13 = smov %s4410_s15 }
 0x1bc   : > { %s5563_s14 = smov %s5566_s17  ;;  %s5564_s15 = smov %s5570_s18 }
 0x1bd   :  { %12 = sbr.rel (!%p10_p8) target bundleno = 3 (0x3), region = 64 }

</bundles_post_ra>
